<compile_context>
chip_gen: v5e
topology: v5e:2x2
jax: 0.10.0
libtpu: 0.0.40
codegen_flags: <defaults>
</compile_context>

<pallas_src>
import functools

import jax
import jax.numpy as jnp
from jax import lax
from jax.experimental import pallas as pl
from jax.experimental.pallas import tpu as pltpu


# ----------------------------------------------------------------------------
# Kernel: one grid step = one (batch, view_i, view_j) angular view.
# ----------------------------------------------------------------------------
def _recon_view_kernel(x_ref, w_ref, s_ref, o_ref, pad_ref, *, P, Q, r):
    # x_ref:   (1, 1, 1, P, Q, Cin)  input sub-grid for this angular view
    # w_ref:   (3, 3, Cin, r*r)      PreConv weights with FinalConv folded in
    # s_ref:   (r*Q, Q*r)            constant 0/1 column-interleave matrix
    # o_ref:   (1, 1, P*r, Q*r)      this view's contiguous tile of the output
    # pad_ref: (P+2, Q+2, Cin)       VMEM scratch with a 1-pixel zero halo
    r2 = r * r
    Cin = x_ref.shape[-1]
    dt = pad_ref.dtype

    # Zero only the 1-pixel halo ring (O(perimeter), not a full-tile memset).
    pad_ref[0:1, :, :] = jnp.zeros((1, Q + 2, Cin), dt)
    pad_ref[P + 1:P + 2, :, :] = jnp.zeros((1, Q + 2, Cin), dt)
    pad_ref[:, 0:1, :] = jnp.zeros((P + 2, 1, Cin), dt)
    pad_ref[:, Q + 1:Q + 2, :] = jnp.zeros((P + 2, 1, Cin), dt)
    pad_ref[1:P + 1, 1:Q + 1, :] = x_ref[0, 0, 0]

    # Dense 3x3 conv on the (P, Q) view: 9 accumulating MXU matmuls, f32 acc,
    # no concatenated im2col matrix.
    # TODO(synk): for large Cin, switch to weight-as-LHS (r2, Cin) x (Cin, P*Q)
    # so the wide spatial axis sits on the MXU N dimension.
    acc = jnp.zeros((P * Q, r2), jnp.float32)
    for kh in range(3):
        for kw in range(3):
            win = pad_ref[kh:kh + P, kw:kw + Q, :]            # (P, Q, Cin)
            col = win.reshape(P * Q, Cin)                     # merge leading dims
            acc = acc + jnp.dot(col, w_ref[kh, kw],
                                preferred_element_type=jnp.float32)

    # On-chip MacPI2SAI + PixelShuffle for this view:
    #   tile[p*r + ri, q*r + rj] = acc[p*Q + q, ri*r + rj]
    y = acc.reshape(P, Q, r2)
    y = jnp.swapaxes(y, 1, 2)                                 # (P, r2, Q)
    y = y.reshape(P, r, r, Q)                                 # (P, ri, rj, Q)
    m = jnp.concatenate(                                      # (P*r, r*Q)
        [y[:, :, rj, :].reshape(P * r, Q) for rj in range(r)], axis=1)
    # Column interleave (q, rj) -> q*r + rj via one small MXU matmul against a
    # constant 0/1 matrix; result is the final lane-dense (P*r, Q*r) tile.
    tile = jnp.dot(m, s_ref[...], preferred_element_type=jnp.float32)
    o_ref[0, 0] = tile.astype(o_ref.dtype)


def _column_shuffle_matrix(Q, r):
    # S[rj*Q + q, q*r + rj] = 1
    c = jnp.arange(r * Q)
    rj, q = c // Q, c % Q
    m = q * r + rj
    return (m[:, None] == jnp.arange(Q * r)[None, :]).astype(jnp.float32)


def _vmem_limit_bytes(P, Q, Cin, r, itemsize):
    r2 = r * r
    in_blk = P * Q * Cin * itemsize
    out_blk = P * r * Q * r * itemsize
    pad = (P + 2) * (Q + 2) * Cin * itemsize
    shuf = (r * Q) * (Q * r) * 4
    f32_tmp = (P * Q * r2 + 2 * P * r * Q * r + P * r * r * Q) * 4
    need = 3 * (in_blk + out_blk) + pad + shuf + f32_tmp + (1 << 20)
    return int(min(64 * 2 ** 20, max(8 * 2 ** 20, need)))


def fused_recon_views(x_views, w_fused, shuf, P, Q, r):
    # x_views: (B, a, a, P, Q, Cin); w_fused: (3, 3, Cin, r^2); shuf: (r*Q, Q*r)
    B, ang, _, _, _, Cin = x_views.shape
    r2 = r * r
    kernel = functools.partial(_recon_view_kernel, P=P, Q=Q, r=r)
    # TODO(synk): add an H-band grid axis over P (with a 1-row halo) for very
    # large images so the per-step footprint stays well under v7x's 64 MiB VMEM.
    return pl.pallas_call(
        kernel,
        out_shape=jax.ShapeDtypeStruct((B, ang, P * r, ang * Q * r),
                                       x_views.dtype),
        grid_spec=pltpu.PrefetchScalarGridSpec(
            num_scalar_prefetch=0,
            grid=(B, ang, ang),
            in_specs=[
                pl.BlockSpec((1, 1, 1, P, Q, Cin),
                             lambda b, i, j: (b, i, j, 0, 0, 0)),
                pl.BlockSpec((3, 3, Cin, r2), lambda b, i, j: (0, 0, 0, 0)),
                pl.BlockSpec((r * Q, Q * r), lambda b, i, j: (0, 0)),
            ],
            out_specs=pl.BlockSpec((1, 1, P * r, Q * r),
                                   lambda b, i, j: (b, i, 0, j)),
            scratch_shapes=[
                pltpu.VMEM((P + 2, Q + 2, Cin), x_views.dtype),
            ],
        ),
        compiler_params=pltpu.CompilerParams(
            dimension_semantics=("parallel", "parallel", "parallel"),
            vmem_limit_bytes=_vmem_limit_bytes(P, Q, Cin, r,
                                               x_views.dtype.itemsize),
        ),
    )(x_views, w_fused, shuf)


# ----------------------------------------------------------------------------
# Host-side weight folding: FinalConv(1x1) folded through PixelShuffle /
# MacPI2SAI (pure permutations) into the PreConv weights.
# ----------------------------------------------------------------------------
def fold_weights(w_pre_hwio, w_final_c1, r):
    kh, kw, cin, cout = w_pre_hwio.shape
    r2 = r * r
    C = cout // r2
    w = w_pre_hwio.reshape(kh, kw, cin, C, r2)               # out ch = c*r^2 + rc
    return jnp.einsum("hwicr,c->hwir", w, w_final_c1[:, 0])  # (3, 3, Cin, r^2)


def recon_block_forward(x_nchw, w_pre_hwio, w_final_c1, ang, upscale):
    B, Cin, H, W = x_nchw.shape
    r = upscale
    P, Q = H // ang, W // ang
    assert H % ang == 0 and W % ang == 0
    # Lane-dense final-layout stores: per-view output width must be a lane-tile
    # multiple when angRes > 1.
    # TODO(synk): support unaligned widths via a padded out buffer + crop.
    assert ang == 1 or (Q * r) % 128 == 0, "need (W//angRes)*upscale % 128 == 0"

    w_fused = fold_weights(w_pre_hwio, w_final_c1, r).astype(x_nchw.dtype)
    # Per-view rearrangement of the (small) input; the r^2x larger output is
    # written directly in its final layout by the kernel (no output transpose).
    # TODO(synk): fold this gather into the kernel via manual strided DMA.
    xv = x_nchw.reshape(B, Cin, P, ang, Q, ang).transpose(0, 3, 5, 2, 4, 1)
    shuf = _column_shuffle_matrix(Q, r)

    out = fused_recon_views(xv, w_fused, shuf, P, Q, r)      # (B, a, P*r, a*Q*r)
    # Pure row-major dim-merge (no data movement) to the final NCHW shape.
    return out.reshape(B, 1, H * r, W * r)


# ----------------------------------------------------------------------------
# Pure-JAX reference following the PyTorch NCHW semantics literally.
# ----------------------------------------------------------------------------
def ref_forward_nchw(x, w_pre_hwio, w_final_c1, ang, r):
    w_oihw = jnp.transpose(w_pre_hwio, (3, 2, 0, 1))
    buf = lax.conv_general_dilated(
        x, w_oihw, (1, 1), [(ang, ang), (ang, ang)],
        rhs_dilation=(ang, ang),
        dimension_numbers=("NCHW", "OIHW", "NCHW"))
    rows = []
    for i in range(ang):
        cols = [buf[:, :, i::ang, j::ang] for j in range(ang)]
        rows.append(jnp.concatenate(cols, axis=3))
    sai = jnp.concatenate(rows, axis=2)
    B, Cr2, H, W = sai.shape
    C = Cr2 // (r * r)
    hr = sai.reshape(B, C, r, r, H, W).transpose(0, 1, 4, 2, 5, 3)
    hr = hr.reshape(B, C, H * r, W * r)
    return jnp.einsum("bchw,c->bhw", hr, w_final_c1[:, 0])[:, None, :, :]


if __name__ == "__main__":
    angRes = 2
    channels = 4
    upscale_factor = 2
    # W chosen so the per-view output width (W//angRes)*upscale = 128 is a full
    # lane tile (lane-dense, aligned final-layout stores).
    B, H, W = 2, 16, 128

    key = jax.random.PRNGKey(0)
    k1, k2, k3 = jax.random.split(key, 3)
    x = jax.random.normal(k1, (B, channels, H, W), jnp.float32)
    w_pre = 0.1 * jax.random.normal(
        k2, (3, 3, channels, channels * upscale_factor ** 2), jnp.float32)
    w_final = 0.1 * jax.random.normal(k3, (channels, 1), jnp.float32)

    fwd = jax.jit(recon_block_forward, static_argnums=(3, 4))

    out = jax.block_until_ready(fwd(x, w_pre, w_final, angRes, upscale_factor))
    assert out.shape == (B, 1, H * upscale_factor, W * upscale_factor)
    ref = ref_forward_nchw(x, w_pre, w_final, angRes, upscale_factor)
    assert jnp.allclose(out, ref, atol=1e-4, rtol=1e-4), "f32 mismatch vs reference"

    # bf16 inputs/outputs (halves HBM traffic; f32 accumulation kept in-kernel).
    out_bf = jax.block_until_ready(
        fwd(x.astype(jnp.bfloat16), w_pre, w_final, angRes, upscale_factor))
    assert out_bf.dtype == jnp.bfloat16
    assert jnp.allclose(out_bf.astype(jnp.float32), ref, atol=5e-2, rtol=5e-2), \
        "bf16 mismatch vs reference"

    print("KERNEL_OK")
</pallas_src>

<mosaic_0001>
module attributes {stable_mosaic.version = 11 : i64} {
  func.func @_recon_view_kernel(%arg0: i32, %arg1: i32, %arg2: i32, %arg3: memref<1x1x1x8x64x4xf32, #tpu.memory_space<vmem>>, %arg4: memref<3x3x4x4xf32, #tpu.memory_space<vmem>>, %arg5: memref<128x128xf32, #tpu.memory_space<vmem>>, %arg6: memref<1x1x16x128xf32, #tpu.memory_space<vmem>>, %arg7: memref<10x66x4xf32, #tpu.memory_space<vmem>>) attributes {dimension_semantics = [#tpu.dimension_semantics<parallel>, #tpu.dimension_semantics<parallel>, #tpu.dimension_semantics<parallel>], iteration_bounds = array<i64: 2, 2, 2>, scalar_prefetch = 0 : i64, scratch_operands = 1 : i64, tpu.core_type = #tpu.core_type<tc>, window_params = [{transform_indices = @transform_0, window_bounds = array<i64: 1, 1, 1, 8, 64, 4>}, {pipeline_mode = #tpu.pipeline_mode<synchronous>, transform_indices = @transform_1, window_bounds = array<i64: 3, 3, 4, 4>}, {pipeline_mode = #tpu.pipeline_mode<synchronous>, transform_indices = @transform_2, window_bounds = array<i64: 128, 128>}, {transform_indices = @transform_3, window_bounds = array<i64: 1, 1, 16, 128>}]} {
    %cst = arith.constant 0.000000e+00 : f32
    %0 = vector.broadcast %cst : f32 to vector<1x66x4xf32>
    %c0 = arith.constant 0 : index
    %c0_0 = arith.constant 0 : index
    %c0_1 = arith.constant 0 : index
    %1 = vector.load %arg7[%c0, %c0_0, %c0_1] : memref<10x66x4xf32, #tpu.memory_space<vmem>>, vector<1x66x4xf32>
    tpu.vector_store %arg7[%c0, %c0_0, %c0_1], %0 {strides = array<i32>} : memref<10x66x4xf32, #tpu.memory_space<vmem>>, vector<1x66x4xf32>,
    %cst_2 = arith.constant 0.000000e+00 : f32
    %2 = vector.broadcast %cst_2 : f32 to vector<1x66x4xf32>
    %c9 = arith.constant 9 : index
    %c0_3 = arith.constant 0 : index
    %c0_4 = arith.constant 0 : index
    %3 = vector.load %arg7[%c9, %c0_3, %c0_4] : memref<10x66x4xf32, #tpu.memory_space<vmem>>, vector<1x66x4xf32>
    tpu.vector_store %arg7[%c9, %c0_3, %c0_4], %2 {strides = array<i32>} : memref<10x66x4xf32, #tpu.memory_space<vmem>>, vector<1x66x4xf32>,
    %cst_5 = arith.constant 0.000000e+00 : f32
    %4 = vector.broadcast %cst_5 : f32 to vector<10x1x4xf32>
    %c0_6 = arith.constant 0 : index
    %c0_7 = arith.constant 0 : index
    %c0_8 = arith.constant 0 : index
    %5 = vector.load %arg7[%c0_6, %c0_7, %c0_8] : memref<10x66x4xf32, #tpu.memory_space<vmem>>, vector<10x1x4xf32>
    tpu.vector_store %arg7[%c0_6, %c0_7, %c0_8], %4 {strides = array<i32>} : memref<10x66x4xf32, #tpu.memory_space<vmem>>, vector<10x1x4xf32>,
    %cst_9 = arith.constant 0.000000e+00 : f32
    %6 = vector.broadcast %cst_9 : f32 to vector<10x1x4xf32>
    %c0_10 = arith.constant 0 : index
    %c65 = arith.constant 65 : index
    %c0_11 = arith.constant 0 : index
    %7 = vector.load %arg7[%c0_10, %c65, %c0_11] : memref<10x66x4xf32, #tpu.memory_space<vmem>>, vector<10x1x4xf32>
    tpu.vector_store %arg7[%c0_10, %c65, %c0_11], %6 {strides = array<i32>} : memref<10x66x4xf32, #tpu.memory_space<vmem>>, vector<10x1x4xf32>,
    %c0_12 = arith.constant 0 : index
    %c0_13 = arith.constant 0 : index
    %c0_14 = arith.constant 0 : index
    %c0_15 = arith.constant 0 : index
    %c0_16 = arith.constant 0 : index
    %c0_17 = arith.constant 0 : index
    %8 = vector.load %arg3[%c0_12, %c0_13, %c0_14, %c0_15, %c0_16, %c0_17] : memref<1x1x1x8x64x4xf32, #tpu.memory_space<vmem>>, vector<1x1x1x8x64x4xf32>
    %9 = vector.shape_cast %8 : vector<1x1x1x8x64x4xf32> to vector<8x64x4xf32>
    %c1 = arith.constant 1 : index
    %c1_18 = arith.constant 1 : index
    %c0_19 = arith.constant 0 : index
    %10 = vector.load %arg7[%c1, %c1_18, %c0_19] : memref<10x66x4xf32, #tpu.memory_space<vmem>>, vector<8x64x4xf32>
    tpu.vector_store %arg7[%c1, %c1_18, %c0_19], %9 {strides = array<i32>} : memref<10x66x4xf32, #tpu.memory_space<vmem>>, vector<8x64x4xf32>,
    %cst_20 = arith.constant 0.000000e+00 : f32
    %11 = vector.broadcast %cst_20 : f32 to vector<512x4xf32>
    %c0_21 = arith.constant 0 : index
    %c0_22 = arith.constant 0 : index
    %c0_23 = arith.constant 0 : index
    %12 = vector.load %arg7[%c0_21, %c0_22, %c0_23] : memref<10x66x4xf32, #tpu.memory_space<vmem>>, vector<8x64x4xf32>
    %13 = vector.shape_cast %12 : vector<8x64x4xf32> to vector<512x4xf32>
    %c0_24 = arith.constant 0 : index
    %c0_25 = arith.constant 0 : index
    %c0_26 = arith.constant 0 : index
    %c0_27 = arith.constant 0 : index
    %14 = vector.load %arg4[%c0_24, %c0_25, %c0_26, %c0_27] : memref<3x3x4x4xf32, #tpu.memory_space<vmem>>, vector<1x1x4x4xf32>
    %15 = vector.shape_cast %14 : vector<1x1x4x4xf32> to vector<4x4xf32>
    %cst_28 = arith.constant dense<0.000000e+00> : vector<512x4xf32>
    %16 = tpu.matmul %13, %15, %cst_28 {dimension_numbers = #tpu.dot_dimension_numbers<[1], [0], [0], [1], [0, 0, 1, 1], [], []>} : vector<512x4xf32>, vector<4x4xf32>, vector<512x4xf32> -> vector<512x4xf32>
    %17 = arith.addf %11, %16 : vector<512x4xf32>
    %c0_29 = arith.constant 0 : index
    %c1_30 = arith.constant 1 : index
    %c0_31 = arith.constant 0 : index
    %18 = vector.load %arg7[%c0_29, %c1_30, %c0_31] : memref<10x66x4xf32, #tpu.memory_space<vmem>>, vector<8x64x4xf32>
    %19 = vector.shape_cast %18 : vector<8x64x4xf32> to vector<512x4xf32>
    %c0_32 = arith.constant 0 : index
    %c1_33 = arith.constant 1 : index
    %c0_34 = arith.constant 0 : index
    %c0_35 = arith.constant 0 : index
    %20 = vector.load %arg4[%c0_32, %c1_33, %c0_34, %c0_35] : memref<3x3x4x4xf32, #tpu.memory_space<vmem>>, vector<1x1x4x4xf32>
    %21 = vector.shape_cast %20 : vector<1x1x4x4xf32> to vector<4x4xf32>
    %cst_36 = arith.constant dense<0.000000e+00> : vector<512x4xf32>
    %22 = tpu.matmul %19, %21, %cst_36 {dimension_numbers = #tpu.dot_dimension_numbers<[1], [0], [0], [1], [0, 0, 1, 1], [], []>} : vector<512x4xf32>, vector<4x4xf32>, vector<512x4xf32> -> vector<512x4xf32>
    %23 = arith.addf %17, %22 : vector<512x4xf32>
    %c0_37 = arith.constant 0 : index
    %c2 = arith.constant 2 : index
    %c0_38 = arith.constant 0 : index
    %24 = vector.load %arg7[%c0_37, %c2, %c0_38] : memref<10x66x4xf32, #tpu.memory_space<vmem>>, vector<8x64x4xf32>
    %25 = vector.shape_cast %24 : vector<8x64x4xf32> to vector<512x4xf32>
    %c0_39 = arith.constant 0 : index
    %c2_40 = arith.constant 2 : index
    %c0_41 = arith.constant 0 : index
    %c0_42 = arith.constant 0 : index
    %26 = vector.load %arg4[%c0_39, %c2_40, %c0_41, %c0_42] : memref<3x3x4x4xf32, #tpu.memory_space<vmem>>, vector<1x1x4x4xf32>
    %27 = vector.shape_cast %26 : vector<1x1x4x4xf32> to vector<4x4xf32>
    %cst_43 = arith.constant dense<0.000000e+00> : vector<512x4xf32>
    %28 = tpu.matmul %25, %27, %cst_43 {dimension_numbers = #tpu.dot_dimension_numbers<[1], [0], [0], [1], [0, 0, 1, 1], [], []>} : vector<512x4xf32>, vector<4x4xf32>, vector<512x4xf32> -> vector<512x4xf32>
    %29 = arith.addf %23, %28 : vector<512x4xf32>
    %c1_44 = arith.constant 1 : index
    %c0_45 = arith.constant 0 : index
    %c0_46 = arith.constant 0 : index
    %30 = vector.load %arg7[%c1_44, %c0_45, %c0_46] : memref<10x66x4xf32, #tpu.memory_space<vmem>>, vector<8x64x4xf32>
    %31 = vector.shape_cast %30 : vector<8x64x4xf32> to vector<512x4xf32>
    %c1_47 = arith.constant 1 : index
    %c0_48 = arith.constant 0 : index
    %c0_49 = arith.constant 0 : index
    %c0_50 = arith.constant 0 : index
    %32 = vector.load %arg4[%c1_47, %c0_48, %c0_49, %c0_50] : memref<3x3x4x4xf32, #tpu.memory_space<vmem>>, vector<1x1x4x4xf32>
    %33 = vector.shape_cast %32 : vector<1x1x4x4xf32> to vector<4x4xf32>
    %cst_51 = arith.constant dense<0.000000e+00> : vector<512x4xf32>
    %34 = tpu.matmul %31, %33, %cst_51 {dimension_numbers = #tpu.dot_dimension_numbers<[1], [0], [0], [1], [0, 0, 1, 1], [], []>} : vector<512x4xf32>, vector<4x4xf32>, vector<512x4xf32> -> vector<512x4xf32>
    %35 = arith.addf %29, %34 : vector<512x4xf32>
    %c1_52 = arith.constant 1 : index
    %c1_53 = arith.constant 1 : index
    %c0_54 = arith.constant 0 : index
    %36 = vector.load %arg7[%c1_52, %c1_53, %c0_54] : memref<10x66x4xf32, #tpu.memory_space<vmem>>, vector<8x64x4xf32>
    %37 = vector.shape_cast %36 : vector<8x64x4xf32> to vector<512x4xf32>
    %c1_55 = arith.constant 1 : index
    %c1_56 = arith.constant 1 : index
    %c0_57 = arith.constant 0 : index
    %c0_58 = arith.constant 0 : index
    %38 = vector.load %arg4[%c1_55, %c1_56, %c0_57, %c0_58] : memref<3x3x4x4xf32, #tpu.memory_space<vmem>>, vector<1x1x4x4xf32>
    %39 = vector.shape_cast %38 : vector<1x1x4x4xf32> to vector<4x4xf32>
    %cst_59 = arith.constant dense<0.000000e+00> : vector<512x4xf32>
    %40 = tpu.matmul %37, %39, %cst_59 {dimension_numbers = #tpu.dot_dimension_numbers<[1], [0], [0], [1], [0, 0, 1, 1], [], []>} : vector<512x4xf32>, vector<4x4xf32>, vector<512x4xf32> -> vector<512x4xf32>
    %41 = arith.addf %35, %40 : vector<512x4xf32>
    %c1_60 = arith.constant 1 : index
    %c2_61 = arith.constant 2 : index
    %c0_62 = arith.constant 0 : index
    %42 = vector.load %arg7[%c1_60, %c2_61, %c0_62] : memref<10x66x4xf32, #tpu.memory_space<vmem>>, vector<8x64x4xf32>
    %43 = vector.shape_cast %42 : vector<8x64x4xf32> to vector<512x4xf32>
    %c1_63 = arith.constant 1 : index
    %c2_64 = arith.constant 2 : index
    %c0_65 = arith.constant 0 : index
    %c0_66 = arith.constant 0 : index
    %44 = vector.load %arg4[%c1_63, %c2_64, %c0_65, %c0_66] : memref<3x3x4x4xf32, #tpu.memory_space<vmem>>, vector<1x1x4x4xf32>
    %45 = vector.shape_cast %44 : vector<1x1x4x4xf32> to vector<4x4xf32>
    %cst_67 = arith.constant dense<0.000000e+00> : vector<512x4xf32>
    %46 = tpu.matmul %43, %45, %cst_67 {dimension_numbers = #tpu.dot_dimension_numbers<[1], [0], [0], [1], [0, 0, 1, 1], [], []>} : vector<512x4xf32>, vector<4x4xf32>, vector<512x4xf32> -> vector<512x4xf32>
    %47 = arith.addf %41, %46 : vector<512x4xf32>
    %c2_68 = arith.constant 2 : index
    %c0_69 = arith.constant 0 : index
    %c0_70 = arith.constant 0 : index
    %48 = vector.load %arg7[%c2_68, %c0_69, %c0_70] : memref<10x66x4xf32, #tpu.memory_space<vmem>>, vector<8x64x4xf32>
    %49 = vector.shape_cast %48 : vector<8x64x4xf32> to vector<512x4xf32>
    %c2_71 = arith.constant 2 : index
    %c0_72 = arith.constant 0 : index
    %c0_73 = arith.constant 0 : index
    %c0_74 = arith.constant 0 : index
    %50 = vector.load %arg4[%c2_71, %c0_72, %c0_73, %c0_74] : memref<3x3x4x4xf32, #tpu.memory_space<vmem>>, vector<1x1x4x4xf32>
    %51 = vector.shape_cast %50 : vector<1x1x4x4xf32> to vector<4x4xf32>
    %cst_75 = arith.constant dense<0.000000e+00> : vector<512x4xf32>
    %52 = tpu.matmul %49, %51, %cst_75 {dimension_numbers = #tpu.dot_dimension_numbers<[1], [0], [0], [1], [0, 0, 1, 1], [], []>} : vector<512x4xf32>, vector<4x4xf32>, vector<512x4xf32> -> vector<512x4xf32>
    %53 = arith.addf %47, %52 : vector<512x4xf32>
    %c2_76 = arith.constant 2 : index
    %c1_77 = arith.constant 1 : index
    %c0_78 = arith.constant 0 : index
    %54 = vector.load %arg7[%c2_76, %c1_77, %c0_78] : memref<10x66x4xf32, #tpu.memory_space<vmem>>, vector<8x64x4xf32>
    %55 = vector.shape_cast %54 : vector<8x64x4xf32> to vector<512x4xf32>
    %c2_79 = arith.constant 2 : index
    %c1_80 = arith.constant 1 : index
    %c0_81 = arith.constant 0 : index
    %c0_82 = arith.constant 0 : index
    %56 = vector.load %arg4[%c2_79, %c1_80, %c0_81, %c0_82] : memref<3x3x4x4xf32, #tpu.memory_space<vmem>>, vector<1x1x4x4xf32>
    %57 = vector.shape_cast %56 : vector<1x1x4x4xf32> to vector<4x4xf32>
    %cst_83 = arith.constant dense<0.000000e+00> : vector<512x4xf32>
    %58 = tpu.matmul %55, %57, %cst_83 {dimension_numbers = #tpu.dot_dimension_numbers<[1], [0], [0], [1], [0, 0, 1, 1], [], []>} : vector<512x4xf32>, vector<4x4xf32>, vector<512x4xf32> -> vector<512x4xf32>
    %59 = arith.addf %53, %58 : vector<512x4xf32>
    %c2_84 = arith.constant 2 : index
    %c2_85 = arith.constant 2 : index
    %c0_86 = arith.constant 0 : index
    %60 = vector.load %arg7[%c2_84, %c2_85, %c0_86] : memref<10x66x4xf32, #tpu.memory_space<vmem>>, vector<8x64x4xf32>
    %61 = vector.shape_cast %60 : vector<8x64x4xf32> to vector<512x4xf32>
    %c2_87 = arith.constant 2 : index
    %c2_88 = arith.constant 2 : index
    %c0_89 = arith.constant 0 : index
    %c0_90 = arith.constant 0 : index
    %62 = vector.load %arg4[%c2_87, %c2_88, %c0_89, %c0_90] : memref<3x3x4x4xf32, #tpu.memory_space<vmem>>, vector<1x1x4x4xf32>
    %63 = vector.shape_cast %62 : vector<1x1x4x4xf32> to vector<4x4xf32>
    %cst_91 = arith.constant dense<0.000000e+00> : vector<512x4xf32>
    %64 = tpu.matmul %61, %63, %cst_91 {dimension_numbers = #tpu.dot_dimension_numbers<[1], [0], [0], [1], [0, 0, 1, 1], [], []>} : vector<512x4xf32>, vector<4x4xf32>, vector<512x4xf32> -> vector<512x4xf32>
    %65 = arith.addf %59, %64 : vector<512x4xf32>
    %66 = vector.shape_cast %65 : vector<512x4xf32> to vector<8x64x4xf32>
    %67 = tpu.transpose %66, [0, 2, 1] : vector<8x64x4xf32> -> vector<8x4x64xf32>
    %68 = vector.shape_cast %67 : vector<8x4x64xf32> to vector<8x2x2x64xf32>
    %69 = vector.extract_strided_slice %68 {offsets = [0, 0, 0, 0], sizes = [8, 2, 1, 64], strides = [1, 1, 1, 1]} : vector<8x2x2x64xf32> to vector<8x2x1x64xf32>
    %70 = vector.shape_cast %69 : vector<8x2x1x64xf32> to vector<8x2x64xf32>
    %71 = vector.shape_cast %70 : vector<8x2x64xf32> to vector<16x64xf32>
    %72 = vector.extract_strided_slice %68 {offsets = [0, 0, 1, 0], sizes = [8, 2, 1, 64], strides = [1, 1, 1, 1]} : vector<8x2x2x64xf32> to vector<8x2x1x64xf32>
    %73 = vector.shape_cast %72 : vector<8x2x1x64xf32> to vector<8x2x64xf32>
    %74 = vector.shape_cast %73 : vector<8x2x64xf32> to vector<16x64xf32>
    %75 = tpu.concatenate %71, %74 in 1 : vector<16x64xf32>, vector<16x64xf32> -> vector<16x128xf32>
    %c0_92 = arith.constant 0 : index
    %c0_93 = arith.constant 0 : index
    %76 = vector.load %arg5[%c0_92, %c0_93] : memref<128x128xf32, #tpu.memory_space<vmem>>, vector<128x128xf32>
    %cst_94 = arith.constant dense<0.000000e+00> : vector<16x128xf32>
    %77 = tpu.matmul %75, %76, %cst_94 {dimension_numbers = #tpu.dot_dimension_numbers<[1], [0], [0], [1], [0, 0, 1, 1], [], []>} : vector<16x128xf32>, vector<128x128xf32>, vector<16x128xf32> -> vector<16x128xf32>
    %c0_95 = arith.constant 0 : index
    %c0_96 = arith.constant 0 : index
    %c0_97 = arith.constant 0 : index
    %c0_98 = arith.constant 0 : index
    %78 = vector.load %arg6[%c0_95, %c0_96, %c0_97, %c0_98] : memref<1x1x16x128xf32, #tpu.memory_space<vmem>>, vector<1x1x16x128xf32>
    %79 = vector.shape_cast %78 : vector<1x1x16x128xf32> to vector<16x128xf32>
    %80 = vector.shape_cast %77 : vector<16x128xf32> to vector<1x1x16x128xf32>
    tpu.vector_store %arg6[%c0_95, %c0_96, %c0_97, %c0_98], %80 {strides = array<i32>} : memref<1x1x16x128xf32, #tpu.memory_space<vmem>>, vector<1x1x16x128xf32>,
    return
  }
  func.func @transform_0(%arg0: i32, %arg1: i32, %arg2: i32) -> (i32, i32, i32, i32, i32, i32) {
    %c0_i32 = arith.constant 0 : i32
    %c0_i32_0 = arith.constant 0 : i32
    %c0_i32_1 = arith.constant 0 : i32
    %c0_i32_2 = arith.constant 0 : i32
    return %arg0, %arg1, %arg2, %c0_i32, %c0_i32_0, %c0_i32_1 : i32, i32, i32, i32, i32, i32
  }
  func.func @transform_1(%arg0: i32, %arg1: i32, %arg2: i32) -> (i32, i32, i32, i32) {
    %c0_i32 = arith.constant 0 : i32
    %c0_i32_0 = arith.constant 0 : i32
    %c0_i32_1 = arith.constant 0 : i32
    %c0_i32_2 = arith.constant 0 : i32
    %c0_i32_3 = arith.constant 0 : i32
    return %c0_i32, %c0_i32_0, %c0_i32_1, %c0_i32_2 : i32, i32, i32, i32
  }
  func.func @transform_2(%arg0: i32, %arg1: i32, %arg2: i32) -> (i32, i32) {
    %c0_i32 = arith.constant 0 : i32
    %c0_i32_0 = arith.constant 0 : i32
    %c0_i32_1 = arith.constant 0 : i32
    return %c0_i32, %c0_i32_0 : i32, i32
  }
  func.func @transform_3(%arg0: i32, %arg1: i32, %arg2: i32) -> (i32, i32, i32, i32) {
    %c0_i32 = arith.constant 0 : i32
    %c0_i32_0 = arith.constant 0 : i32
    return %arg0, %arg1, %c0_i32, %arg2 : i32, i32, i32, i32
  }
}

</mosaic_0001>

<bundles_post_ra>
// kernel: recon_block_forward.1
= control target key start
LH: loop header
LB: loop body
LE: loop exit
PB: predicated region body
PF: predicated region fallthrough
CT: control target
= control target key end

     0   :  { %s8729_s0 = inlined_call_operand.vmem [shape: f32[2,2,2,8,64,4], index: 0, kind: input, shape index: {}]   ;;  %s8730_s1 = inlined_call_operand.vmem [shape: f32[3,3,4,4], index: 1, kind: input, shape index: {}]   ;;  %s8731_s2 = inlined_call_operand.vmem [shape: f32[128,128], index: 2, kind: input, shape index: {}]   ;;  %s8732_s3 = inlined_call_operand.hbm [shape: f32[2,2,16,256], index: 3, kind: output, shape index: {}]  }
   0x1   :  { %8734 = sst [smem:[#allocation35_spill]] %s8729_s0 }
   0x2   :  { %8735 = sst [smem:[#allocation36_spill]] %s8730_s1 }
   0x3   :  { %8736 = sst [smem:[#allocation37_spill]] %s8731_s2 }
   0x4   :  { %8 = vsyncpa [#allocation4], 0 }
   0x5   :  { %10 = vsyncpa [#allocation4 + $0x1], 0  ;;  %s6503_s12 = smov 0   ;;  %s6505_s13 = smov 0  }
   0x6   :  { %s6507_s14 = smov 0   ;;  %s6509_s15 = smov 0  }
   0x7   :  { %s6511_s16 = smov 0   ;;  %s6513_s17 = smov 0  }
   0x8   :  { %s6515_s18 = smov 0   ;;  %s6517_s19 = smov 0  }
   0x9   :  { %s6519_s20 = smov 0   ;;  %s6521_s21 = smov 0  }
   0xa LB: > { %s5578_s22 = sadd.s32 4294967295, %s6476_s21   ;;  %s28_s23 = sadd.s32 1, %s6464_s18  ;;  %s6476_s21 = sphi %s6521_s21, %s16_s21   ;;  %s6472_s20 = sphi %s6519_s20, %s8854_s20   ;;  %s6468_s19 = sphi %s6517_s19, %s8853_s19   ;;  %s6464_s18 = sphi %s6515_s18, %s8852_s18   ;;  %s6460_s17 = sphi %s6513_s17, %s8851_s17   ;;  %s6456_s16 = sphi %s6511_s16, %s8850_s16   ;;  %s6452_s15 = sphi %s6509_s15, %s8849_s15   ;;  %s6448_s14 = sphi %s6507_s14, %s8848_s14   ;;  %s6444_s13 = sphi %s6505_s13, %s8847_s13   ;;  %s6440_s12 = sphi %s6503_s12, %s8846_s12  }
   0xb   : > { %p29_p0 = scmp.ge.s32.totalorder %s28_s23, 2  ;;  %s31_s24 = sadd.s32 1, %s6468_s19 }
   0xc   : > { %s5579_s25 = sadd.s32 4294967294, %s6476_s21   ;;  %p128_p1 = scmp.ne.s32.totalorder %s6448_s14, %s6444_s13 }
   0xd   : > { %s8856_s23 = smov (%p29_p0, %s28_s23), 0  ;;  %s8858_s24 = smov (!%p29_p0, %s31_s24), %s6468_s19 }
   0xe   : > { %s35_s26 = sadd.s32 1, %s6472_s20  ;;  %p129_p2 = scmp.eq.s32.totalorder %s5578_s22, 7 }
   0xf   : > { %p33_p3 = scmp.ge.s32.totalorder %s8858_s24, 2  ;;  %p134_p4 = scmp.ne.s32.totalorder %s6444_s13, %s6440_s12 }
  0x10   : > { %p6565_p5 = por %p129_p2, %p128_p1  ;;  %p135_p6 = scmp.eq.s32.totalorder %s5579_s25, 7 }
  0x11   : > { %s8860_s24 = smov (%p33_p3, %s8858_s24), 0  ;;  %s8862_s26 = smov (!%p33_p3, %s35_s26), %s6472_s20 }
  0x12   : > { %p6572_p7 = por %p135_p6, %p134_p4  ;;  %p37_p8 = scmp.ge.s32.totalorder %s8862_s26, 2 }
  0x13   : > { %p5582_p9 = scmp.ge.s32.totalorder %s6476_s21, 1  ;;  %s112_s29 = ssub.s32 %s6468_s19, %s8860_s24 }
  0x14   : > { %p175_p10 = scmp.lt.s32.totalorder %s6476_s21, 9  ;;  %s8864_s26 = smov (%p37_p8, %s8862_s26), 0 }
  0x15   : > { %8739 = sst [smem:[#allocation6_spill]] %s8864_s26  ;;  %s114_s30 = ssub.s32 %s6464_s18, %s8856_s23 }
  0x16   : > { %p176_p11 = pnand %p5582_p9, %p175_p10  ;;  %s111_s4 = ssub.s32 %s6472_s20, %s8864_s26 }
  0x17   : > { %s113_s5 = sor.u32 %s112_s29, %s111_s4  ;;  %s118_s7 = sadd.s32 1, %s6448_s14 }
  0x18   : > { %s115_s6 = sor.u32 %s114_s30, %s113_s5  ;;  %179 = sbr.rel (%p176_p11) target bundleno = 1686 (0x696), region = 32 }
  0x19   : > { %p116_p12 = scmp.eq.s32.totalorder %s115_s6, 0 }
  0x1b   : > { %s6588_s8 = scalar_select %p116_p12, %s6448_s14, %s118_s7  }
  0x1d   : > { %s8740_s1 = sld [smem:[#allocation36_spill]]  ;;  %vm714_vm0 = vcmask 1043456   ;;  %p207_p13 = scmp.lt.s32.totalorder %s6460_s17, 1  ;;  %vm220_vm1 = vcmask 31744   ;;  %v6478_v3 = vmov 0.0   ;;  %vm229_vm2 = vcmask 25600  }
  0x1e   : > { %p209_p0 = scmp.lt.s32.totalorder %s6456_s16, 1  ;;  %p211_p1 = scmp.lt.s32.totalorder %s6452_s15, 1  ;;  %221 = vst.msk [vmem:[#allocation2] sm:$0xff] %vm220_vm1, %v6478_v3  ;;  %vm241_vm3 = vcmask 24576   ;;  %vm5358_vm4 = vcmask 1041409   ;;  %vm5360_vm5 = vcmask 1042434  }
  0x1f   : > { %s208_s30 = scalar_select %p207_p13, %s6460_s17, 1  ;;  %222 = vst.msk [vmem:[#allocation2 + $0x8] sm:$0xff] %vm220_vm1, %v6478_v3  ;;  %vm5362_vm6 = vcmask 1043459   ;;  %vm5364_vm7 = vcmask 1044484   ;;  %vm5366_vm8 = vcmask 1045509   ;;  %vm5368_vm9 = vcmask 1046534  }
  0x20   : > { %s210_s6 = scalar_select %p209_p0, %s6456_s16, 1  ;;  %223 = vst.msk [vmem:[#allocation2 + $0x10] sm:$0xff] %vm220_vm1, %v6478_v3  ;;  %vm5370_vm10 = vcmask 1047559   ;;  %vm5417_vm11 = vcmask 523264  }
  0x21   : > { %s212_s7 = scalar_select %p211_p1, %s6452_s15, 1  ;;  %224 = vst.msk [vmem:[#allocation2 + $0x18] sm:$0xff] %vm220_vm1, %v6478_v3 }
  0x22   : > { %s5585_s9 = sshll.u32 %s210_s6, 7  ;;  %s5586_s10 = sshll.u32 %s208_s30, 8  ;;  %225 = vst.msk [vmem:[#allocation2 + $0x20] sm:$0xff] %vm220_vm1, %v6478_v3 }
  0x23   : > { %v5588_v0 = vld [vmem:[%s8740_s1 + $0x4] sm:$0xf]  ;;  %v5719_v1 = vld [vmem:[%s8740_s1 + $0x8] sm:$0xf]  ;;  %v5785_v2 = vld [vmem:[%s8740_s1 + $0xc] sm:$0xf] }
  0x24   : > { %6187 = vmatpush.msk.msra.mxu1 %vm714_vm0, %v5588_v0  ;;  %6188 = vmatpush.msk.msra.mxu2 %vm714_vm0, %v5588_v0  ;;  %v5851_v4 = vld [vmem:[%s8740_s1 + $0x10] sm:$0xf]  ;;  %s5584_s11 = sshll.u32 %s212_s7, 6  ;;  %226 = vst.msk [vmem:[#allocation2 + $0x28] sm:$0xff] %vm220_vm1, %v6478_v3  ;;  %s8741_s0 = sld [smem:[#allocation35_spill]] }
  0x25   : > { %6189 = vmatpush.msk.msra.mxu3 %vm714_vm0, %v5588_v0  ;;  %5589 = vmatpush.msk.msra.mxu0 %vm714_vm0, %v5588_v0  ;;  %s215_s22 = sadd.s32 %s5585_s9, %s5584_s11  ;;  %227 = vst.msk [vmem:[#allocation2 + $0x30] sm:$0xff] %vm220_vm1, %v6478_v3  ;;  %v455_v19 = vld [vmem:[%s8740_s1] sm:$0xf]  ;;  %s8821_s2 = sld [smem:[#allocation37_spill]] }
  0x26   : > { %5720 = vmatpush.msk.msrb.mxu2 %vm714_vm0, %v5719_v1  ;;  %s217_s25 = sadd.s32 %s5586_s10, %s215_s22  ;;  %228 = vst.msk [vmem:[#allocation2 + $0x38] sm:$0xff] %vm220_vm1, %v6478_v3  ;;  %v456_v5 = vld [vmem:[#allocation2 + $0x1] sm:$0xff]  ;;  %5654 = vmatpush.msk.msrb.mxu1 %vm714_vm0, %v455_v19  ;;  %s204_s6 = sand.u32 1, %s6444_s13  }
  0x27   : > { %5786 = vmatpush.msk.msrb.mxu3 %vm714_vm0, %v5785_v2  ;;  %5852 = vmatpush.msk.msrb.mxu0 %vm714_vm0, %v5851_v4  ;;  %s5587_s29 = sshll.u32 %s217_s25, 3  ;;  %232 = vst.msk [vmem:[#allocation2 + $0x288] sm:$0xff] %vm220_vm1, %v6478_v3  ;;  %v457_v11 = vld [vmem:[#allocation2 + $0x9] sm:$0xff]  ;;  %s6479_s25 = smov 64  }
  0x28   : > { %5590 = vmatmul.msk.f32.vlgmr.msra.gmra.mxu0 %vm220_vm1, %v456_v5  ;;  %233 = vst.msk [vmem:[#allocation2 + $0x290] sm:$0xff] %vm220_vm1, %v6478_v3  ;;  %v458_v21 = vld [vmem:[#allocation2 + $0x11] sm:$0xff]  ;;  %s5583_s7 = sshll.u32 %s204_s6, 4  ;;  %s6182_s10 = sshll.u32 %s6456_s16, 2 }
  0x29   : > { %234 = vst.msk [vmem:[#allocation2 + $0x298] sm:$0xff] %vm220_vm1, %v6478_v3  ;;  %v459_v32 = vld [vmem:[#allocation2 + $0x19] sm:$0xff]  ;;  %s206_s9 = scalar_lea.vmem [#allocation3], %s5583_s7  ;;  %s5472_s11 = sadd.s32 %s6452_s15, %s6182_s10 }
  0x2a   : > { %s6634_s5 = scalar_lea.vmem %s8741_s0, %s5587_s29  ;;  %235 = vst.msk [vmem:[#allocation2 + $0x2a0] sm:$0xff] %vm220_vm1, %v6478_v3  ;;  %s6183_s22 = sshll.u32 %s6460_s17, 3 }
  0x2b   : > { %v271_v6 = vld [vmem:[%s6634_s5 + $0x48] sm:$0xff]  ;;  %v284_v7 = vld [vmem:[%s6634_s5 + $0xb0] sm:$0xff]  ;;  %v301_v8 = vld [vmem:[%s6634_s5 + $0x138] sm:$0xff]  ;;  %236 = vst.msk [vmem:[#allocation2 + $0x2a8] sm:$0xff] %vm220_vm1, %v6478_v3  ;;  %s5474_s29 = sadd.s32 %s6183_s22, %s5472_s11  ;;  %s5462_s7 = scalar_lea.sflag [#allocation4], %s204_s6 }
  0x2c   : > { %336 = vst.msk [vmem:[#allocation2 + $0x99] sm:$0xff] %vm220_vm1, %v271_v6  ;;  %v272_v9 = vld [vmem:[%s6634_s5 + $0x50] sm:$0xff]  ;;  %v285_v10 = vld [vmem:[%s6634_s5 + $0xb8] sm:$0xff]  ;;  %v302_v14 = vld [vmem:[%s6634_s5 + $0x140] sm:$0xff]  ;;  %s6184_s30 = sshll.u32 %s5474_s29, 3  ;;  %s6386_s17 = scalar_lea.hbm %s8732_s3, 128 }
  0x2d   : > { %349 = vst.msk [vmem:[#allocation2 + $0x109] sm:$0xff] %vm220_vm1, %v284_v7  ;;  %v273_v16 = vld [vmem:[%s6634_s5 + $0x58] sm:$0xff]  ;;  %v286_v17 = vld [vmem:[%s6634_s5 + $0xc0] sm:$0xff]  ;;  %v303_v18 = vld [vmem:[%s6634_s5 + $0x148] sm:$0xff]  ;;  %s5476_s0 = scalar_lea.hbm %s8732_s3, %s6184_s30 }
  0x2e   : > { %366 = vst.msk [vmem:[#allocation2 + $0x1a1] sm:$0xff] %vm220_vm1, %v301_v8  ;;  %v274_v20 = vld [vmem:[%s6634_s5 + $0x60] sm:$0xff]  ;;  %v287_v23 = vld [vmem:[%s6634_s5 + $0xc8] sm:$0xff]  ;;  %v304_v25 = vld [vmem:[%s6634_s5 + $0x150] sm:$0xff] }
  0x2f   : > { %337 = vst.msk [vmem:[#allocation2 + $0xa1] sm:$0xff] %vm220_vm1, %v272_v9  ;;  %v275_v26 = vld [vmem:[%s6634_s5 + $0x68] sm:$0xff]  ;;  %v288_v27 = vld [vmem:[%s6634_s5 + $0xd0] sm:$0xff]  ;;  %v305_v28 = vld [vmem:[%s6634_s5 + $0x158] sm:$0xff] }
  0x30   : > { %350 = vst.msk [vmem:[#allocation2 + $0x111] sm:$0xff] %vm220_vm1, %v285_v10  ;;  %5591 = vmatmul.msk.f32.gmra.mxu0 %vm220_vm1, %v457_v11  ;;  %v276_v30 = vld [vmem:[%s6634_s5 + $0x70] sm:$0xff]  ;;  %v289_v31 = vld [vmem:[%s6634_s5 + $0xd8] sm:$0xff]  ;;  %v306_v33 = vld [vmem:[%s6634_s5 + $0x160] sm:$0xff] }
  0x31   : > { %237 = vst.msk [vmem:[#allocation2 + $0x2b0] sm:$0xff] %vm220_vm1, %v6478_v3  ;;  %v277_v35 = vld [vmem:[%s6634_s5 + $0x78] sm:$0xff]  ;;  %v290_v37 = vld [vmem:[%s6634_s5 + $0xe0] sm:$0xff]  ;;  %v307_v38 = vld [vmem:[%s6634_s5 + $0x168] sm:$0xff] }
  0x32   : > { %238 = vst.msk [vmem:[#allocation2 + $0x2b8] sm:$0xff] %vm220_vm1, %v6478_v3  ;;  %v278_v40 = vld [vmem:[%s6634_s5 + $0x80] sm:$0xff]  ;;  %v291_v41 = vld [vmem:[%s6634_s5 + $0xe8] sm:$0xff]  ;;  %v308_v42 = vld [vmem:[%s6634_s5 + $0x170] sm:$0xff] }
  0x33   : > { %v6655_v12 = vld [vmem:[#allocation2 + $0x99] sm:$0xff]  ;;  %239 = vst.msk [vmem:[#allocation2 + $0x2c0] sm:$0xff] %vm220_vm1, %v6478_v3  ;;  %v460_v43 = vld [vmem:[#allocation2 + $0x21] sm:$0xff]  ;;  %v292_v48 = vld [vmem:[%s6634_s5 + $0xf0] sm:$0xff] }
  0x34   : > { %5607 = vmatmul.msk.f32.vlgmr.msra.gmra.mxu1 %vm220_vm1, %v6655_v12  ;;  %v486_v13 = vld [vmem:[#allocation2 + $0x109] sm:$0xff]  ;;  %367 = vst.msk [vmem:[#allocation2 + $0x1b1] sm:$0xff] %vm220_vm1, %v302_v14  ;;  %v309_v49 = vld [vmem:[%s6634_s5 + $0x178] sm:$0xff]  ;;  %v262_v56 = vld [vmem:[%s6634_s5] sm:$0xff] }
  0x35   : > { %5620 = vmatmul.msk.f32.vlgmr.msra.gmra.mxu2 %vm220_vm1, %v486_v13  ;;  %v503_v15 = vld [vmem:[#allocation2 + $0x1a1] sm:$0xff]  ;;  %338 = vst.msk [vmem:[#allocation2 + $0xa9] sm:$0xff] %vm220_vm1, %v273_v16  ;;  %v461_v50 = vld [vmem:[#allocation2 + $0x29] sm:$0xff]  ;;  %v293_v55 = vld [vmem:[%s6634_s5 + $0xf8] sm:$0xff] }
  0x36   : > { %5637 = vmatmul.msk.f32.vlgmr.msra.gmra.mxu3 %vm220_vm1, %v503_v15  ;;  %v6681_v22 = vld [vmem:[#allocation2 + $0xa1] sm:$0xff]  ;;  %351 = vst.msk [vmem:[#allocation2 + $0x121] sm:$0xff] %vm220_vm1, %v286_v17  ;;  %v280_v54 = vld [vmem:[%s6634_s5 + $0x90] sm:$0xff]  ;;  %v281_v62 = vld [vmem:[%s6634_s5 + $0x98] sm:$0xff] }
  0x37   : > { %v487_v24 = vld [vmem:[#allocation2 + $0x111] sm:$0xff]  ;;  %368 = vst.msk [vmem:[#allocation2 + $0x1b9] sm:$0xff] %vm220_vm1, %v303_v18  ;;  %v279_v47 = vld [vmem:[%s6634_s5 + $0x88] sm:$0xff]  ;;  %v310_v57 = vld [vmem:[%s6634_s5 + $0x180] sm:$0xff] }
  0x38   : > { %339 = vst.msk [vmem:[#allocation2 + $0xb1] sm:$0xff] %vm220_vm1, %v274_v20  ;;  %5592 = vmatmul.msk.f32.gmra.mxu0 %vm220_vm1, %v458_v21  ;;  %v462_v58 = vld [vmem:[#allocation2 + $0x31] sm:$0xff]  ;;  %v294_v63 = vld [vmem:[%s6634_s5 + $0x100] sm:$0xff]  ;;  %v263_v0 = vld [vmem:[%s6634_s5 + $0x8] sm:$0xff] }
  0x39   : > { %352 = vst.msk [vmem:[#allocation2 + $0x129] sm:$0xff] %vm220_vm1, %v287_v23  ;;  %v311_v1 = vld [vmem:[%s6634_s5 + $0x188] sm:$0xff]  ;;  %v282_v7 = vld [vmem:[%s6634_s5 + $0xa0] sm:$0xff]  ;;  %v264_v9 = vld [vmem:[%s6634_s5 + $0x10] sm:$0xff] }
  0x3a   : > { %369 = vst.msk [vmem:[#allocation2 + $0x1c1] sm:$0xff] %vm220_vm1, %v304_v25  ;;  %v295_v8 = vld [vmem:[%s6634_s5 + $0x108] sm:$0xff]  ;;  %v312_v10 = vld [vmem:[%s6634_s5 + $0x190] sm:$0xff]  ;;  %v265_v18 = vld [vmem:[%s6634_s5 + $0x18] sm:$0xff] }
  0x3b   : > { %v504_v29 = vld [vmem:[#allocation2 + $0x1b1] sm:$0xff]  ;;  %340 = vst.msk [vmem:[#allocation2 + $0xb9] sm:$0xff] %vm220_vm1, %v275_v26  ;;  %v283_v16 = vld [vmem:[%s6634_s5 + $0xa8] sm:$0xff] }
  0x3c   : > { %5608 = vmatmul.msk.f32.gmra.mxu1 %vm220_vm1, %v6681_v22  ;;  %353 = vst.msk [vmem:[#allocation2 + $0x131] sm:$0xff] %vm220_vm1, %v288_v27  ;;  %v6704_v34 = vld [vmem:[#allocation2 + $0xa9] sm:$0xff]  ;;  %v313_v19 = vld [vmem:[%s6634_s5 + $0x198] sm:$0xff] }
  0x3d   : > { %5621 = vmatmul.msk.f32.gmra.mxu2 %vm220_vm1, %v487_v24  ;;  %370 = vst.msk [vmem:[#allocation2 + $0x1c9] sm:$0xff] %vm220_vm1, %v305_v28  ;;  %v488_v36 = vld [vmem:[#allocation2 + $0x121] sm:$0xff]  ;;  %v296_v17 = vld [vmem:[%s6634_s5 + $0x110] sm:$0xff]  ;;  %v297_v25 = vld [vmem:[%s6634_s5 + $0x118] sm:$0xff] }
  0x3e   : > { %5638 = vmatmul.msk.f32.gmra.mxu3 %vm220_vm1, %v504_v29  ;;  %341 = vst.msk [vmem:[#allocation2 + $0xc1] sm:$0xff] %vm220_vm1, %v276_v30  ;;  %v505_v39 = vld [vmem:[#allocation2 + $0x1b9] sm:$0xff] }
  0x3f   : > { %354 = vst.msk [vmem:[#allocation2 + $0x139] sm:$0xff] %vm220_vm1, %v289_v31  ;;  %v6725_v44 = vld [vmem:[#allocation2 + $0xb1] sm:$0xff] }
  0x40   : > { %5593 = vmatmul.msk.f32.gmra.mxu0 %vm220_vm1, %v459_v32  ;;  %371 = vst.msk [vmem:[#allocation2 + $0x1d1] sm:$0xff] %vm220_vm1, %v306_v33  ;;  %v489_v45 = vld [vmem:[#allocation2 + $0x129] sm:$0xff] }
  0x41   : > { %342 = vst.msk [vmem:[#allocation2 + $0xc9] sm:$0xff] %vm220_vm1, %v277_v35  ;;  %v506_v46 = vld [vmem:[#allocation2 + $0x1c1] sm:$0xff] }
  0x42   : > { %355 = vst.msk [vmem:[#allocation2 + $0x141] sm:$0xff] %vm220_vm1, %v290_v37  ;;  %v6740_v51 = vld [vmem:[#allocation2 + $0xb9] sm:$0xff] }
  0x43   : > { %372 = vst.msk [vmem:[#allocation2 + $0x1d9] sm:$0xff] %vm220_vm1, %v307_v38  ;;  %v490_v52 = vld [vmem:[#allocation2 + $0x131] sm:$0xff]  ;;  %v266_v35 = vld [vmem:[%s6634_s5 + $0x20] sm:$0xff] }
  0x44   : > { %5609 = vmatmul.msk.f32.gmra.mxu1 %vm220_vm1, %v6704_v34  ;;  %343 = vst.msk [vmem:[#allocation2 + $0xd9] sm:$0xff] %vm220_vm1, %v278_v40  ;;  %v507_v53 = vld [vmem:[#allocation2 + $0x1c9] sm:$0xff]  ;;  %v298_v38 = vld [vmem:[%s6634_s5 + $0x120] sm:$0xff] }
  0x45   : > { %5622 = vmatmul.msk.f32.gmra.mxu2 %vm220_vm1, %v488_v36  ;;  %356 = vst.msk [vmem:[#allocation2 + $0x149] sm:$0xff] %vm220_vm1, %v291_v41  ;;  %v6756_v59 = vld [vmem:[#allocation2 + $0xc1] sm:$0xff] }
  0x46   : > { %5639 = vmatmul.msk.f32.gmra.mxu3 %vm220_vm1, %v505_v39  ;;  %373 = vst.msk [vmem:[#allocation2 + $0x1e1] sm:$0xff] %vm220_vm1, %v308_v42  ;;  %v491_v60 = vld [vmem:[#allocation2 + $0x139] sm:$0xff]  ;;  %v267_v40 = vld [vmem:[%s6634_s5 + $0x28] sm:$0xff] }
  0x47   : > { %344 = vst.msk [vmem:[#allocation2 + $0xe1] sm:$0xff] %vm220_vm1, %v279_v47  ;;  %v508_v61 = vld [vmem:[#allocation2 + $0x1d1] sm:$0xff]  ;;  %v314_v36 = vld [vmem:[%s6634_s5 + $0x1a0] sm:$0xff]  ;;  %v315_v41 = vld [vmem:[%s6634_s5 + $0x1a8] sm:$0xff] }
  0x48   : > { %5594 = vmatmul.msk.f32.gmra.mxu0 %vm220_vm1, %v460_v43  ;;  %357 = vst.msk [vmem:[#allocation2 + $0x151] sm:$0xff] %vm220_vm1, %v292_v48  ;;  %v6771_v4 = vld [vmem:[#allocation2 + $0xc9] sm:$0xff]  ;;  %v269_v47 = vld [vmem:[%s6634_s5 + $0x38] sm:$0xff] }
  0x49   : > { %230 = vst.msk [vmem:[#allocation2 + $0x40] sm:$0x3] %vm229_vm2, %v6478_v3  ;;  %v492_v5 = vld [vmem:[#allocation2 + $0x141] sm:$0xff] }
  0x4a   : > { %240 = vst.msk [vmem:[#allocation2 + $0x2c8] sm:$0x3] %vm229_vm2, %v6478_v3  ;;  %v509_v6 = vld [vmem:[#allocation2 + $0x1d9] sm:$0xff]  ;;  %v299_v43 = vld [vmem:[%s6634_s5 + $0x128] sm:$0xff] }
  0x4b   : > { %374 = vst.msk [vmem:[#allocation2 + $0x1e9] sm:$0xff] %vm220_vm1, %v309_v49  ;;  %v6788_v13 = vld [vmem:[#allocation2 + $0xd9] sm:$0xff] }
  0x4c   : > { %5610 = vmatmul.msk.f32.gmra.mxu1 %vm220_vm1, %v6725_v44  ;;  %345 = vst.msk [vmem:[#allocation2 + $0xe9] sm:$0xff] %vm220_vm1, %v280_v54  ;;  %v493_v14 = vld [vmem:[#allocation2 + $0x149] sm:$0xff]  ;;  %v270_v54 = vld [vmem:[%s6634_s5 + $0x40] sm:$0xff] }
  0x4d   : > { %5623 = vmatmul.msk.f32.gmra.mxu2 %vm220_vm1, %v489_v45  ;;  %358 = vst.msk [vmem:[#allocation2 + $0x159] sm:$0xff] %vm220_vm1, %v293_v55  ;;  %v510_v15 = vld [vmem:[#allocation2 + $0x1e1] sm:$0xff]  ;;  %v316_v45 = vld [vmem:[%s6634_s5 + $0x1b0] sm:$0xff] }
  0x4e   : > { %5640 = vmatmul.msk.f32.gmra.mxu3 %vm220_vm1, %v506_v46  ;;  %327 = vst.msk [vmem:[#allocation2 + $0x49] sm:$0xff] %vm220_vm1, %v262_v56  ;;  %v6806_v21 = vld [vmem:[#allocation2 + $0xe1] sm:$0xff]  ;;  %v300_v46 = vld [vmem:[%s6634_s5 + $0x130] sm:$0xff] }
  0x4f   : > { %375 = vst.msk [vmem:[#allocation2 + $0x1f9] sm:$0xff] %vm220_vm1, %v310_v57  ;;  %v494_v23 = vld [vmem:[#allocation2 + $0x151] sm:$0xff] }
  0x50   : > { %5595 = vmatmul.msk.f32.gmra.mxu0 %vm220_vm1, %v461_v50  ;;  %346 = vst.msk [vmem:[#allocation2 + $0xf1] sm:$0xff] %vm220_vm1, %v281_v62  ;;  %v463_v2 = vld [vmem:[#allocation2 + $0x39] sm:$0xff] }
  0x51   : > { %359 = vst.msk [vmem:[#allocation2 + $0x169] sm:$0xff] %vm220_vm1, %v294_v63  ;;  %v317_v50 = vld [vmem:[%s6634_s5 + $0x1b8] sm:$0xff]  ;;  %v5917_v63 = vld [vmem:[%s8740_s1 + $0x14] sm:$0xf] }
  0x52   : > { %328 = vst.msk [vmem:[#allocation2 + $0x51] sm:$0xff] %vm220_vm1, %v263_v0  ;;  %v511_v24 = vld [vmem:[#allocation2 + $0x1e9] sm:$0xff]  ;;  %v6049_v62 = vld [vmem:[%s8740_s1 + $0x1c] sm:$0xf]  ;;  %5918 = vmatpush.msk.msra.mxu1 %vm714_vm0, %v5917_v63 }
  0x53   : > { %376 = vst.msk [vmem:[#allocation2 + $0x201] sm:$0xff] %vm220_vm1, %v311_v1  ;;  %v6824_v27 = vld [vmem:[#allocation2 + $0xe9] sm:$0xff]  ;;  %6050 = vmatpush.msk.msra.mxu3 %vm714_vm0, %v6049_v62 }
  0x54   : > { %5611 = vmatmul.msk.f32.gmra.mxu1 %vm220_vm1, %v6740_v51  ;;  %347 = vst.msk [vmem:[#allocation2 + $0xf9] sm:$0xff] %vm220_vm1, %v282_v7  ;;  %v495_v28 = vld [vmem:[#allocation2 + $0x159] sm:$0xff]  ;;  %v392_v0 = vld [vmem:[#allocation2 + $0x8] sm:$0xff] }
  0x55   : > { %5624 = vmatmul.msk.f32.gmra.mxu2 %vm220_vm1, %v490_v52  ;;  %360 = vst.msk [vmem:[#allocation2 + $0x171] sm:$0xff] %vm220_vm1, %v295_v8  ;;  %v6785_v11 = vld [vmem:[#allocation2 + $0x49] sm:$0xff] }
  0x56   : > { %5641 = vmatmul.msk.f32.gmra.mxu3 %vm220_vm1, %v507_v53  ;;  %329 = vst.msk [vmem:[#allocation2 + $0x59] sm:$0xff] %vm220_vm1, %v264_v9  ;;  %v512_v29 = vld [vmem:[#allocation2 + $0x1f9] sm:$0xff]  ;;  %v393_v8 = vld [vmem:[#allocation2 + $0x10] sm:$0xff] }
  0x57   : > { %377 = vst.msk [vmem:[#allocation2 + $0x209] sm:$0xff] %vm220_vm1, %v312_v10  ;;  %v6850_v31 = vld [vmem:[#allocation2 + $0xf1] sm:$0xff] }
  0x58   : > { %5596 = vmatmul.msk.f32.gmra.mxu0 %vm220_vm1, %v462_v58  ;;  %348 = vst.msk [vmem:[#allocation2 + $0x101] sm:$0xff] %vm220_vm1, %v283_v16  ;;  %v496_v32 = vld [vmem:[#allocation2 + $0x169] sm:$0xff] }
  0x59   : > { %361 = vst.msk [vmem:[#allocation2 + $0x179] sm:$0xff] %vm220_vm1, %v296_v17  ;;  %v6803_v20 = vld [vmem:[#allocation2 + $0x51] sm:$0xff] }
  0x5a   : > { %330 = vst.msk [vmem:[#allocation2 + $0x61] sm:$0xff] %vm220_vm1, %v265_v18  ;;  %v513_v33 = vld [vmem:[#allocation2 + $0x201] sm:$0xff]  ;;  %v394_v17 = vld [vmem:[#allocation2 + $0x18] sm:$0xff] }
  0x5b   : > { %378 = vst.msk [vmem:[#allocation2 + $0x211] sm:$0xff] %vm220_vm1, %v313_v19  ;;  %v6876_v37 = vld [vmem:[#allocation2 + $0xf9] sm:$0xff] }
  0x5c   : > { %5612 = vmatmul.msk.f32.gmra.mxu1 %vm220_vm1, %v6756_v59  ;;  %362 = vst.msk [vmem:[#allocation2 + $0x181] sm:$0xff] %vm220_vm1, %v297_v25  ;;  %v497_v39 = vld [vmem:[#allocation2 + $0x171] sm:$0xff] }
  0x5d   : > { %5625 = vmatmul.msk.f32.gmra.mxu2 %vm220_vm1, %v491_v60  ;;  %242 = vst.msk [vmem:[#allocation2] sm:$0x1] %vm241_vm3, %v6478_v3  ;;  %v6820_v26 = vld [vmem:[#allocation2 + $0x59] sm:$0xff] }
  0x5e   : > { %5642 = vmatmul.msk.f32.gmra.mxu3 %vm220_vm1, %v508_v61  ;;  %243 = vst.msk [vmem:[#allocation2 + $0x48] sm:$0x1] %vm241_vm3, %v6478_v3  ;;  %v514_v42 = vld [vmem:[#allocation2 + $0x209] sm:$0xff]  ;;  %v5983_v60 = vld [vmem:[%s8740_s1 + $0x18] sm:$0xf] }
  0x5f   : > { %244 = vst.msk [vmem:[#allocation2 + $0x90] sm:$0x1] %vm241_vm3, %v6478_v3  ;;  %v6899_v48 = vld [vmem:[#allocation2 + $0x101] sm:$0xff]  ;;  %5984 = vmatpush.msk.msra.mxu2 %vm714_vm0, %v5983_v60 }
  0x60   : > { %5597 = vmatmul.msk.f32.gmra.mxu0 %vm220_vm1, %v463_v2  ;;  %245 = vst.msk [vmem:[#allocation2 + $0xd8] sm:$0x1] %vm241_vm3, %v6478_v3  ;;  %v498_v52 = vld [vmem:[#allocation2 + $0x179] sm:$0xff] }
  0x61   : > { %246 = vst.msk [vmem:[#allocation2 + $0x120] sm:$0x1] %vm241_vm3, %v6478_v3  ;;  %v6846_v30 = vld [vmem:[#allocation2 + $0x61] sm:$0xff] }
  0x62   : > { %247 = vst.msk [vmem:[#allocation2 + $0x168] sm:$0x1] %vm241_vm3, %v6478_v3  ;;  %v515_v53 = vld [vmem:[#allocation2 + $0x211] sm:$0xff] }
  0x63   : > { %248 = vst.msk [vmem:[#allocation2 + $0x1b0] sm:$0x1] %vm241_vm3, %v6478_v3  ;;  %v499_v57 = vld [vmem:[#allocation2 + $0x181] sm:$0xff] }
  0x64   : > { %5613 = vmatmul.msk.f32.gmra.mxu1 %vm220_vm1, %v6771_v4  ;;  %249 = vst.msk [vmem:[#allocation2 + $0x1f8] sm:$0x1] %vm241_vm3, %v6478_v3  ;;  %v391_v56 = vld [vmem:[#allocation2] sm:$0xff] }
  0x65   : > { %5626 = vmatmul.msk.f32.gmra.mxu2 %vm220_vm1, %v492_v5  ;;  %250 = vst.msk [vmem:[#allocation2 + $0x240] sm:$0x1] %vm241_vm3, %v6478_v3 }
  0x66   : > { %5643 = vmatmul.msk.f32.gmra.mxu3 %vm220_vm1, %v509_v6  ;;  %251 = vst.msk [vmem:[#allocation2 + $0x288] sm:$0x1] %vm241_vm3, %v6478_v3  ;;  %v6115_v6 = vld [vmem:[%s8740_s1 + $0x20] sm:$0xf]  ;;  %s5479_s1 = sshll.u32 %s5476_s0, 4  ;;  %s5480_s1 = int_to_ptr.hbm [resolvable:$true] %s5479_s1 }
  0x67   : > { %252 = vst.msk [vmem:[#allocation2 + $0x41] sm:$0x1] %vm241_vm3, %v6478_v3  ;;  %6116 = vmatpush.msk.msra.mxu0 %vm714_vm0, %v6115_v6 }
  0x68   : > { %5598 = vmatmul.msk.f32.gmra.mxu0 %vm220_vm1, %v6785_v11  ;;  %253 = vst.msk [vmem:[#allocation2 + $0x89] sm:$0x1] %vm241_vm3, %v6478_v3 }
  0x69   : > { %254 = vst.msk [vmem:[#allocation2 + $0xd1] sm:$0x1] %vm241_vm3, %v6478_v3 }
  0x6a   : > { %255 = vst.msk [vmem:[#allocation2 + $0x119] sm:$0x1] %vm241_vm3, %v6478_v3 }
  0x6b   : > { %256 = vst.msk [vmem:[#allocation2 + $0x161] sm:$0x1] %vm241_vm3, %v6478_v3 }
  0x6c   : > { %5614 = vmatmul.msk.f32.gmra.mxu1 %vm220_vm1, %v6788_v13  ;;  %257 = vst.msk [vmem:[#allocation2 + $0x1a9] sm:$0x1] %vm241_vm3, %v6478_v3 }
  0x6d   : > { %5627 = vmatmul.msk.f32.gmra.mxu2 %vm220_vm1, %v493_v14  ;;  %258 = vst.msk [vmem:[#allocation2 + $0x1f1] sm:$0x1] %vm241_vm3, %v6478_v3 }
  0x6e   : > { %5644 = vmatmul.msk.f32.gmra.mxu3 %vm220_vm1, %v510_v15  ;;  %259 = vst.msk [vmem:[#allocation2 + $0x239] sm:$0x1] %vm241_vm3, %v6478_v3 }
  0x6f   : > { %260 = vst.msk [vmem:[#allocation2 + $0x281] sm:$0x1] %vm241_vm3, %v6478_v3 }
  0x70   : > { %5599 = vmatmul.msk.f32.gmra.mxu0 %vm220_vm1, %v6803_v20  ;;  %261 = vst.msk [vmem:[#allocation2 + $0x2c9] sm:$0x1] %vm241_vm3, %v6478_v3  ;;  %v268_v3 = vld [vmem:[%s6634_s5 + $0x30] sm:$0xff] }
  0x71   : > { %331 = vst.msk [vmem:[#allocation2 + $0x69] sm:$0xff] %vm220_vm1, %v266_v35 }
  0x72   : > { %379 = vst.msk [vmem:[#allocation2 + $0x219] sm:$0xff] %vm220_vm1, %v314_v36 }
  0x73   : > { %363 = vst.msk [vmem:[#allocation2 + $0x189] sm:$0xff] %vm220_vm1, %v298_v38 }
  0x74   : > { %5615 = vmatmul.msk.f32.gmra.mxu1 %vm220_vm1, %v6806_v21  ;;  %332 = vst.msk [vmem:[#allocation2 + $0x71] sm:$0xff] %vm220_vm1, %v267_v40 }
  0x75   : > { %5628 = vmatmul.msk.f32.gmra.mxu2 %vm220_vm1, %v494_v23  ;;  %380 = vst.msk [vmem:[#allocation2 + $0x221] sm:$0xff] %vm220_vm1, %v315_v41  ;;  %v1332_v41 = vld [vmem:[#allocation2 + $0xa] sm:$0xff] }
  0x76   : > { %5645 = vmatmul.msk.f32.gmra.mxu3 %vm220_vm1, %v511_v24  ;;  %364 = vst.msk [vmem:[#allocation2 + $0x191] sm:$0xff] %vm220_vm1, %v299_v43 }
  0x77   : > { %333 = vst.msk [vmem:[#allocation2 + $0x79] sm:$0xff] %vm220_vm1, %v268_v3 }
  0x78   : > { %5600 = vmatmul.msk.f32.gmra.mxu0 %vm220_vm1, %v6820_v26  ;;  %v6901_v49 = vld [vmem:[#allocation2 + $0x69] sm:$0xff]  ;;  %381 = vst.msk [vmem:[#allocation2 + $0x229] sm:$0xff] %vm220_vm1, %v316_v45 }
  0x79   : > { %365 = vst.msk [vmem:[#allocation2 + $0x199] sm:$0xff] %vm220_vm1, %v300_v46  ;;  %v516_v58 = vld [vmem:[#allocation2 + $0x219] sm:$0xff]  ;;  %v397_v45 = vld [vmem:[#allocation2 + $0x30] sm:$0xff] }
  0x7a   : > { %334 = vst.msk [vmem:[#allocation2 + $0x81] sm:$0xff] %vm220_vm1, %v269_v47  ;;  %v500_v1 = vld [vmem:[#allocation2 + $0x189] sm:$0xff]  ;;  %v1333_v47 = vld [vmem:[#allocation2 + $0x12] sm:$0xff] }
  0x7b   : > { %382 = vst.msk [vmem:[#allocation2 + $0x231] sm:$0xff] %vm220_vm1, %v317_v50  ;;  %v6915_v55 = vld [vmem:[#allocation2 + $0x71] sm:$0xff] }
  0x7c   : > { %5616 = vmatmul.msk.f32.gmra.mxu1 %vm220_vm1, %v6824_v27  ;;  %335 = vst.msk [vmem:[#allocation2 + $0x91] sm:$0xff] %vm220_vm1, %v270_v54  ;;  %v517_v2 = vld [vmem:[#allocation2 + $0x221] sm:$0xff]  ;;  %v398_v54 = vld [vmem:[#allocation2 + $0x38] sm:$0xff] }
  0x7d   : > { %5629 = vmatmul.msk.f32.gmra.mxu2 %vm220_vm1, %v495_v28  ;;  %v501_v9 = vld [vmem:[#allocation2 + $0x191] sm:$0xff] }
  0x7e   : > { %5646 = vmatmul.msk.f32.gmra.mxu3 %vm220_vm1, %v512_v29  ;;  %v6927_v61 = vld [vmem:[#allocation2 + $0x79] sm:$0xff] }
  0x7f   : > { %v518_v10 = vld [vmem:[#allocation2 + $0x229] sm:$0xff]  ;;  %v395_v29 = vld [vmem:[#allocation2 + $0x20] sm:$0xff] }
  0x80   : > { %5601 = vmatmul.msk.f32.gmra.mxu0 %vm220_vm1, %v6846_v30  ;;  %v502_v18 = vld [vmem:[#allocation2 + $0x199] sm:$0xff] }
  0x81   : > { %v6942_v5 = vld [vmem:[#allocation2 + $0x81] sm:$0xff] }
  0x82   : > { %v519_v19 = vld [vmem:[#allocation2 + $0x231] sm:$0xff] }
  0x83   : > { %v6955_v14 = vld [vmem:[#allocation2 + $0x91] sm:$0xff] }
  0x84   : > { %5617 = vmatmul.msk.f32.gmra.mxu1 %vm220_vm1, %v6850_v31 }
  0x85   : > { %5630 = vmatmul.msk.f32.gmra.mxu2 %vm220_vm1, %v496_v32  ;;  %v1331_v32 = vld [vmem:[#allocation2 + $0x2] sm:$0xff] }
  0x86   : > { %5647 = vmatmul.msk.f32.gmra.mxu3 %vm220_vm1, %v513_v33  ;;  %v1865_v33 = vld [vmem:[#allocation2 + $0x48] sm:$0xff] }
  0x88   : > { %5602 = vmatmul.msk.f32.gmra.mxu0 %vm220_vm1, %v6901_v49 }
  0x8c   : > { %5618 = vmatmul.msk.f32.gmra.mxu1 %vm220_vm1, %v6876_v37 }
  0x8d   : > { %5631 = vmatmul.msk.f32.gmra.mxu2 %vm220_vm1, %v497_v39  ;;  %v396_v39 = vld [vmem:[#allocation2 + $0x28] sm:$0xff] }
  0x8e   : > { %5648 = vmatmul.msk.f32.gmra.mxu3 %vm220_vm1, %v514_v42 }
  0x90   : > { %5603 = vmatmul.msk.f32.gmra.mxu0 %vm220_vm1, %v6915_v55 }
  0x94   : > { %5619 = vmatmul.msk.f32.gmra.mxu1 %vm220_vm1, %v6899_v48 }
  0x95   : > { %5632 = vmatmul.msk.f32.gmra.mxu2 %vm220_vm1, %v498_v52 }
  0x96   : > { %5649 = vmatmul.msk.f32.gmra.mxu3 %vm220_vm1, %v515_v53 }
  0x98   : > { %5604 = vmatmul.msk.f32.gmra.mxu0 %vm220_vm1, %v6927_v61 }
  0x9c   : > { %5655 = vmatmul.msk.f32.vlgmr.msrb.gmra.mxu1 %vm220_vm1, %v391_v56 }
  0x9d   : > { %5633 = vmatmul.msk.f32.gmra.mxu2 %vm220_vm1, %v499_v57  ;;  %v1334_v57 = vld [vmem:[#allocation2 + $0x1a] sm:$0xff] }
  0x9e   : > { %5650 = vmatmul.msk.f32.gmra.mxu3 %vm220_vm1, %v516_v58 }
  0xa0   : > { %5605 = vmatmul.msk.f32.gmra.mxu0 %vm220_vm1, %v6942_v5 }
  0xa4   : > { %5656 = vmatmul.msk.f32.gmra.mxu1 %vm220_vm1, %v392_v0  ;;  %v1335_v0 = vld [vmem:[#allocation2 + $0x22] sm:$0xff] }
  0xa5   : > { %5634 = vmatmul.msk.f32.gmra.mxu2 %vm220_vm1, %v500_v1  ;;  %v6947_v7 = vpop.f32.mrf.mxu0 }
  0xa6   : > { %5651 = vmatmul.msk.f32.gmra.mxu3 %vm220_vm1, %v517_v2 }
  0xa8   : > { %5606 = vmatmul.msk.f32.gmra.mxu0 %vm220_vm1, %v6955_v14 }
  0xac   : > { %5657 = vmatmul.msk.f32.gmra.mxu1 %vm220_vm1, %v393_v8 }
  0xad   : > { %5635 = vmatmul.msk.f32.gmra.mxu2 %vm220_vm1, %v501_v9  ;;  %v6957_v15 = vpop.f32.mrf.mxu0  ;;  %v1336_v9 = vld [vmem:[#allocation2 + $0x2a] sm:$0xff] }
  0xae   : > { %5652 = vmatmul.msk.f32.gmra.mxu3 %vm220_vm1, %v518_v10 }
  0xb0   : > { %5853 = vmatmul.msk.f32.vlgmr.msrb.gmra.mxu0 %vm220_vm1, %v6785_v11  ;;  %v1866_v11 = vld [vmem:[#allocation2 + $0x50] sm:$0xff] }
  0xb1   : > { %v6959_v16 = vpop.f32.mrf.mxu1 }
  0xb4   : > { %5658 = vmatmul.msk.f32.gmra.mxu1 %vm220_vm1, %v394_v17 }
  0xb5   : > { %5636 = vmatmul.msk.f32.gmra.mxu2 %vm220_vm1, %v502_v18  ;;  %v6968_v24 = vpop.f32.mrf.mxu0 }
  0xb6   : > { %5653 = vmatmul.msk.f32.gmra.mxu3 %vm220_vm1, %v519_v19 }
  0xb8   : > { %v6966_v23 = vpop.f32.mrf.mxu2  ;;  %5854 = vmatmul.msk.f32.gmra.mxu0 %vm220_vm1, %v6803_v20  ;;  %v1867_v20 = vld [vmem:[#allocation2 + $0x58] sm:$0xff] }
  0xb9   : > { %v6970_v25 = vpop.f32.mrf.mxu1  ;;  %v6972_v28 = vpop.f32.mrf.mxu3 }
  0xba   : > { %8742 = vst [vmem:[#allocation7_spill] sm:$0xff] %v6972_v28 }
  0xbc   : > { %5659 = vmatmul.msk.f32.gmra.mxu1 %vm220_vm1, %v395_v29  ;;  %v1337_v29 = vld [vmem:[#allocation2 + $0x32] sm:$0xff] }
  0xbd   : > { %5721 = vmatmul.msk.f32.vlgmr.msrb.gmra.mxu2 %vm220_vm1, %v1331_v32  ;;  %v6981_v36 = vpop.f32.mrf.mxu0 }
  0xbe   : > { %5787 = vmatmul.msk.f32.vlgmr.msrb.gmra.mxu3 %vm220_vm1, %v1865_v33 }
  0xc0   : > { %v6979_v35 = vpop.f32.mrf.mxu2  ;;  %5855 = vmatmul.msk.f32.gmra.mxu0 %vm220_vm1, %v6820_v26  ;;  %v1868_v26 = vld [vmem:[#allocation2 + $0x60] sm:$0xff] }
  0xc1   : > { %v6983_v38 = vpop.f32.mrf.mxu1  ;;  %v6985_v40 = vpop.f32.mrf.mxu3 }
  0xc2   : > { %8743 = vst [vmem:[#allocation8_spill] sm:$0xff] %v6985_v40  ;;  %v1344_v40 = vld [vmem:[#allocation2 + $0x72] sm:$0xff] }
  0xc4   : > { %5660 = vmatmul.msk.f32.gmra.mxu1 %vm220_vm1, %v396_v39 }
  0xc5   : > { %5722 = vmatmul.msk.f32.gmra.mxu2 %vm220_vm1, %v1332_v41  ;;  %v6994_v43 = vpop.f32.mrf.mxu0 }
  0xc6   : > { %5788 = vmatmul.msk.f32.gmra.mxu3 %vm220_vm1, %v1866_v11 }
  0xc8   : > { %v6992_v42 = vpop.f32.mrf.mxu2  ;;  %5856 = vmatmul.msk.f32.gmra.mxu0 %vm220_vm1, %v6846_v30  ;;  %v1869_v30 = vld [vmem:[#allocation2 + $0x68] sm:$0xff] }
  0xc9   : > { %v6996_v3 = vpop.f32.mrf.mxu1  ;;  %v6998_v46 = vpop.f32.mrf.mxu3 }
  0xca   : > { %8744 = vst [vmem:[#allocation9_spill] sm:$0xff] %v6998_v46 }
  0xcc   : > { %5661 = vmatmul.msk.f32.gmra.mxu1 %vm220_vm1, %v397_v45 }
  0xcd   : > { %5723 = vmatmul.msk.f32.gmra.mxu2 %vm220_vm1, %v1333_v47  ;;  %v7007_v52 = vpop.f32.mrf.mxu0 }
  0xce   : > { %5789 = vmatmul.msk.f32.gmra.mxu3 %vm220_vm1, %v1867_v20 }
  0xd0   : > { %v7005_v50 = vpop.f32.mrf.mxu2  ;;  %5857 = vmatmul.msk.f32.gmra.mxu0 %vm220_vm1, %v6901_v49  ;;  %v1870_v49 = vld [vmem:[#allocation2 + $0x70] sm:$0xff] }
  0xd1   : > { %v7009_v53 = vpop.f32.mrf.mxu1  ;;  %v7011_v56 = vpop.f32.mrf.mxu3 }
  0xd2   : > { %8745 = vst [vmem:[#allocation10_spill] sm:$0xff] %v7011_v56  ;;  %v1343_v56 = vld [vmem:[#allocation2 + $0x6a] sm:$0xff] }
  0xd4   : > { %5662 = vmatmul.msk.f32.gmra.mxu1 %vm220_vm1, %v398_v54  ;;  %v1339_v54 = vld [vmem:[#allocation2 + $0x4a] sm:$0xff] }
  0xd5   : > { %5724 = vmatmul.msk.f32.gmra.mxu2 %vm220_vm1, %v1334_v57  ;;  %v7020_v60 = vpop.f32.mrf.mxu0 }
  0xd6   : > { %5790 = vmatmul.msk.f32.gmra.mxu3 %vm220_vm1, %v1868_v26 }
  0xd8   : > { %v7018_v58 = vpop.f32.mrf.mxu2  ;;  %5858 = vmatmul.msk.f32.gmra.mxu0 %vm220_vm1, %v6915_v55  ;;  %v1871_v55 = vld [vmem:[#allocation2 + $0x78] sm:$0xff] }
  0xd9   : > { %v7022_v62 = vpop.f32.mrf.mxu1  ;;  %v7024_v63 = vpop.f32.mrf.mxu3 }
  0xda   : > { %8746 = vst [vmem:[#allocation11_spill] sm:$0xff] %v7024_v63 }
  0xdc   : > { %5663 = vmatmul.msk.f32.gmra.mxu1 %vm220_vm1, %v1865_v33 }
  0xdd   : > { %5725 = vmatmul.msk.f32.gmra.mxu2 %vm220_vm1, %v1335_v0  ;;  %v7033_v2 = vpop.f32.mrf.mxu0 }
  0xde   : > { %5791 = vmatmul.msk.f32.gmra.mxu3 %vm220_vm1, %v1869_v30 }
  0xe0   : > { %v7031_v1 = vpop.f32.mrf.mxu2  ;;  %5859 = vmatmul.msk.f32.gmra.mxu0 %vm220_vm1, %v6927_v61  ;;  %v1872_v61 = vld [vmem:[#allocation2 + $0x80] sm:$0xff] }
  0xe1   : > { %v7035_v6 = vpop.f32.mrf.mxu1  ;;  %v7037_v8 = vpop.f32.mrf.mxu3 }
  0xe2   : > { %8747 = vst [vmem:[#allocation12_spill] sm:$0xff] %v7037_v8 }
  0xe4   : > { %5664 = vmatmul.msk.f32.gmra.mxu1 %vm220_vm1, %v1866_v11  ;;  %v1338_v11 = vld [vmem:[#allocation2 + $0x3a] sm:$0xff] }
  0xe5   : > { %5726 = vmatmul.msk.f32.gmra.mxu2 %vm220_vm1, %v1336_v9  ;;  %v7046_v17 = vpop.f32.mrf.mxu0 }
  0xe6   : > { %5792 = vmatmul.msk.f32.gmra.mxu3 %vm220_vm1, %v1870_v49 }
  0xe8   : > { %v7044_v10 = vpop.f32.mrf.mxu2  ;;  %5860 = vmatmul.msk.f32.gmra.mxu0 %vm220_vm1, %v6942_v5  ;;  %v1873_v5 = vld [vmem:[#allocation2 + $0x90] sm:$0xff] }
  0xe9   : > { %8748 = vst [vmem:[#allocation13_spill] sm:$0xff] %v7044_v10  ;;  %v7048_v18 = vpop.f32.mrf.mxu1  ;;  %v7050_v19 = vpop.f32.mrf.mxu3  ;;  %v1349_v10 = vld [vmem:[#allocation2 + $0xa2] sm:$0xff] }
  0xea   : > { %8749 = vst [vmem:[#allocation14_spill] sm:$0xff] %v7050_v19 }
  0xec   : > { %5665 = vmatmul.msk.f32.gmra.mxu1 %vm220_vm1, %v1867_v20 }
  0xed   : > { %5727 = vmatmul.msk.f32.gmra.mxu2 %vm220_vm1, %v1337_v29  ;;  %v7061_v39 = vpop.f32.mrf.mxu0  ;;  %v1340_v29 = vld [vmem:[#allocation2 + $0x52] sm:$0xff] }
  0xee   : > { %5793 = vmatmul.msk.f32.gmra.mxu3 %vm220_vm1, %v1871_v55 }
  0xf0   : > { %v7057_v32 = vpop.f32.mrf.mxu2  ;;  %5861 = vmatmul.msk.f32.gmra.mxu0 %vm220_vm1, %v6955_v14  ;;  %v1874_v14 = vld [vmem:[#allocation2 + $0x98] sm:$0xff] }
  0xf1   : > { %8750 = vst [vmem:[#allocation15_spill] sm:$0xff] %v7057_v32  ;;  %v7059_v33 = vpop.f32.mrf.mxu1  ;;  %v7063_v41 = vpop.f32.mrf.mxu3 }
  0xf2   : > { %8751 = vst [vmem:[#allocation16_spill] sm:$0xff] %v7063_v41 }
  0xf4   : > { %5666 = vmatmul.msk.f32.gmra.mxu1 %vm220_vm1, %v1868_v26 }
  0xf5   : > { %5728 = vmatmul.msk.f32.gmra.mxu2 %vm220_vm1, %v1338_v11  ;;  %v7078_v57 = vpop.f32.mrf.mxu0 }
  0xf6   : > { %5794 = vmatmul.msk.f32.gmra.mxu3 %vm220_vm1, %v1872_v61 }
  0xf8   : > { %v7070_v45 = vpop.f32.mrf.mxu2  ;;  %5862 = vmatmul.msk.f32.gmra.mxu0 %vm220_vm1, %v6655_v12  ;;  %v1875_v12 = vld [vmem:[#allocation2 + $0xa0] sm:$0xff] }
  0xf9   : > { %8752 = vst [vmem:[#allocation17_spill] sm:$0xff] %v7070_v45  ;;  %v7072_v47 = vpop.f32.mrf.mxu1  ;;  %v7074_v20 = vpop.f32.mrf.mxu3 }
  0xfa   : > { %8753 = vst [vmem:[#allocation18_spill] sm:$0xff] %v7074_v20 }
  0xfc   : > { %5667 = vmatmul.msk.f32.gmra.mxu1 %vm220_vm1, %v1869_v30 }
  0xfd   : > { %5729 = vmatmul.msk.f32.gmra.mxu2 %vm220_vm1, %v1339_v54  ;;  %v7093_v30 = vpop.f32.mrf.mxu0 }
  0xfe   : > { %5795 = vmatmul.msk.f32.gmra.mxu3 %vm220_vm1, %v1873_v5 }
 0x100   : > { %v7083_v26 = vpop.f32.mrf.mxu2  ;;  %5863 = vmatmul.msk.f32.gmra.mxu0 %vm220_vm1, %v6681_v22  ;;  %v1876_v22 = vld [vmem:[#allocation2 + $0xa8] sm:$0xff] }
 0x101   : > { %8754 = vst [vmem:[#allocation19_spill] sm:$0xff] %v7083_v26  ;;  %v7085_v0 = vpop.f32.mrf.mxu1  ;;  %v7087_v9 = vpop.f32.mrf.mxu3 }
 0x102   : > { %8755 = vst [vmem:[#allocation20_spill] sm:$0xff] %v7087_v9  ;;  %v1341_v9 = vld [vmem:[#allocation2 + $0x5a] sm:$0xff] }
 0x104   : > { %5668 = vmatmul.msk.f32.gmra.mxu1 %vm220_vm1, %v1870_v49 }
 0x105   : > { %5730 = vmatmul.msk.f32.gmra.mxu2 %vm220_vm1, %v1340_v29  ;;  %v7107_v49 = vpop.f32.mrf.mxu0 }
 0x106   : > { %5796 = vmatmul.msk.f32.gmra.mxu3 %vm220_vm1, %v1874_v14 }
 0x108   : > { %v7096_v11 = vpop.f32.mrf.mxu2  ;;  %5864 = vmatmul.msk.f32.gmra.mxu0 %vm220_vm1, %v6704_v34  ;;  %v1877_v34 = vld [vmem:[#allocation2 + $0xb0] sm:$0xff] }
 0x109   : > { %8756 = vst [vmem:[#allocation21_spill] sm:$0xff] %v7096_v11  ;;  %v7098_v54 = vpop.f32.mrf.mxu1  ;;  %v7100_v20 = vpop.f32.mrf.mxu3 }
 0x10a   : > { %8757 = vst [vmem:[#allocation22_spill] sm:$0xff] %v7100_v20  ;;  %v1342_v20 = vld [vmem:[#allocation2 + $0x62] sm:$0xff] }
 0x10c   : > { %5669 = vmatmul.msk.f32.gmra.mxu1 %vm220_vm1, %v1871_v55 }
 0x10d   : > { %5731 = vmatmul.msk.f32.gmra.mxu2 %vm220_vm1, %v1341_v9  ;;  %v7120_v55 = vpop.f32.mrf.mxu0 }
 0x10e   : > { %5797 = vmatmul.msk.f32.gmra.mxu3 %vm220_vm1, %v1875_v12 }
 0x110   : > { %v7109_v29 = vpop.f32.mrf.mxu2  ;;  %5865 = vmatmul.msk.f32.gmra.mxu0 %vm220_vm1, %v6725_v44  ;;  %v1878_v44 = vld [vmem:[#allocation2 + $0xb8] sm:$0xff] }
 0x111   : > { %8758 = vst [vmem:[#allocation23_spill] sm:$0xff] %v7109_v29  ;;  %v7111_v41 = vpop.f32.mrf.mxu1  ;;  %v7113_v19 = vpop.f32.mrf.mxu3  ;;  %v1347_v29 = vld [vmem:[#allocation2 + $0x92] sm:$0xff] }
 0x112   : > { %8759 = vst [vmem:[#allocation24_spill] sm:$0xff] %v7113_v19 }
 0x114   : > { %5670 = vmatmul.msk.f32.gmra.mxu1 %vm220_vm1, %v1872_v61 }
 0x115   : > { %5732 = vmatmul.msk.f32.gmra.mxu2 %vm220_vm1, %v1342_v20  ;;  %v7131_v61 = vpop.f32.mrf.mxu0 }
 0x116   : > { %5798 = vmatmul.msk.f32.gmra.mxu3 %vm220_vm1, %v1876_v22 }
 0x118   : > { %v7122_v9 = vpop.f32.mrf.mxu2  ;;  %5866 = vmatmul.msk.f32.gmra.mxu0 %vm220_vm1, %v6740_v51  ;;  %v1879_v51 = vld [vmem:[#allocation2 + $0xc0] sm:$0xff] }
 0x119   : > { %8760 = vst [vmem:[#allocation25_spill] sm:$0xff] %v7122_v9  ;;  %v1139_v8 = vpop.f32.mrf.mxu1  ;;  %v7124_v63 = vpop.f32.mrf.mxu3  ;;  %v1346_v9 = vld [vmem:[#allocation2 + $0x82] sm:$0xff] }
 0x11a   : > { %8761 = vst [vmem:[#allocation26_spill] sm:$0xff] %v7124_v63 }
 0x11c   : > { %5671 = vmatmul.msk.f32.gmra.mxu1 %vm220_vm1, %v1873_v5 }
 0x11d   : > { %5733 = vmatmul.msk.f32.gmra.mxu2 %vm220_vm1, %v1343_v56  ;;  %v7142_v56 = vpop.f32.mrf.mxu0 }
 0x11e   : > { %5799 = vmatmul.msk.f32.gmra.mxu3 %vm220_vm1, %v1877_v34 }
 0x120   : > { %v7133_v20 = vpop.f32.mrf.mxu2  ;;  %5867 = vmatmul.msk.f32.gmra.mxu0 %vm220_vm1, %v6756_v59  ;;  %v1880_v59 = vld [vmem:[#allocation2 + $0xc8] sm:$0xff] }
 0x121   : > { %8762 = vst [vmem:[#allocation27_spill] sm:$0xff] %v7133_v20  ;;  %v1142_v19 = vpop.f32.mrf.mxu1  ;;  %v7135_v46 = vpop.f32.mrf.mxu3  ;;  %v1345_v20 = vld [vmem:[#allocation2 + $0x7a] sm:$0xff] }
 0x122   : > { %8763 = vst [vmem:[#allocation28_spill] sm:$0xff] %v7135_v46 }
 0x124   : > { %5672 = vmatmul.msk.f32.gmra.mxu1 %vm220_vm1, %v1874_v14 }
 0x125   : > { %5734 = vmatmul.msk.f32.gmra.mxu2 %vm220_vm1, %v1344_v40  ;;  %v7153_v40 = vpop.f32.mrf.mxu0 }
 0x126   : > { %5800 = vmatmul.msk.f32.gmra.mxu3 %vm220_vm1, %v1878_v44 }
 0x128   : > { %v7144_v5 = vpop.f32.mrf.mxu2  ;;  %5868 = vmatmul.msk.f32.gmra.mxu0 %vm220_vm1, %v6771_v4  ;;  %v1881_v4 = vld [vmem:[#allocation2 + $0xd8] sm:$0xff] }
 0x129   : > { %8764 = vst [vmem:[#allocation29_spill] sm:$0xff] %v7144_v5  ;;  %v1145_v63 = vpop.f32.mrf.mxu1  ;;  %v7146_v28 = vpop.f32.mrf.mxu3 }
 0x12a   : > { %8765 = vst [vmem:[#allocation30_spill] sm:$0xff] %v7146_v28 }
 0x12c   : > { %5673 = vmatmul.msk.f32.gmra.mxu1 %vm220_vm1, %v1875_v12 }
 0x12d   : > { %5735 = vmatmul.msk.f32.gmra.mxu2 %vm220_vm1, %v1345_v20  ;;  %v2677_v12 = vpop.f32.mrf.mxu0 }
 0x12e   : > { %5801 = vmatmul.msk.f32.gmra.mxu3 %vm220_vm1, %v1879_v51 }
 0x130   : > { %v7155_v14 = vpop.f32.mrf.mxu2  ;;  %5869 = vmatmul.msk.f32.gmra.mxu0 %vm220_vm1, %v6788_v13 }
 0x131   : > { %8766 = vst [vmem:[#allocation31_spill] sm:$0xff] %v7155_v14  ;;  %v1148_v46 = vpop.f32.mrf.mxu1  ;;  %v7157_v5 = vpop.f32.mrf.mxu3 }
 0x132   : > { %8767 = vst [vmem:[#allocation32_spill] sm:$0xff] %v7157_v5 }
 0x134   : > { %5674 = vmatmul.msk.f32.gmra.mxu1 %vm220_vm1, %v1876_v22  ;;  %v1140_v22 = vadd.f32 %v1139_v8, %v6947_v7  ;;  %v1143_v7 = vadd.f32 %v1142_v19, %v6957_v15  ;;  %v1146_v15 = vadd.f32 %v1145_v63, %v6968_v24  ;;  %v1149_v24 = vadd.f32 %v1148_v46, %v6981_v36 }
 0x135   : > { %5736 = vmatmul.msk.f32.gmra.mxu2 %vm220_vm1, %v1346_v9  ;;  %v2680_v9 = vpop.f32.mrf.mxu0 }
 0x136   : > { %5802 = vmatmul.msk.f32.gmra.mxu3 %vm220_vm1, %v1880_v59 }
 0x138   : > { %v7164_v20 = vpop.f32.mrf.mxu2  ;;  %5870 = vmatmul.msk.f32.gmra.mxu0 %vm220_vm1, %v6806_v21 }
 0x139   : > { %8768 = vst [vmem:[#allocation33_spill] sm:$0xff] %v7164_v20  ;;  %v7166_v28 = vpop.f32.mrf.mxu1  ;;  %v7168_v14 = vpop.f32.mrf.mxu3 }
 0x13a   : > { %8769 = vst [vmem:[#allocation34_spill] sm:$0xff] %v7168_v14  ;;  %v1348_v14 = vld [vmem:[#allocation2 + $0x9a] sm:$0xff]  ;;  %v1152_v36 = vadd.f32 %v7166_v28, %v6994_v43 }
 0x13c   : > { %5675 = vmatmul.msk.f32.gmra.mxu1 %vm220_vm1, %v1877_v34  ;;  %v1882_v34 = vld [vmem:[#allocation2 + $0xe0] sm:$0xff] }
 0x13d   : > { %5737 = vmatmul.msk.f32.gmra.mxu2 %vm220_vm1, %v1347_v29  ;;  %v2683_v8 = vpop.f32.mrf.mxu0 }
 0x13e   : > { %5803 = vmatmul.msk.f32.gmra.mxu3 %vm220_vm1, %v1881_v4 }
 0x140   : > { %v1609_v5 = vpop.f32.mrf.mxu2  ;;  %5871 = vmatmul.msk.f32.gmra.mxu0 %vm220_vm1, %v6824_v27 }
 0x141   : > { %v1801_v20 = vadd.f32 %v1609_v5, %v1140_v22  ;;  %v7176_v11 = vpop.f32.mrf.mxu1  ;;  %v2143_v26 = vpop.f32.mrf.mxu3 }
 0x142   : > { %v1155_v28 = vadd.f32 %v7176_v11, %v7007_v52 }
 0x143   : > { %v2335_v13 = vadd.f32 %v2143_v26, %v1801_v20  ;;  %v1883_v26 = vld [vmem:[#allocation2 + $0xe8] sm:$0xff] }
 0x144   : > { %5676 = vmatmul.msk.f32.gmra.mxu1 %vm220_vm1, %v1878_v44 }
 0x145   : > { %v7181_v45 = vadd.f32 %v2677_v12, %v2335_v13  ;;  %5738 = vmatmul.msk.f32.gmra.mxu2 %vm220_vm1, %v1348_v14  ;;  %v2686_v19 = vpop.f32.mrf.mxu0 }
 0x146   : > { %5804 = vmatmul.msk.f32.gmra.mxu3 %vm220_vm1, %v1882_v34 }
 0x148   : > { %v1612_v29 = vpop.f32.mrf.mxu2  ;;  %5872 = vmatmul.msk.f32.gmra.mxu0 %vm220_vm1, %v6850_v31 }
 0x149   : > { %v1802_v5 = vadd.f32 %v1612_v29, %v1143_v7  ;;  %v7186_v22 = vpop.f32.mrf.mxu1  ;;  %v2146_v32 = vpop.f32.mrf.mxu3  ;;  %v1350_v7 = vld [vmem:[#allocation2 + $0xaa] sm:$0xff] }
 0x14a   : > { %v1158_v52 = vadd.f32 %v7186_v22, %v7020_v60 }
 0x14b   : > { %v2336_v21 = vadd.f32 %v2146_v32, %v1802_v5  ;;  %v1884_v32 = vld [vmem:[#allocation2 + $0xf0] sm:$0xff] }
 0x14c   : > { %5677 = vmatmul.msk.f32.gmra.mxu1 %vm220_vm1, %v1879_v51 }
 0x14d   : > { %v7191_v44 = vadd.f32 %v2680_v9, %v2336_v21  ;;  %5739 = vmatmul.msk.f32.gmra.mxu2 %vm220_vm1, %v1349_v10  ;;  %v2689_v63 = vpop.f32.mrf.mxu0  ;;  %v1351_v21 = vld [vmem:[#allocation2 + $0xb2] sm:$0xff] }
 0x14e   : > { %5805 = vmatmul.msk.f32.gmra.mxu3 %vm220_vm1, %v1883_v26 }
 0x150   : > { %v1615_v14 = vpop.f32.mrf.mxu2  ;;  %5873 = vmatmul.msk.f32.gmra.mxu0 %vm220_vm1, %v6876_v37  ;;  %v1352_v37 = vld [vmem:[#allocation2 + $0xba] sm:$0xff] }
 0x151   : > { %v1803_v12 = vadd.f32 %v1615_v14, %v1146_v15  ;;  %v7196_v20 = vpop.f32.mrf.mxu1  ;;  %v2149_v13 = vpop.f32.mrf.mxu3 }
 0x152   : > { %v1161_v60 = vadd.f32 %v7196_v20, %v7033_v2 }
 0x153   : > { %v2337_v27 = vadd.f32 %v2149_v13, %v1803_v12 }
 0x154   : > { %5678 = vmatmul.msk.f32.gmra.mxu1 %vm220_vm1, %v1880_v59  ;;  %v1885_v59 = vld [vmem:[#allocation2 + $0xf8] sm:$0xff] }
 0x155   : > { %v7201_v51 = vadd.f32 %v2683_v8, %v2337_v27  ;;  %5740 = vmatmul.msk.f32.gmra.mxu2 %vm220_vm1, %v1350_v7  ;;  %v2692_v46 = vpop.f32.mrf.mxu0  ;;  %v2421_v27 = vld [vmem:[#allocation2 + $0x109] sm:$0xff] }
 0x156   : > { %5806 = vmatmul.msk.f32.gmra.mxu3 %vm220_vm1, %v1884_v32 }
 0x158   : > { %v1618_v10 = vpop.f32.mrf.mxu2  ;;  %5874 = vmatmul.msk.f32.gmra.mxu0 %vm220_vm1, %v6899_v48 }
 0x159   : > { %v1804_v9 = vadd.f32 %v1618_v10, %v1149_v24  ;;  %v7206_v29 = vpop.f32.mrf.mxu1  ;;  %v2152_v5 = vpop.f32.mrf.mxu3 }
 0x15a   : > { %v1164_v2 = vadd.f32 %v7206_v29, %v7046_v17 }
 0x15b   : > { %v2338_v31 = vadd.f32 %v2152_v5, %v1804_v9  ;;  %v1353_v5 = vld [vmem:[#allocation2 + $0xc2] sm:$0xff] }
 0x15c   : > { %5679 = vmatmul.msk.f32.gmra.mxu1 %vm220_vm1, %v1881_v4 }
 0x15d   : > { %v7211_v8 = vadd.f32 %v2686_v19, %v2338_v31  ;;  %5741 = vmatmul.msk.f32.gmra.mxu2 %vm220_vm1, %v1351_v21  ;;  %v1886_v19 = vld [vmem:[#allocation2 + $0x100] sm:$0xff]  ;;  %v2695_v43 = vpop.f32.mrf.mxu0  ;;  %v2422_v31 = vld [vmem:[#allocation2 + $0x111] sm:$0xff] }
 0x15e   : > { %5807 = vmatmul.msk.f32.gmra.mxu3 %vm220_vm1, %v1885_v59 }
 0x160   : > { %v1621_v15 = vpop.f32.mrf.mxu2  ;;  %5875 = vmatmul.msk.f32.gmra.mxu0 %vm220_vm1, %v2421_v27 }
 0x161   : > { %v1805_v14 = vadd.f32 %v1621_v15, %v1152_v36  ;;  %v7217_v12 = vpop.f32.mrf.mxu1  ;;  %v2155_v13 = vpop.f32.mrf.mxu3 }
 0x162   : > { %v1167_v17 = vadd.f32 %v7217_v12, %v7061_v39 }
 0x163   : > { %v2339_v4 = vadd.f32 %v2155_v13, %v1805_v14 }
 0x164   : > { %5680 = vmatmul.msk.f32.gmra.mxu1 %vm220_vm1, %v1882_v34 }
 0x165   : > { %v7222_v7 = vadd.f32 %v2689_v63, %v2339_v4  ;;  %5742 = vmatmul.msk.f32.gmra.mxu2 %vm220_vm1, %v1352_v37  ;;  %v1887_v63 = vld [vmem:[#allocation2 + $0x108] sm:$0xff]  ;;  %v2698_v11 = vpop.f32.mrf.mxu0 }
 0x166   : > { %5808 = vmatmul.msk.f32.gmra.mxu3 %vm220_vm1, %v1886_v19  ;;  %v1354_v37 = vld [vmem:[#allocation2 + $0xca] sm:$0xff] }
 0x168   : > { %v1624_v24 = vpop.f32.mrf.mxu2  ;;  %5876 = vmatmul.msk.f32.gmra.mxu0 %vm220_vm1, %v2422_v31 }
 0x169   : > { %v1806_v10 = vadd.f32 %v1624_v24, %v1155_v28  ;;  %v7228_v9 = vpop.f32.mrf.mxu1  ;;  %v2158_v48 = vpop.f32.mrf.mxu3  ;;  %v2423_v28 = vld [vmem:[#allocation2 + $0x121] sm:$0xff] }
 0x16a   : > { %v1170_v39 = vadd.f32 %v7228_v9, %v7078_v57 }
 0x16b   : > { %v2340_v34 = vadd.f32 %v2158_v48, %v1806_v10 }
 0x16c   : > { %5681 = vmatmul.msk.f32.gmra.mxu1 %vm220_vm1, %v1883_v26 }
 0x16d   : > { %v7232_v21 = vadd.f32 %v2692_v46, %v2340_v34  ;;  %5743 = vmatmul.msk.f32.gmra.mxu2 %vm220_vm1, %v1353_v5  ;;  %v1888_v46 = vld [vmem:[#allocation2 + $0x110] sm:$0xff]  ;;  %v2701_v22 = vpop.f32.mrf.mxu0  ;;  %v1355_v5 = vld [vmem:[#allocation2 + $0xda] sm:$0xff] }
 0x16e   : > { %5809 = vmatmul.msk.f32.gmra.mxu3 %vm220_vm1, %v1887_v63 }
 0x170   : > { %v1627_v36 = vpop.f32.mrf.mxu2  ;;  %5877 = vmatmul.msk.f32.gmra.mxu0 %vm220_vm1, %v2423_v28 }
 0x171   : > { %v1807_v15 = vadd.f32 %v1627_v36, %v1158_v52  ;;  %v7238_v14 = vpop.f32.mrf.mxu1  ;;  %v2161_v13 = vpop.f32.mrf.mxu3  ;;  %v2424_v52 = vld [vmem:[#allocation2 + $0x129] sm:$0xff] }
 0x172   : > { %v1173_v57 = vadd.f32 %v7238_v14, %v7093_v30 }
 0x173   : > { %v2341_v26 = vadd.f32 %v2161_v13, %v1807_v15 }
 0x174   : > { %5682 = vmatmul.msk.f32.gmra.mxu1 %vm220_vm1, %v1884_v32 }
 0x175   : > { %v7242_v4 = vadd.f32 %v2695_v43, %v2341_v26  ;;  %5744 = vmatmul.msk.f32.gmra.mxu2 %vm220_vm1, %v1354_v37  ;;  %v1889_v43 = vld [vmem:[#allocation2 + $0x120] sm:$0xff]  ;;  %v2704_v20 = vpop.f32.mrf.mxu0 }
 0x176   : > { %5810 = vmatmul.msk.f32.gmra.mxu3 %vm220_vm1, %v1888_v46  ;;  %v1356_v37 = vld [vmem:[#allocation2 + $0xe2] sm:$0xff] }
 0x178   : > { %v1630_v27 = vpop.f32.mrf.mxu2  ;;  %5878 = vmatmul.msk.f32.gmra.mxu0 %vm220_vm1, %v2424_v52 }
 0x179   : > { %v1808_v24 = vadd.f32 %v1630_v27, %v1161_v60  ;;  %v7248_v10 = vpop.f32.mrf.mxu1  ;;  %v2164_v48 = vpop.f32.mrf.mxu3  ;;  %v2425_v60 = vld [vmem:[#allocation2 + $0x131] sm:$0xff] }
 0x17a   : > { %v1176_v30 = vadd.f32 %v7248_v10, %v7107_v49 }
 0x17b   : > { %v2342_v32 = vadd.f32 %v2164_v48, %v1808_v24 }
 0x17c   : > { %5683 = vmatmul.msk.f32.gmra.mxu1 %vm220_vm1, %v1885_v59 }
 0x17d   : > { %v7252_v34 = vadd.f32 %v2698_v11, %v2342_v32  ;;  %5745 = vmatmul.msk.f32.gmra.mxu2 %vm220_vm1, %v1355_v5  ;;  %v1890_v11 = vld [vmem:[#allocation2 + $0x128] sm:$0xff]  ;;  %v2707_v29 = vpop.f32.mrf.mxu0 }
 0x17e   : > { %5811 = vmatmul.msk.f32.gmra.mxu3 %vm220_vm1, %v1889_v43  ;;  %v1357_v5 = vld [vmem:[#allocation2 + $0xea] sm:$0xff] }
 0x180   : > { %v1633_v31 = vpop.f32.mrf.mxu2  ;;  %5879 = vmatmul.msk.f32.gmra.mxu0 %vm220_vm1, %v2425_v60 }
 0x181   : > { %v1809_v36 = vadd.f32 %v1633_v31, %v1164_v2  ;;  %v7258_v15 = vpop.f32.mrf.mxu1  ;;  %v2167_v13 = vpop.f32.mrf.mxu3  ;;  %v2426_v2 = vld [vmem:[#allocation2 + $0x139] sm:$0xff] }
 0x182   : > { %v1179_v49 = vadd.f32 %v7258_v15, %v7120_v55 }
 0x183   : > { %v2343_v59 = vadd.f32 %v2167_v13, %v1809_v36 }
 0x184   : > { %5684 = vmatmul.msk.f32.gmra.mxu1 %vm220_vm1, %v1886_v19 }
 0x185   : > { %v7262_v26 = vadd.f32 %v2701_v22, %v2343_v59  ;;  %5746 = vmatmul.msk.f32.gmra.mxu2 %vm220_vm1, %v1356_v37  ;;  %v1891_v22 = vld [vmem:[#allocation2 + $0x130] sm:$0xff]  ;;  %v2710_v12 = vpop.f32.mrf.mxu0 }
 0x186   : > { %5812 = vmatmul.msk.f32.gmra.mxu3 %vm220_vm1, %v1890_v11  ;;  %v1358_v37 = vld [vmem:[#allocation2 + $0xf2] sm:$0xff] }
 0x188   : > { %v1636_v28 = vpop.f32.mrf.mxu2  ;;  %5880 = vmatmul.msk.f32.gmra.mxu0 %vm220_vm1, %v2426_v2 }
 0x189   : > { %v1810_v27 = vadd.f32 %v1636_v28, %v1167_v17  ;;  %v7268_v24 = vpop.f32.mrf.mxu1  ;;  %v2170_v48 = vpop.f32.mrf.mxu3  ;;  %v2427_v17 = vld [vmem:[#allocation2 + $0x141] sm:$0xff] }
 0x18a   : > { %v1182_v55 = vadd.f32 %v7268_v24, %v7131_v61 }
 0x18b   : > { %v2344_v19 = vadd.f32 %v2170_v48, %v1810_v27 }
 0x18c   : > { %5685 = vmatmul.msk.f32.gmra.mxu1 %vm220_vm1, %v1887_v63 }
 0x18d   : > { %v7272_v32 = vadd.f32 %v2704_v20, %v2344_v19  ;;  %5747 = vmatmul.msk.f32.gmra.mxu2 %vm220_vm1, %v1357_v5  ;;  %v1892_v20 = vld [vmem:[#allocation2 + $0x138] sm:$0xff]  ;;  %v2713_v9 = vpop.f32.mrf.mxu0 }
 0x18e   : > { %5813 = vmatmul.msk.f32.gmra.mxu3 %vm220_vm1, %v1891_v22  ;;  %v1359_v5 = vld [vmem:[#allocation2 + $0xfa] sm:$0xff] }
 0x190   : > { %v1639_v52 = vpop.f32.mrf.mxu2  ;;  %5881 = vmatmul.msk.f32.gmra.mxu0 %vm220_vm1, %v2427_v17 }
 0x191   : > { %v1811_v31 = vadd.f32 %v1639_v52, %v1170_v39  ;;  %v7278_v36 = vpop.f32.mrf.mxu1  ;;  %v2173_v13 = vpop.f32.mrf.mxu3  ;;  %v2428_v39 = vld [vmem:[#allocation2 + $0x149] sm:$0xff] }
 0x192   : > { %v1185_v61 = vadd.f32 %v7278_v36, %v7142_v56 }
 0x193   : > { %v2345_v63 = vadd.f32 %v2173_v13, %v1811_v31 }
 0x194   : > { %5686 = vmatmul.msk.f32.gmra.mxu1 %vm220_vm1, %v1888_v46 }
 0x195   : > { %v7282_v59 = vadd.f32 %v2707_v29, %v2345_v63  ;;  %5748 = vmatmul.msk.f32.gmra.mxu2 %vm220_vm1, %v1358_v37  ;;  %v1893_v29 = vld [vmem:[#allocation2 + $0x140] sm:$0xff]  ;;  %v2716_v14 = vpop.f32.mrf.mxu0 }
 0x196   : > { %5814 = vmatmul.msk.f32.gmra.mxu3 %vm220_vm1, %v1892_v20  ;;  %v1360_v37 = vld [vmem:[#allocation2 + $0x102] sm:$0xff] }
 0x198   : > { %v1642_v60 = vpop.f32.mrf.mxu2  ;;  %5882 = vmatmul.msk.f32.gmra.mxu0 %vm220_vm1, %v2428_v39 }
 0x199   : > { %v1812_v28 = vadd.f32 %v1642_v60, %v1173_v57  ;;  %v7288_v27 = vpop.f32.mrf.mxu1  ;;  %v2176_v48 = vpop.f32.mrf.mxu3  ;;  %v2429_v57 = vld [vmem:[#allocation2 + $0x151] sm:$0xff] }
 0x19a   : > { %v1188_v56 = vadd.f32 %v7288_v27, %v7153_v40 }
 0x19b   : > { %v2346_v46 = vadd.f32 %v2176_v48, %v1812_v28 }
 0x19c   : > { %5687 = vmatmul.msk.f32.gmra.mxu1 %vm220_vm1, %v1889_v43 }
 0x19d   : > { %v7292_v19 = vadd.f32 %v2710_v12, %v2346_v46  ;;  %5749 = vmatmul.msk.f32.gmra.mxu2 %vm220_vm1, %v1359_v5  ;;  %v1894_v12 = vld [vmem:[#allocation2 + $0x148] sm:$0xff]  ;;  %v2719_v10 = vpop.f32.mrf.mxu0 }
 0x19e   : > { %5815 = vmatmul.msk.f32.gmra.mxu3 %vm220_vm1, %v1893_v29  ;;  %v1361_v5 = vld [vmem:[#allocation2 + $0x10a] sm:$0xff] }
 0x1a0   : > { %v1645_v2 = vpop.f32.mrf.mxu2  ;;  %5883 = vmatmul.msk.f32.gmra.mxu0 %vm220_vm1, %v2429_v57 }
 0x1a1   : > { %v1813_v52 = vadd.f32 %v1645_v2, %v1176_v30  ;;  %v7298_v31 = vpop.f32.mrf.mxu1  ;;  %v2179_v13 = vpop.f32.mrf.mxu3  ;;  %v2430_v30 = vld [vmem:[#allocation2 + $0x159] sm:$0xff] }
 0x1a2   : > { %v1191_v40 = vadd.f32 %v7298_v31, %v6959_v16 }
 0x1a3   : > { %v2347_v43 = vadd.f32 %v2179_v13, %v1813_v52 }
 0x1a4   : > { %5688 = vmatmul.msk.f32.gmra.mxu1 %vm220_vm1, %v1890_v11 }
 0x1a5   : > { %v7302_v63 = vadd.f32 %v2713_v9, %v2347_v43  ;;  %5750 = vmatmul.msk.f32.gmra.mxu2 %vm220_vm1, %v1360_v37  ;;  %v1895_v9 = vld [vmem:[#allocation2 + $0x150] sm:$0xff]  ;;  %v2722_v15 = vpop.f32.mrf.mxu0 }
 0x1a6   : > { %5816 = vmatmul.msk.f32.gmra.mxu3 %vm220_vm1, %v1894_v12  ;;  %v1362_v37 = vld [vmem:[#allocation2 + $0x112] sm:$0xff] }
 0x1a8   : > { %v1648_v17 = vpop.f32.mrf.mxu2  ;;  %5884 = vmatmul.msk.f32.gmra.mxu0 %vm220_vm1, %v2430_v30 }
 0x1a9   : > { %v1814_v60 = vadd.f32 %v1648_v17, %v1179_v49  ;;  %v7308_v28 = vpop.f32.mrf.mxu1  ;;  %v2182_v48 = vpop.f32.mrf.mxu3  ;;  %v2431_v49 = vld [vmem:[#allocation2 + $0x169] sm:$0xff] }
 0x1aa   : > { %v1194_v16 = vadd.f32 %v7308_v28, %v6970_v25 }
 0x1ab   : > { %v2348_v11 = vadd.f32 %v2182_v48, %v1814_v60 }
 0x1ac   : > { %5689 = vmatmul.msk.f32.gmra.mxu1 %vm220_vm1, %v1891_v22 }
 0x1ad   : > { %v7312_v46 = vadd.f32 %v2716_v14, %v2348_v11  ;;  %5751 = vmatmul.msk.f32.gmra.mxu2 %vm220_vm1, %v1361_v5  ;;  %v1896_v14 = vld [vmem:[#allocation2 + $0x158] sm:$0xff]  ;;  %v2725_v24 = vpop.f32.mrf.mxu0  ;;  %v1363_v5 = vld [vmem:[#allocation2 + $0x122] sm:$0xff] }
 0x1ae   : > { %5817 = vmatmul.msk.f32.gmra.mxu3 %vm220_vm1, %v1895_v9 }
 0x1b0   : > { %v1651_v39 = vpop.f32.mrf.mxu2  ;;  %5885 = vmatmul.msk.f32.gmra.mxu0 %vm220_vm1, %v2431_v49 }
 0x1b1   : > { %v1815_v2 = vadd.f32 %v1651_v39, %v1182_v55  ;;  %v7318_v52 = vpop.f32.mrf.mxu1  ;;  %v2185_v13 = vpop.f32.mrf.mxu3  ;;  %v2432_v55 = vld [vmem:[#allocation2 + $0x171] sm:$0xff] }
 0x1b2   : > { %v1197_v25 = vadd.f32 %v7318_v52, %v6983_v38 }
 0x1b3   : > { %v2349_v22 = vadd.f32 %v2185_v13, %v1815_v2 }
 0x1b4   : > { %5690 = vmatmul.msk.f32.gmra.mxu1 %vm220_vm1, %v1892_v20 }
 0x1b5   : > { %v7322_v43 = vadd.f32 %v2719_v10, %v2349_v22  ;;  %5752 = vmatmul.msk.f32.gmra.mxu2 %vm220_vm1, %v1362_v37  ;;  %v1897_v10 = vld [vmem:[#allocation2 + $0x168] sm:$0xff]  ;;  %v2728_v36 = vpop.f32.mrf.mxu0 }
 0x1b6   : > { %5818 = vmatmul.msk.f32.gmra.mxu3 %vm220_vm1, %v1896_v14  ;;  %v1364_v37 = vld [vmem:[#allocation2 + $0x12a] sm:$0xff] }
 0x1b8   : > { %v1654_v57 = vpop.f32.mrf.mxu2  ;;  %5886 = vmatmul.msk.f32.gmra.mxu0 %vm220_vm1, %v2432_v55 }
 0x1b9   : > { %v1816_v17 = vadd.f32 %v1654_v57, %v1185_v61  ;;  %v7328_v60 = vpop.f32.mrf.mxu1  ;;  %v2188_v48 = vpop.f32.mrf.mxu3  ;;  %v2433_v61 = vld [vmem:[#allocation2 + $0x179] sm:$0xff] }
 0x1ba   : > { %v1200_v38 = vadd.f32 %v7328_v60, %v6996_v3 }
 0x1bb   : > { %v2350_v20 = vadd.f32 %v2188_v48, %v1816_v17 }
 0x1bc   : > { %5691 = vmatmul.msk.f32.gmra.mxu1 %vm220_vm1, %v1893_v29 }
 0x1bd   : > { %v7332_v11 = vadd.f32 %v2722_v15, %v2350_v20  ;;  %5753 = vmatmul.msk.f32.gmra.mxu2 %vm220_vm1, %v1363_v5  ;;  %v1898_v15 = vld [vmem:[#allocation2 + $0x170] sm:$0xff]  ;;  %v2731_v27 = vpop.f32.mrf.mxu0 }
 0x1be   : > { %5819 = vmatmul.msk.f32.gmra.mxu3 %vm220_vm1, %v1897_v10  ;;  %v1365_v5 = vld [vmem:[#allocation2 + $0x132] sm:$0xff] }
 0x1c0   : > { %v1657_v30 = vpop.f32.mrf.mxu2  ;;  %5887 = vmatmul.msk.f32.gmra.mxu0 %vm220_vm1, %v2433_v61 }
 0x1c1   : > { %v1817_v39 = vadd.f32 %v1657_v30, %v1188_v56  ;;  %v7338_v2 = vpop.f32.mrf.mxu1  ;;  %v2191_v13 = vpop.f32.mrf.mxu3  ;;  %v2434_v56 = vld [vmem:[#allocation2 + $0x181] sm:$0xff] }
 0x1c2   : > { %v1203_v3 = vadd.f32 %v7338_v2, %v7009_v53 }
 0x1c3   : > { %v2351_v29 = vadd.f32 %v2191_v13, %v1817_v39 }
 0x1c4   : > { %5692 = vmatmul.msk.f32.gmra.mxu1 %vm220_vm1, %v1894_v12 }
 0x1c5   : > { %v7342_v22 = vadd.f32 %v2725_v24, %v2351_v29  ;;  %5754 = vmatmul.msk.f32.gmra.mxu2 %vm220_vm1, %v1364_v37  ;;  %v1899_v24 = vld [vmem:[#allocation2 + $0x178] sm:$0xff]  ;;  %v2734_v31 = vpop.f32.mrf.mxu0 }
 0x1c6   : > { %5820 = vmatmul.msk.f32.gmra.mxu3 %vm220_vm1, %v1898_v15  ;;  %v1366_v37 = vld [vmem:[#allocation2 + $0x13a] sm:$0xff] }
 0x1c8   : > { %v1660_v49 = vpop.f32.mrf.mxu2  ;;  %5888 = vmatmul.msk.f32.gmra.mxu0 %vm220_vm1, %v2434_v56 }
 0x1c9   : > { %v1818_v57 = vadd.f32 %v1660_v49, %v1191_v40  ;;  %v7348_v17 = vpop.f32.mrf.mxu1  ;;  %v2194_v48 = vpop.f32.mrf.mxu3  ;;  %v2435_v40 = vld [vmem:[#allocation2 + $0x189] sm:$0xff] }
 0x1ca   : > { %v1206_v53 = vadd.f32 %v7348_v17, %v7022_v62 }
 0x1cb   : > { %v2352_v12 = vadd.f32 %v2194_v48, %v1818_v57 }
 0x1cc   : > { %5693 = vmatmul.msk.f32.gmra.mxu1 %vm220_vm1, %v1895_v9 }
 0x1cd   : > { %v7352_v20 = vadd.f32 %v2728_v36, %v2352_v12  ;;  %5755 = vmatmul.msk.f32.gmra.mxu2 %vm220_vm1, %v1365_v5  ;;  %v1900_v36 = vld [vmem:[#allocation2 + $0x180] sm:$0xff]  ;;  %v2737_v28 = vpop.f32.mrf.mxu0 }
 0x1ce   : > { %5821 = vmatmul.msk.f32.gmra.mxu3 %vm220_vm1, %v1899_v24  ;;  %v1367_v5 = vld [vmem:[#allocation2 + $0x142] sm:$0xff] }
 0x1d0   : > { %v1663_v55 = vpop.f32.mrf.mxu2  ;;  %5889 = vmatmul.msk.f32.gmra.mxu0 %vm220_vm1, %v2435_v40 }
 0x1d1   : > { %v1819_v30 = vadd.f32 %v1663_v55, %v1194_v16  ;;  %v7358_v39 = vpop.f32.mrf.mxu1  ;;  %v2197_v13 = vpop.f32.mrf.mxu3  ;;  %v2436_v16 = vld [vmem:[#allocation2 + $0x191] sm:$0xff] }
 0x1d2   : > { %v1209_v62 = vadd.f32 %v7358_v39, %v7035_v6 }
 0x1d3   : > { %v2353_v9 = vadd.f32 %v2197_v13, %v1819_v30 }
 0x1d4   : > { %5694 = vmatmul.msk.f32.gmra.mxu1 %vm220_vm1, %v1896_v14 }
 0x1d5   : > { %v7362_v29 = vadd.f32 %v2731_v27, %v2353_v9  ;;  %5756 = vmatmul.msk.f32.gmra.mxu2 %vm220_vm1, %v1366_v37  ;;  %v1901_v27 = vld [vmem:[#allocation2 + $0x188] sm:$0xff]  ;;  %v2740_v52 = vpop.f32.mrf.mxu0 }
 0x1d6   : > { %5822 = vmatmul.msk.f32.gmra.mxu3 %vm220_vm1, %v1900_v36  ;;  %v1368_v37 = vld [vmem:[#allocation2 + $0x14a] sm:$0xff] }
 0x1d8   : > { %v1666_v61 = vpop.f32.mrf.mxu2  ;;  %5890 = vmatmul.msk.f32.gmra.mxu0 %vm220_vm1, %v2436_v16 }
 0x1d9   : > { %v1820_v49 = vadd.f32 %v1666_v61, %v1197_v25  ;;  %v7368_v57 = vpop.f32.mrf.mxu1  ;;  %v2200_v48 = vpop.f32.mrf.mxu3  ;;  %v2437_v25 = vld [vmem:[#allocation2 + $0x199] sm:$0xff] }
 0x1da   : > { %v1212_v6 = vadd.f32 %v7368_v57, %v7048_v18 }
 0x1db   : > { %v2354_v14 = vadd.f32 %v2200_v48, %v1820_v49 }
 0x1dc   : > { %5695 = vmatmul.msk.f32.gmra.mxu1 %vm220_vm1, %v1897_v10 }
 0x1dd   : > { %v7372_v12 = vadd.f32 %v2734_v31, %v2354_v14  ;;  %5757 = vmatmul.msk.f32.gmra.mxu2 %vm220_vm1, %v1367_v5  ;;  %v1902_v31 = vld [vmem:[#allocation2 + $0x190] sm:$0xff]  ;;  %v2743_v60 = vpop.f32.mrf.mxu0 }
 0x1de   : > { %5823 = vmatmul.msk.f32.gmra.mxu3 %vm220_vm1, %v1901_v27  ;;  %v1369_v5 = vld [vmem:[#allocation2 + $0x152] sm:$0xff] }
 0x1e0   : > { %v1669_v56 = vpop.f32.mrf.mxu2  ;;  %5891 = vmatmul.msk.f32.gmra.mxu0 %vm220_vm1, %v2437_v25 }
 0x1e1   : > { %v1821_v55 = vadd.f32 %v1669_v56, %v1200_v38  ;;  %v7378_v30 = vpop.f32.mrf.mxu1  ;;  %v2203_v13 = vpop.f32.mrf.mxu3  ;;  %v2438_v38 = vld [vmem:[#allocation2 + $0x1a1] sm:$0xff] }
 0x1e2   : > { %v1215_v18 = vadd.f32 %v7378_v30, %v7059_v33 }
 0x1e3   : > { %v2355_v10 = vadd.f32 %v2203_v13, %v1821_v55 }
 0x1e4   : > { %5696 = vmatmul.msk.f32.gmra.mxu1 %vm220_vm1, %v1898_v15 }
 0x1e5   : > { %v7382_v9 = vadd.f32 %v2737_v28, %v2355_v10  ;;  %5758 = vmatmul.msk.f32.gmra.mxu2 %vm220_vm1, %v1368_v37  ;;  %v1903_v28 = vld [vmem:[#allocation2 + $0x198] sm:$0xff]  ;;  %v2746_v2 = vpop.f32.mrf.mxu0 }
 0x1e6   : > { %5824 = vmatmul.msk.f32.gmra.mxu3 %vm220_vm1, %v1902_v31  ;;  %v1370_v37 = vld [vmem:[#allocation2 + $0x15a] sm:$0xff] }
 0x1e8   : > { %v1672_v40 = vpop.f32.mrf.mxu2  ;;  %5892 = vmatmul.msk.f32.gmra.mxu0 %vm220_vm1, %v2438_v38 }
 0x1e9   : > { %v1822_v61 = vadd.f32 %v1672_v40, %v1203_v3  ;;  %v7388_v49 = vpop.f32.mrf.mxu1  ;;  %v2206_v48 = vpop.f32.mrf.mxu3  ;;  %v2439_v3 = vld [vmem:[#allocation2 + $0x1b1] sm:$0xff] }
 0x1ea   : > { %v1218_v33 = vadd.f32 %v7388_v49, %v7072_v47 }
 0x1eb   : > { %v2356_v15 = vadd.f32 %v2206_v48, %v1822_v61 }
 0x1ec   : > { %5697 = vmatmul.msk.f32.gmra.mxu1 %vm220_vm1, %v1899_v24 }
 0x1ed   : > { %v7392_v14 = vadd.f32 %v2740_v52, %v2356_v15  ;;  %5759 = vmatmul.msk.f32.gmra.mxu2 %vm220_vm1, %v1369_v5  ;;  %v1904_v52 = vld [vmem:[#allocation2 + $0x1a0] sm:$0xff]  ;;  %v2749_v17 = vpop.f32.mrf.mxu0  ;;  %v1371_v5 = vld [vmem:[#allocation2 + $0x16a] sm:$0xff] }
 0x1ee   : > { %5825 = vmatmul.msk.f32.gmra.mxu3 %vm220_vm1, %v1903_v28 }
 0x1f0   : > { %v1675_v16 = vpop.f32.mrf.mxu2  ;;  %5893 = vmatmul.msk.f32.gmra.mxu0 %vm220_vm1, %v2439_v3 }
 0x1f1   : > { %v1823_v56 = vadd.f32 %v1675_v16, %v1206_v53  ;;  %v7398_v55 = vpop.f32.mrf.mxu1  ;;  %v2209_v13 = vpop.f32.mrf.mxu3  ;;  %v2440_v53 = vld [vmem:[#allocation2 + $0x1b9] sm:$0xff] }
 0x1f2   : > { %v1221_v47 = vadd.f32 %v7398_v55, %v7085_v0 }
 0x1f3   : > { %v2357_v24 = vadd.f32 %v2209_v13, %v1823_v56 }
 0x1f4   : > { %5698 = vmatmul.msk.f32.gmra.mxu1 %vm220_vm1, %v1900_v36 }
 0x1f5   : > { %v7402_v10 = vadd.f32 %v2743_v60, %v2357_v24  ;;  %5760 = vmatmul.msk.f32.gmra.mxu2 %vm220_vm1, %v1370_v37  ;;  %v1905_v60 = vld [vmem:[#allocation2 + $0x1b0] sm:$0xff]  ;;  %v2752_v39 = vpop.f32.mrf.mxu0 }
 0x1f6   : > { %5826 = vmatmul.msk.f32.gmra.mxu3 %vm220_vm1, %v1904_v52  ;;  %v1372_v37 = vld [vmem:[#allocation2 + $0x172] sm:$0xff] }
 0x1f8   : > { %v1678_v25 = vpop.f32.mrf.mxu2  ;;  %5894 = vmatmul.msk.f32.gmra.mxu0 %vm220_vm1, %v2440_v53 }
 0x1f9   : > { %v1824_v40 = vadd.f32 %v1678_v25, %v1209_v62  ;;  %v7408_v61 = vpop.f32.mrf.mxu1  ;;  %v2212_v48 = vpop.f32.mrf.mxu3  ;;  %v2441_v62 = vld [vmem:[#allocation2 + $0x1c1] sm:$0xff] }
 0x1fa   : > { %v1224_v0 = vadd.f32 %v7408_v61, %v7098_v54 }
 0x1fb   : > { %v2358_v36 = vadd.f32 %v2212_v48, %v1824_v40 }
 0x1fc   : > { %5699 = vmatmul.msk.f32.gmra.mxu1 %vm220_vm1, %v1901_v27 }
 0x1fd   : > { %v7412_v15 = vadd.f32 %v2746_v2, %v2358_v36  ;;  %5761 = vmatmul.msk.f32.gmra.mxu2 %vm220_vm1, %v1371_v5  ;;  %v1906_v2 = vld [vmem:[#allocation2 + $0x1b8] sm:$0xff]  ;;  %v2755_v57 = vpop.f32.mrf.mxu0 }
 0x1fe   : > { %5827 = vmatmul.msk.f32.gmra.mxu3 %vm220_vm1, %v1905_v60  ;;  %v1373_v5 = vld [vmem:[#allocation2 + $0x17a] sm:$0xff] }
 0x200   : > { %v1681_v38 = vpop.f32.mrf.mxu2  ;;  %5895 = vmatmul.msk.f32.gmra.mxu0 %vm220_vm1, %v2441_v62 }
 0x201   : > { %v1825_v16 = vadd.f32 %v1681_v38, %v1212_v6  ;;  %v7418_v56 = vpop.f32.mrf.mxu1  ;;  %v2215_v13 = vpop.f32.mrf.mxu3  ;;  %v2442_v6 = vld [vmem:[#allocation2 + $0x1c9] sm:$0xff] }
 0x202   : > { %v1227_v54 = vadd.f32 %v7418_v56, %v7111_v41 }
 0x203   : > { %v2359_v27 = vadd.f32 %v2215_v13, %v1825_v16 }
 0x204   : > { %5700 = vmatmul.msk.f32.gmra.mxu1 %vm220_vm1, %v1902_v31 }
 0x205   : > { %v7422_v24 = vadd.f32 %v2749_v17, %v2359_v27  ;;  %5762 = vmatmul.msk.f32.gmra.mxu2 %vm220_vm1, %v1372_v37  ;;  %v1907_v17 = vld [vmem:[#allocation2 + $0x1c0] sm:$0xff]  ;;  %v2758_v30 = vpop.f32.mrf.mxu0 }
 0x206   : > { %5828 = vmatmul.msk.f32.gmra.mxu3 %vm220_vm1, %v1906_v2  ;;  %v1374_v37 = vld [vmem:[#allocation2 + $0x182] sm:$0xff] }
 0x208   : > { %v1684_v3 = vpop.f32.mrf.mxu2  ;;  %5896 = vmatmul.msk.f32.gmra.mxu0 %vm220_vm1, %v2442_v6 }
 0x209   : > { %v1826_v25 = vadd.f32 %v1684_v3, %v1215_v18  ;;  %v7428_v40 = vpop.f32.mrf.mxu1  ;;  %v2218_v48 = vpop.f32.mrf.mxu3  ;;  %v2443_v18 = vld [vmem:[#allocation2 + $0x1d1] sm:$0xff] }
 0x20a   : > { %v1230_v41 = vadd.f32 %v7428_v40, %v6966_v23 }
 0x20b   : > { %v2360_v31 = vadd.f32 %v2218_v48, %v1826_v25 }
 0x20c   : > { %5701 = vmatmul.msk.f32.gmra.mxu1 %vm220_vm1, %v1903_v28 }
 0x20d   : > { %v7432_v36 = vadd.f32 %v2752_v39, %v2360_v31  ;;  %5763 = vmatmul.msk.f32.gmra.mxu2 %vm220_vm1, %v1373_v5  ;;  %v1908_v39 = vld [vmem:[#allocation2 + $0x1c8] sm:$0xff]  ;;  %v2761_v49 = vpop.f32.mrf.mxu0 }
 0x20e   : > { %5829 = vmatmul.msk.f32.gmra.mxu3 %vm220_vm1, %v1907_v17  ;;  %v1375_v5 = vld [vmem:[#allocation2 + $0x18a] sm:$0xff] }
 0x210   : > { %v1687_v53 = vpop.f32.mrf.mxu2  ;;  %5897 = vmatmul.msk.f32.gmra.mxu0 %vm220_vm1, %v2443_v18 }
 0x211   : > { %v1827_v38 = vadd.f32 %v1687_v53, %v1218_v33  ;;  %v7438_v16 = vpop.f32.mrf.mxu1  ;;  %v2221_v13 = vpop.f32.mrf.mxu3  ;;  %v2444_v33 = vld [vmem:[#allocation2 + $0x1d9] sm:$0xff] }
 0x212   : > { %v1233_v23 = vadd.f32 %v7438_v16, %v6979_v35 }
 0x213   : > { %v2361_v28 = vadd.f32 %v2221_v13, %v1827_v38 }
 0x214   : > { %5702 = vmatmul.msk.f32.gmra.mxu1 %vm220_vm1, %v1904_v52 }
 0x215   : > { %v7442_v27 = vadd.f32 %v2755_v57, %v2361_v28  ;;  %5764 = vmatmul.msk.f32.gmra.mxu2 %vm220_vm1, %v1374_v37  ;;  %v1909_v57 = vld [vmem:[#allocation2 + $0x1d0] sm:$0xff]  ;;  %v2764_v55 = vpop.f32.mrf.mxu0 }
 0x216   : > { %5830 = vmatmul.msk.f32.gmra.mxu3 %vm220_vm1, %v1908_v39  ;;  %v1376_v37 = vld [vmem:[#allocation2 + $0x192] sm:$0xff] }
 0x218   : > { %v1690_v62 = vpop.f32.mrf.mxu2  ;;  %5898 = vmatmul.msk.f32.gmra.mxu0 %vm220_vm1, %v2444_v33 }
 0x219   : > { %v1828_v3 = vadd.f32 %v1690_v62, %v1221_v47  ;;  %v7448_v25 = vpop.f32.mrf.mxu1  ;;  %v2224_v48 = vpop.f32.mrf.mxu3  ;;  %v2445_v47 = vld [vmem:[#allocation2 + $0x1e1] sm:$0xff] }
 0x21a   : > { %v1236_v35 = vadd.f32 %v7448_v25, %v6992_v42 }
 0x21b   : > { %v2362_v52 = vadd.f32 %v2224_v48, %v1828_v3 }
 0x21c   : > { %5703 = vmatmul.msk.f32.gmra.mxu1 %vm220_vm1, %v1905_v60 }
 0x21d   : > { %v7452_v31 = vadd.f32 %v2758_v30, %v2362_v52  ;;  %5765 = vmatmul.msk.f32.gmra.mxu2 %vm220_vm1, %v1375_v5  ;;  %v1910_v30 = vld [vmem:[#allocation2 + $0x1d8] sm:$0xff]  ;;  %v2767_v61 = vpop.f32.mrf.mxu0 }
 0x21e   : > { %5831 = vmatmul.msk.f32.gmra.mxu3 %vm220_vm1, %v1909_v57  ;;  %v1377_v5 = vld [vmem:[#allocation2 + $0x19a] sm:$0xff] }
 0x220   : > { %v1693_v6 = vpop.f32.mrf.mxu2  ;;  %5899 = vmatmul.msk.f32.gmra.mxu0 %vm220_vm1, %v2445_v47 }
 0x221   : > { %v1829_v53 = vadd.f32 %v1693_v6, %v1224_v0  ;;  %v7458_v38 = vpop.f32.mrf.mxu1  ;;  %v2227_v13 = vpop.f32.mrf.mxu3  ;;  %v2446_v0 = vld [vmem:[#allocation2 + $0x1e9] sm:$0xff] }
 0x222   : > { %v1239_v42 = vadd.f32 %v7458_v38, %v7005_v50 }
 0x223   : > { %v2363_v60 = vadd.f32 %v2227_v13, %v1829_v53 }
 0x224   : > { %5704 = vmatmul.msk.f32.gmra.mxu1 %vm220_vm1, %v1906_v2 }
 0x225   : > { %v7462_v28 = vadd.f32 %v2761_v49, %v2363_v60  ;;  %5766 = vmatmul.msk.f32.gmra.mxu2 %vm220_vm1, %v1376_v37  ;;  %v1911_v49 = vld [vmem:[#allocation2 + $0x1e0] sm:$0xff]  ;;  %v2770_v56 = vpop.f32.mrf.mxu0 }
 0x226   : > { %5832 = vmatmul.msk.f32.gmra.mxu3 %vm220_vm1, %v1910_v30  ;;  %v1378_v37 = vld [vmem:[#allocation2 + $0x1a2] sm:$0xff] }
 0x228   : > { %v1696_v18 = vpop.f32.mrf.mxu2  ;;  %5900 = vmatmul.msk.f32.gmra.mxu0 %vm220_vm1, %v2446_v0 }
 0x229   : > { %v1830_v62 = vadd.f32 %v1696_v18, %v1227_v54  ;;  %v7468_v3 = vpop.f32.mrf.mxu1  ;;  %v2230_v48 = vpop.f32.mrf.mxu3  ;;  %v2447_v54 = vld [vmem:[#allocation2 + $0x1f9] sm:$0xff] }
 0x22a   : > { %v1242_v50 = vadd.f32 %v7468_v3, %v7018_v58  ;;  %v318_v58 = vld [vmem:[%s6634_s5 + $0x1c0] sm:$0xff] }
 0x22b   : > { %v2364_v2 = vadd.f32 %v2230_v48, %v1830_v62  ;;  %383 = vst.msk [vmem:[#allocation2 + $0x241] sm:$0xff] %vm220_vm1, %v318_v58 }
 0x22c   : > { %5705 = vmatmul.msk.f32.gmra.mxu1 %vm220_vm1, %v1907_v17 }
 0x22d   : > { %v7472_v52 = vadd.f32 %v2764_v55, %v2364_v2  ;;  %5767 = vmatmul.msk.f32.gmra.mxu2 %vm220_vm1, %v1377_v5  ;;  %v1912_v55 = vld [vmem:[#allocation2 + $0x1e8] sm:$0xff]  ;;  %v2773_v40 = vpop.f32.mrf.mxu0  ;;  %v1379_v5 = vld [vmem:[#allocation2 + $0x1b2] sm:$0xff] }
 0x22e   : > { %5833 = vmatmul.msk.f32.gmra.mxu3 %vm220_vm1, %v1911_v49 }
 0x230   : > { %v1699_v33 = vpop.f32.mrf.mxu2  ;;  %5901 = vmatmul.msk.f32.gmra.mxu0 %vm220_vm1, %v2447_v54 }
 0x231   : > { %v1831_v6 = vadd.f32 %v1699_v33, %v1230_v41  ;;  %v7478_v53 = vpop.f32.mrf.mxu1  ;;  %v2233_v13 = vpop.f32.mrf.mxu3  ;;  %v2448_v41 = vld [vmem:[#allocation2 + $0x201] sm:$0xff] }
 0x232   : > { %v1245_v3 = vadd.f32 %v7478_v53, %v7031_v1  ;;  %v7543_v1 = vld [vmem:[#allocation2 + $0x218] sm:$0xff] }
 0x233   : > { %v2365_v17 = vadd.f32 %v2233_v13, %v1831_v6 }
 0x234   : > { %5706 = vmatmul.msk.f32.gmra.mxu1 %vm220_vm1, %v1908_v39 }
 0x235   : > { %v7482_v60 = vadd.f32 %v2767_v61, %v2365_v17  ;;  %5768 = vmatmul.msk.f32.gmra.mxu2 %vm220_vm1, %v1378_v37  ;;  %v1913_v61 = vld [vmem:[#allocation2 + $0x1f8] sm:$0xff]  ;;  %v2776_v16 = vpop.f32.mrf.mxu0 }
 0x236   : > { %5834 = vmatmul.msk.f32.gmra.mxu3 %vm220_vm1, %v1912_v55  ;;  %v1380_v37 = vld [vmem:[#allocation2 + $0x1ba] sm:$0xff] }
 0x238   : > { %v1702_v47 = vpop.f32.mrf.mxu2  ;;  %5902 = vmatmul.msk.f32.gmra.mxu0 %vm220_vm1, %v2448_v41 }
 0x239   : > { %v1832_v18 = vadd.f32 %v1702_v47, %v1233_v23  ;;  %v7488_v62 = vpop.f32.mrf.mxu1  ;;  %v2236_v48 = vpop.f32.mrf.mxu3  ;;  %v2449_v23 = vld [vmem:[#allocation2 + $0x209] sm:$0xff] }
 0x23b   : > { %v2366_v39 = vadd.f32 %v2236_v48, %v1832_v18 }
 0x23c   : > { %5707 = vmatmul.msk.f32.gmra.mxu1 %vm220_vm1, %v1909_v57 }
 0x23d   : > { %v7492_v2 = vadd.f32 %v2770_v56, %v2366_v39  ;;  %5769 = vmatmul.msk.f32.gmra.mxu2 %vm220_vm1, %v1379_v5  ;;  %v7502_v56 = vld [vmem:[#allocation2 + $0x200] sm:$0xff]  ;;  %v2779_v25 = vpop.f32.mrf.mxu0  ;;  %v7515_v5 = vld [vmem:[#allocation2 + $0x208] sm:$0xff] }
 0x23e   : > { %5835 = vmatmul.msk.f32.gmra.mxu3 %vm220_vm1, %v1913_v61 }
 0x240   : > { %v1705_v0 = vpop.f32.mrf.mxu2  ;;  %5903 = vmatmul.msk.f32.gmra.mxu0 %vm220_vm1, %v2449_v23  ;;  %v2451_v23 = vld [vmem:[#allocation2 + $0x219] sm:$0xff] }
 0x241   : > { %v1833_v33 = vadd.f32 %v1705_v0, %v1236_v35  ;;  %v7498_v6 = vpop.f32.mrf.mxu1  ;;  %v2239_v13 = vpop.f32.mrf.mxu3  ;;  %v2450_v35 = vld [vmem:[#allocation2 + $0x211] sm:$0xff] }
 0x243   : > { %v2367_v57 = vadd.f32 %v2239_v13, %v1833_v33  ;;  %v1382_v13 = vld [vmem:[#allocation2 + $0x1ca] sm:$0xff] }
 0x244   : > { %5708 = vmatmul.msk.f32.gmra.mxu1 %vm220_vm1, %v1910_v30  ;;  %v1381_v30 = vld [vmem:[#allocation2 + $0x1c2] sm:$0xff] }
 0x245   : > { %v7504_v17 = vadd.f32 %v2773_v40, %v2367_v57  ;;  %5770 = vmatmul.msk.f32.gmra.mxu2 %vm220_vm1, %v1380_v37  ;;  %v2782_v38 = vpop.f32.mrf.mxu0  ;;  %v7528_v37 = vld [vmem:[#allocation2 + $0x210] sm:$0xff] }
 0x246   : > { %5836 = vmatmul.msk.f32.gmra.mxu3 %vm220_vm1, %v7502_v56 }
 0x248   : > { %v1708_v54 = vpop.f32.mrf.mxu2  ;;  %5904 = vmatmul.msk.f32.gmra.mxu0 %vm220_vm1, %v2450_v35 }
 0x249   : > { %v1834_v47 = vadd.f32 %v1708_v54, %v1239_v42  ;;  %v7511_v18 = vpop.f32.mrf.mxu1  ;;  %v2242_v48 = vpop.f32.mrf.mxu3 }
 0x24b   : > { %v2368_v40 = vadd.f32 %v2242_v48, %v1834_v47  ;;  %v1383_v48 = vld [vmem:[#allocation2 + $0x1d2] sm:$0xff] }
 0x24c   : > { %5709 = vmatmul.msk.f32.gmra.mxu1 %vm220_vm1, %v1911_v49 }
 0x24d   : > { %v7517_v39 = vadd.f32 %v2776_v16, %v2368_v40  ;;  %5771 = vmatmul.msk.f32.gmra.mxu2 %vm220_vm1, %v1381_v30  ;;  %v2785_v42 = vpop.f32.mrf.mxu0  ;;  %v319_v40 = vld [vmem:[%s6634_s5 + $0x1c8] sm:$0xff] }
 0x24e   : > { %5837 = vmatmul.msk.f32.gmra.mxu3 %vm220_vm1, %v7515_v5  ;;  %384 = vst.msk [vmem:[#allocation2 + $0x249] sm:$0xff] %vm220_vm1, %v319_v40 }
 0x250   : > { %v1711_v41 = vpop.f32.mrf.mxu2  ;;  %5905 = vmatmul.msk.f32.gmra.mxu0 %vm220_vm1, %v2451_v23  ;;  %v320_v23 = vld [vmem:[%s6634_s5 + $0x1d0] sm:$0xff] }
 0x251   : > { %v1835_v0 = vadd.f32 %v1711_v41, %v1242_v50  ;;  %v7524_v33 = vpop.f32.mrf.mxu1  ;;  %v2245_v49 = vpop.f32.mrf.mxu3  ;;  %v8770_v50 = vld [vmem:[#allocation13_spill] sm:$0xff]  ;;  %385 = vst.msk [vmem:[#allocation2 + $0x251] sm:$0xff] %vm220_vm1, %v320_v23 }
 0x252   : > { %v1248_v35 = vadd.f32 %v7488_v62, %v8770_v50  ;;  %v7559_v62 = vld [vmem:[#allocation2 + $0x220] sm:$0xff] }
 0x253   : > { %v2369_v16 = vadd.f32 %v2245_v49, %v1835_v0  ;;  %v2452_v0 = vld [vmem:[#allocation2 + $0x221] sm:$0xff] }
 0x254   : > { %5710 = vmatmul.msk.f32.gmra.mxu1 %vm220_vm1, %v1912_v55  ;;  %v1385_v50 = vld [vmem:[#allocation2 + $0x1e2] sm:$0xff] }
 0x255   : > { %v7530_v57 = vadd.f32 %v2779_v25, %v2369_v16  ;;  %5772 = vmatmul.msk.f32.gmra.mxu2 %vm220_vm1, %v1382_v13  ;;  %v2788_v41 = vpop.f32.mrf.mxu0  ;;  %v1384_v16 = vld [vmem:[#allocation2 + $0x1da] sm:$0xff] }
 0x256   : > { %5838 = vmatmul.msk.f32.gmra.mxu3 %vm220_vm1, %v7528_v37 }
 0x258   : > { %v1714_v54 = vpop.f32.mrf.mxu2  ;;  %5906 = vmatmul.msk.f32.gmra.mxu0 %vm220_vm1, %v2452_v0 }
 0x259   : > { %v1836_v55 = vadd.f32 %v1714_v54, %v1245_v3  ;;  %v7539_v47 = vpop.f32.mrf.mxu1  ;;  %v2248_v25 = vpop.f32.mrf.mxu3  ;;  %v8771_v54 = vld [vmem:[#allocation15_spill] sm:$0xff] }
 0x25b   : > { %v2370_v30 = vadd.f32 %v2248_v25, %v1836_v55  ;;  %v1251_v55 = vadd.f32 %v7498_v6, %v8771_v54  ;;  %v7575_v6 = vld [vmem:[#allocation2 + $0x228] sm:$0xff] }
 0x25c   : > { %5711 = vmatmul.msk.f32.gmra.mxu1 %vm220_vm1, %v1913_v61 }
 0x25d   : > { %v7545_v53 = vadd.f32 %v2782_v38, %v2370_v30  ;;  %5773 = vmatmul.msk.f32.gmra.mxu2 %vm220_vm1, %v1383_v48  ;;  %v2791_v25 = vpop.f32.mrf.mxu0  ;;  %v2453_v48 = vld [vmem:[#allocation2 + $0x229] sm:$0xff] }
 0x25e   : > { %5839 = vmatmul.msk.f32.gmra.mxu3 %vm220_vm1, %v7543_v1 }
 0x260   : > { %v1717_v49 = vpop.f32.mrf.mxu2  ;;  %5907 = vmatmul.msk.f32.gmra.mxu0 %vm220_vm1, %v2453_v48 }
 0x261   : > { %v1837_v61 = vadd.f32 %v1717_v49, %v1248_v35  ;;  %v7554_v13 = vpop.f32.mrf.mxu1  ;;  %v2251_v38 = vpop.f32.mrf.mxu3  ;;  %v321_v49 = vld [vmem:[%s6634_s5 + $0x1d8] sm:$0xff] }
 0x262   : > { %386 = vst.msk [vmem:[#allocation2 + $0x259] sm:$0xff] %vm220_vm1, %v321_v49  ;;  %v2455_v49 = vld [vmem:[#allocation2 + $0x241] sm:$0xff] }
 0x263   : > { %v2371_v58 = vadd.f32 %v2251_v38, %v1837_v61  ;;  %v8772_v61 = vld [vmem:[#allocation17_spill] sm:$0xff] }
 0x264   : > { %5712 = vmatmul.msk.f32.gmra.mxu1 %vm220_vm1, %v7502_v56  ;;  %v1254_v38 = vadd.f32 %v7511_v18, %v8772_v61  ;;  %v7591_v18 = vld [vmem:[#allocation2 + $0x230] sm:$0xff] }
 0x265   : > { %v7561_v3 = vadd.f32 %v2785_v42, %v2371_v58  ;;  %5774 = vmatmul.msk.f32.gmra.mxu2 %vm220_vm1, %v1384_v16  ;;  %v2794_v16 = vpop.f32.mrf.mxu0  ;;  %v2454_v58 = vld [vmem:[#allocation2 + $0x231] sm:$0xff] }
 0x266   : > { %5840 = vmatmul.msk.f32.gmra.mxu3 %vm220_vm1, %v7559_v62 }
 0x268   : > { %v1720_v30 = vpop.f32.mrf.mxu2  ;;  %5908 = vmatmul.msk.f32.gmra.mxu0 %vm220_vm1, %v2454_v58  ;;  %v1387_v58 = vld [vmem:[#allocation2 + $0x1fa] sm:$0xff] }
 0x269   : > { %v1838_v56 = vadd.f32 %v1720_v30, %v1251_v55  ;;  %v7570_v40 = vpop.f32.mrf.mxu1  ;;  %v2254_v42 = vpop.f32.mrf.mxu3  ;;  %v1386_v55 = vld [vmem:[#allocation2 + $0x1ea] sm:$0xff] }
 0x26b   : > { %v2372_v35 = vadd.f32 %v2254_v42, %v1838_v56  ;;  %v322_v56 = vld [vmem:[%s6634_s5 + $0x1e0] sm:$0xff]  ;;  %v8773_v42 = vld [vmem:[#allocation19_spill] sm:$0xff] }
 0x26c   : > { %5713 = vmatmul.msk.f32.gmra.mxu1 %vm220_vm1, %v7515_v5  ;;  %387 = vst.msk [vmem:[#allocation2 + $0x261] sm:$0xff] %vm220_vm1, %v322_v56 }
 0x26d   : > { %v7577_v0 = vadd.f32 %v2788_v41, %v2372_v35  ;;  %5775 = vmatmul.msk.f32.gmra.mxu2 %vm220_vm1, %v1385_v50  ;;  %v1257_v50 = vadd.f32 %v7524_v33, %v8773_v42  ;;  %v2797_v35 = vpop.f32.mrf.mxu0  ;;  %v1921_v33 = vld [vmem:[#allocation2 + $0x240] sm:$0xff]  ;;  %v2456_v42 = vld [vmem:[#allocation2 + $0x249] sm:$0xff] }
 0x26e   : > { %5841 = vmatmul.msk.f32.gmra.mxu3 %vm220_vm1, %v7575_v6 }
 0x270   : > { %v1723_v23 = vpop.f32.mrf.mxu2  ;;  %5909 = vmatmul.msk.f32.gmra.mxu0 %vm220_vm1, %v2455_v49 }
 0x271   : > { %v1839_v5 = vadd.f32 %v1723_v23, %v1254_v38  ;;  %v7586_v54 = vpop.f32.mrf.mxu1  ;;  %v2257_v41 = vpop.f32.mrf.mxu3 }
 0x273   : > { %v2373_v48 = vadd.f32 %v2257_v41, %v1839_v5  ;;  %v323_v41 = vld [vmem:[%s6634_s5 + $0x1e8] sm:$0xff] }
 0x274   : > { %5714 = vmatmul.msk.f32.gmra.mxu1 %vm220_vm1, %v7528_v37  ;;  %388 = vst.msk [vmem:[#allocation2 + $0x269] sm:$0xff] %vm220_vm1, %v323_v41 }
 0x275   : > { %v7593_v30 = vadd.f32 %v2791_v25, %v2373_v48  ;;  %5776 = vmatmul.msk.f32.gmra.mxu2 %vm220_vm1, %v1386_v55  ;;  %v8775_v55 = vld [vmem:[#allocation21_spill] sm:$0xff]  ;;  %v2800_v56 = vpop.f32.mrf.mxu0 }
 0x276   : > { %5842 = vmatmul.msk.f32.gmra.mxu3 %vm220_vm1, %v7591_v18  ;;  %v1260_v48 = vadd.f32 %v7539_v47, %v8775_v55  ;;  %v1922_v47 = vld [vmem:[#allocation2 + $0x248] sm:$0xff]  ;;  %v2457_v55 = vld [vmem:[#allocation2 + $0x251] sm:$0xff] }
 0x278   : > { %v1726_v61 = vpop.f32.mrf.mxu2  ;;  %5910 = vmatmul.msk.f32.gmra.mxu0 %vm220_vm1, %v2456_v42 }
 0x279   : > { %v1840_v37 = vadd.f32 %v1726_v61, %v1257_v50  ;;  %v7602_v38 = vpop.f32.mrf.mxu1  ;;  %v2260_v25 = vpop.f32.mrf.mxu3 }
 0x27b   : > { %v2374_v23 = vadd.f32 %v2260_v25, %v1840_v37 }
 0x27c   : > { %5715 = vmatmul.msk.f32.gmra.mxu1 %vm220_vm1, %v7543_v1 }
 0x27d   : > { %v7607_v5 = vadd.f32 %v2794_v16, %v2374_v23  ;;  %5777 = vmatmul.msk.f32.gmra.mxu2 %vm220_vm1, %v1387_v58  ;;  %v1388_v16 = vld [vmem:[#allocation2 + $0x202] sm:$0xff]  ;;  %v324_v58 = vld [vmem:[%s6634_s5 + $0x1f0] sm:$0xff]  ;;  %v2803_v41 = vpop.f32.mrf.mxu0 }
 0x27e   : > { %5843 = vmatmul.msk.f32.gmra.mxu3 %vm220_vm1, %v1921_v33  ;;  %v8777_v23 = vld [vmem:[#allocation23_spill] sm:$0xff]  ;;  %389 = vst.msk [vmem:[#allocation2 + $0x271] sm:$0xff] %vm220_vm1, %v324_v58 }
 0x27f   : > { %8774 = vst [vmem:[#allocation13_spill] sm:$0xff] %v7607_v5  ;;  %v1263_v33 = vadd.f32 %v7554_v13, %v8777_v23  ;;  %v1923_v13 = vld [vmem:[#allocation2 + $0x250] sm:$0xff]  ;;  %v2458_v23 = vld [vmem:[#allocation2 + $0x259] sm:$0xff] }
 0x280   : > { %v1729_v50 = vpop.f32.mrf.mxu2  ;;  %5911 = vmatmul.msk.f32.gmra.mxu0 %vm220_vm1, %v2457_v55 }
 0x281   : > { %v1841_v49 = vadd.f32 %v1729_v50, %v1260_v48  ;;  %v7615_v61 = vpop.f32.mrf.mxu1  ;;  %v2263_v1 = vpop.f32.mrf.mxu3 }
 0x283   : > { %v2375_v37 = vadd.f32 %v2263_v1, %v1841_v49 }
 0x284   : > { %5716 = vmatmul.msk.f32.gmra.mxu1 %vm220_vm1, %v7559_v62 }
 0x285   : > { %v7620_v25 = vadd.f32 %v2797_v35, %v2375_v37  ;;  %5778 = vmatmul.msk.f32.gmra.mxu2 %vm220_vm1, %v1388_v16  ;;  %v1389_v35 = vld [vmem:[#allocation2 + $0x20a] sm:$0xff]  ;;  %v325_v16 = vld [vmem:[%s6634_s5 + $0x1f8] sm:$0xff]  ;;  %v8779_v37 = vld [vmem:[#allocation25_spill] sm:$0xff]  ;;  %v2806_v58 = vpop.f32.mrf.mxu0 }
 0x286   : > { %5844 = vmatmul.msk.f32.gmra.mxu3 %vm220_vm1, %v1922_v47  ;;  %v1266_v47 = vadd.f32 %v7570_v40, %v8779_v37  ;;  %390 = vst.msk [vmem:[#allocation2 + $0x279] sm:$0xff] %vm220_vm1, %v325_v16  ;;  %v2459_v16 = vld [vmem:[#allocation2 + $0x261] sm:$0xff] }
 0x287   : > { %8776 = vst [vmem:[#allocation15_spill] sm:$0xff] %v7620_v25 }
 0x288   : > { %v1732_v48 = vpop.f32.mrf.mxu2  ;;  %5912 = vmatmul.msk.f32.gmra.mxu0 %vm220_vm1, %v2458_v23  ;;  %v2933_v23 = vld [vmem:[#allocation2 + $0x4a] sm:$0xff] }
 0x289   : > { %v1842_v42 = vadd.f32 %v1732_v48, %v1263_v33  ;;  %v7628_v50 = vpop.f32.mrf.mxu1  ;;  %v2266_v62 = vpop.f32.mrf.mxu3 }
 0x28b   : > { %v2376_v49 = vadd.f32 %v2266_v62, %v1842_v42  ;;  %v1390_v42 = vld [vmem:[#allocation2 + $0x212] sm:$0xff] }
 0x28c   : > { %5717 = vmatmul.msk.f32.gmra.mxu1 %vm220_vm1, %v7575_v6  ;;  %v1924_v62 = vld [vmem:[#allocation2 + $0x258] sm:$0xff] }
 0x28d   : > { %v7633_v1 = vadd.f32 %v2800_v56, %v2376_v49  ;;  %5779 = vmatmul.msk.f32.gmra.mxu2 %vm220_vm1, %v1389_v35  ;;  %v8781_v35 = vld [vmem:[#allocation27_spill] sm:$0xff] }
 0x28e   : > { %5845 = vmatmul.msk.f32.gmra.mxu3 %vm220_vm1, %v1923_v13  ;;  %v1269_v49 = vadd.f32 %v7586_v54, %v8781_v35  ;;  %v2809_v13 = vpop.f32.mrf.mxu0  ;;  %v8783_v54 = vld [vmem:[#allocation29_spill] sm:$0xff]  ;;  %v2460_v35 = vld [vmem:[#allocation2 + $0x269] sm:$0xff] }
 0x28f   : > { %8778 = vst [vmem:[#allocation17_spill] sm:$0xff] %v7633_v1 }
 0x290   : > { %v1735_v33 = vpop.f32.mrf.mxu2  ;;  %5913 = vmatmul.msk.f32.gmra.mxu0 %vm220_vm1, %v2459_v16  ;;  %v2934_v16 = vld [vmem:[#allocation2 + $0x52] sm:$0xff] }
 0x291   : > { %v1843_v55 = vadd.f32 %v1735_v33, %v1266_v47  ;;  %v7641_v48 = vpop.f32.mrf.mxu1  ;;  %v2269_v6 = vpop.f32.mrf.mxu3 }
 0x293   : > { %v2377_v56 = vadd.f32 %v2269_v6, %v1843_v55  ;;  %v1391_v6 = vld [vmem:[#allocation2 + $0x21a] sm:$0xff] }
 0x294   : > { %5718 = vmatmul.msk.f32.gmra.mxu1 %vm220_vm1, %v7591_v18 }
 0x295   : > { %v7646_v40 = vadd.f32 %v2803_v41, %v2377_v56  ;;  %5780 = vmatmul.msk.f32.gmra.mxu2 %vm220_vm1, %v1390_v42  ;;  %v1925_v41 = vld [vmem:[#allocation2 + $0x260] sm:$0xff]  ;;  %v1272_v56 = vadd.f32 %v7602_v38, %v8783_v54  ;;  %v8785_v38 = vld [vmem:[#allocation31_spill] sm:$0xff] }
 0x296   : > { %5846 = vmatmul.msk.f32.gmra.mxu3 %vm220_vm1, %v1924_v62  ;;  %v2812_v62 = vpop.f32.mrf.mxu0  ;;  %v2461_v54 = vld [vmem:[#allocation2 + $0x271] sm:$0xff] }
 0x297   : > { %8780 = vst [vmem:[#allocation19_spill] sm:$0xff] %v7646_v40 }
 0x298   : > { %v1738_v37 = vpop.f32.mrf.mxu2  ;;  %5914 = vmatmul.msk.f32.gmra.mxu0 %vm220_vm1, %v2460_v35  ;;  %v2935_v35 = vld [vmem:[#allocation2 + $0x5a] sm:$0xff] }
 0x299   : > { %v1844_v47 = vadd.f32 %v1738_v37, %v1269_v49  ;;  %v7652_v33 = vpop.f32.mrf.mxu1  ;;  %v2272_v55 = vpop.f32.mrf.mxu3 }
 0x29b   : > { %v2378_v18 = vadd.f32 %v2272_v55, %v1844_v47  ;;  %v1392_v55 = vld [vmem:[#allocation2 + $0x222] sm:$0xff] }
 0x29c   : > { %5919 = vmatmul.msk.f32.vlgmr.msra.gmra.mxu1 %vm220_vm1, %v2933_v23  ;;  %v1926_v23 = vld [vmem:[#allocation2 + $0x268] sm:$0xff] }
 0x29d   : > { %v7656_v42 = vadd.f32 %v2806_v58, %v2378_v18  ;;  %5781 = vmatmul.msk.f32.gmra.mxu2 %vm220_vm1, %v1391_v6  ;;  %v1275_v18 = vadd.f32 %v7615_v61, %v8785_v38  ;;  %v8787_v61 = vld [vmem:[#allocation33_spill] sm:$0xff] }
 0x29e   : > { %5847 = vmatmul.msk.f32.gmra.mxu3 %vm220_vm1, %v1925_v41  ;;  %v2815_v41 = vpop.f32.mrf.mxu0  ;;  %v2462_v38 = vld [vmem:[#allocation2 + $0x279] sm:$0xff] }
 0x29f   : > { %8782 = vst [vmem:[#allocation21_spill] sm:$0xff] %v7656_v42 }
 0x2a0   : > { %v1741_v49 = vpop.f32.mrf.mxu2  ;;  %5915 = vmatmul.msk.f32.gmra.mxu0 %vm220_vm1, %v2461_v54  ;;  %v2936_v54 = vld [vmem:[#allocation2 + $0x62] sm:$0xff] }
 0x2a1   : > { %v1845_v37 = vadd.f32 %v1741_v49, %v1272_v56  ;;  %v7662_v40 = vpop.f32.mrf.mxu1  ;;  %v2275_v47 = vpop.f32.mrf.mxu3 }
 0x2a3   : > { %v2379_v58 = vadd.f32 %v2275_v47, %v1845_v37  ;;  %v1393_v47 = vld [vmem:[#allocation2 + $0x22a] sm:$0xff] }
 0x2a4   : > { %5920 = vmatmul.msk.f32.gmra.mxu1 %vm220_vm1, %v2934_v16  ;;  %v1927_v16 = vld [vmem:[#allocation2 + $0x270] sm:$0xff] }
 0x2a5   : > { %v7666_v6 = vadd.f32 %v2809_v13, %v2379_v58  ;;  %5782 = vmatmul.msk.f32.gmra.mxu2 %vm220_vm1, %v1392_v55  ;;  %v1278_v58 = vadd.f32 %v7628_v50, %v8787_v61  ;;  %v8789_v50 = vld [vmem:[#allocation7_spill] sm:$0xff] }
 0x2a6   : > { %5848 = vmatmul.msk.f32.gmra.mxu3 %vm220_vm1, %v1926_v23  ;;  %v2818_v23 = vpop.f32.mrf.mxu0  ;;  %v7692_v61 = vld [vmem:[#allocation2 + $0x92] sm:$0xff] }
 0x2a7   : > { %8784 = vst [vmem:[#allocation23_spill] sm:$0xff] %v7666_v6 }
 0x2a8   : > { %v1744_v56 = vpop.f32.mrf.mxu2  ;;  %5916 = vmatmul.msk.f32.gmra.mxu0 %vm220_vm1, %v2462_v38  ;;  %v2937_v38 = vld [vmem:[#allocation2 + $0x6a] sm:$0xff] }
 0x2a9   : > { %v1846_v49 = vadd.f32 %v1744_v56, %v1275_v18  ;;  %v7672_v42 = vpop.f32.mrf.mxu1  ;;  %v2278_v37 = vpop.f32.mrf.mxu3 }
 0x2ab   : > { %v2380_v13 = vadd.f32 %v2278_v37, %v1846_v49  ;;  %v1394_v37 = vld [vmem:[#allocation2 + $0x232] sm:$0xff] }
 0x2ac   : > { %5921 = vmatmul.msk.f32.gmra.mxu1 %vm220_vm1, %v2935_v35  ;;  %v1928_v35 = vld [vmem:[#allocation2 + $0x278] sm:$0xff] }
 0x2ad   : > { %v7676_v55 = vadd.f32 %v2812_v62, %v2380_v13  ;;  %5783 = vmatmul.msk.f32.gmra.mxu2 %vm220_vm1, %v1393_v47  ;;  %v1281_v13 = vadd.f32 %v7641_v48, %v8789_v50  ;;  %v7705_v50 = vld [vmem:[#allocation2 + $0x9a] sm:$0xff] }
 0x2ae   : > { %5849 = vmatmul.msk.f32.gmra.mxu3 %vm220_vm1, %v1927_v16  ;;  %v2821_v16 = vpop.f32.mrf.mxu0 }
 0x2af   : > { %8786 = vst [vmem:[#allocation25_spill] sm:$0xff] %v7676_v55 }
 0x2b0   : > { %v1747_v18 = vpop.f32.mrf.mxu2  ;;  %6117 = vmatmul.msk.f32.vlgmr.msra.gmra.mxu0 %vm220_vm1, %v7692_v61 }
 0x2b1   : > { %v1847_v56 = vadd.f32 %v1747_v18, %v1278_v58  ;;  %v7682_v6 = vpop.f32.mrf.mxu1  ;;  %v2281_v49 = vpop.f32.mrf.mxu3 }
 0x2b3   : > { %v2381_v62 = vadd.f32 %v2281_v49, %v1847_v56  ;;  %v4002_v49 = vld [vmem:[#allocation2 + $0x91] sm:$0xff] }
 0x2b4   : > { %5922 = vmatmul.msk.f32.gmra.mxu1 %vm220_vm1, %v2936_v54  ;;  %v3468_v54 = vld [vmem:[#allocation2 + $0x90] sm:$0xff] }
 0x2b5   : > { %v7686_v47 = vadd.f32 %v2815_v41, %v2381_v62  ;;  %5784 = vmatmul.msk.f32.gmra.mxu2 %vm220_vm1, %v1394_v37  ;;  %v8791_v37 = vld [vmem:[#allocation8_spill] sm:$0xff] }
 0x2b6   : > { %5850 = vmatmul.msk.f32.gmra.mxu3 %vm220_vm1, %v1928_v35  ;;  %v1284_v62 = vadd.f32 %v7652_v33, %v8791_v37  ;;  %v2824_v35 = vpop.f32.mrf.mxu0 }
 0x2b7   : > { %8788 = vst [vmem:[#allocation27_spill] sm:$0xff] %v7686_v47 }
 0x2b8   : > { %v1750_v58 = vpop.f32.mrf.mxu2  ;;  %6118 = vmatmul.msk.f32.gmra.mxu0 %vm220_vm1, %v7705_v50 }
 0x2b9   : > { %v1848_v18 = vadd.f32 %v1750_v58, %v1281_v13  ;;  %v7694_v55 = vpop.f32.mrf.mxu1  ;;  %v2284_v56 = vpop.f32.mrf.mxu3 }
 0x2bb   : > { %v2382_v41 = vadd.f32 %v2284_v56, %v1848_v18  ;;  %v2938_v18 = vld [vmem:[#allocation2 + $0x72] sm:$0xff] }
 0x2bc   : > { %5923 = vmatmul.msk.f32.gmra.mxu1 %vm220_vm1, %v2937_v38  ;;  %v3469_v38 = vld [vmem:[#allocation2 + $0x98] sm:$0xff] }
 0x2bd   : > { %v7699_v48 = vadd.f32 %v2818_v23, %v2382_v41  ;;  %5985 = vmatmul.msk.f32.vlgmr.msra.gmra.mxu2 %vm220_vm1, %v3468_v54  ;;  %v4003_v54 = vld [vmem:[#allocation2 + $0x99] sm:$0xff] }
 0x2be   : > { %6051 = vmatmul.msk.f32.vlgmr.msra.gmra.mxu3 %vm220_vm1, %v4002_v49  ;;  %v8793_v41 = vld [vmem:[#allocation9_spill] sm:$0xff]  ;;  %v2827_v37 = vpop.f32.mrf.mxu0 }
 0x2bf   : > { %8790 = vst [vmem:[#allocation29_spill] sm:$0xff] %v7699_v48  ;;  %v1287_v49 = vadd.f32 %v7662_v40, %v8793_v41 }
 0x2c0   : > { %v1753_v13 = vpop.f32.mrf.mxu2 }
 0x2c1   : > { %v1849_v58 = vadd.f32 %v1753_v13, %v1284_v62  ;;  %v7707_v47 = vpop.f32.mrf.mxu1  ;;  %v2287_v56 = vpop.f32.mrf.mxu3  ;;  %v7718_v62 = vld [vmem:[#allocation2 + $0xa2] sm:$0xff] }
 0x2c2   : > { %6119 = vmatmul.msk.f32.gmra.mxu0 %vm220_vm1, %v7718_v62 }
 0x2c3   : > { %v2383_v23 = vadd.f32 %v2287_v56, %v1849_v58  ;;  %v2939_v58 = vld [vmem:[#allocation2 + $0x7a] sm:$0xff] }
 0x2c4   : > { %5924 = vmatmul.msk.f32.gmra.mxu1 %vm220_vm1, %v2938_v18  ;;  %v3470_v18 = vld [vmem:[#allocation2 + $0xa0] sm:$0xff] }
 0x2c5   : > { %v7712_v33 = vadd.f32 %v2821_v16, %v2383_v23  ;;  %5986 = vmatmul.msk.f32.gmra.mxu2 %vm220_vm1, %v3469_v38  ;;  %v4004_v38 = vld [vmem:[#allocation2 + $0xa1] sm:$0xff] }
 0x2c6   : > { %6052 = vmatmul.msk.f32.gmra.mxu3 %vm220_vm1, %v4003_v54  ;;  %v8795_v23 = vld [vmem:[#allocation10_spill] sm:$0xff]  ;;  %v2830_v41 = vpop.f32.mrf.mxu0 }
 0x2c7   : > { %8792 = vst [vmem:[#allocation31_spill] sm:$0xff] %v7712_v33  ;;  %v1290_v54 = vadd.f32 %v7672_v42, %v8795_v23 }
 0x2c8   : > { %v1756_v13 = vpop.f32.mrf.mxu2 }
 0x2c9   : > { %v1850_v48 = vadd.f32 %v1756_v13, %v1287_v49  ;;  %v7720_v1 = vpop.f32.mrf.mxu1  ;;  %v2290_v56 = vpop.f32.mrf.mxu3  ;;  %v7731_v49 = vld [vmem:[#allocation2 + $0xaa] sm:$0xff] }
 0x2ca   : > { %6120 = vmatmul.msk.f32.gmra.mxu0 %vm220_vm1, %v7731_v49 }
 0x2cb   : > { %v2384_v16 = vadd.f32 %v2290_v56, %v1850_v48  ;;  %v2940_v48 = vld [vmem:[#allocation2 + $0x82] sm:$0xff] }
 0x2cc   : > { %5925 = vmatmul.msk.f32.gmra.mxu1 %vm220_vm1, %v2939_v58  ;;  %v3471_v58 = vld [vmem:[#allocation2 + $0xa8] sm:$0xff] }
 0x2cd   : > { %v7725_v40 = vadd.f32 %v2824_v35, %v2384_v16  ;;  %5987 = vmatmul.msk.f32.gmra.mxu2 %vm220_vm1, %v3470_v18  ;;  %v4005_v18 = vld [vmem:[#allocation2 + $0xa9] sm:$0xff] }
 0x2ce   : > { %6053 = vmatmul.msk.f32.gmra.mxu3 %vm220_vm1, %v4004_v38  ;;  %v8797_v16 = vld [vmem:[#allocation11_spill] sm:$0xff]  ;;  %v2833_v23 = vpop.f32.mrf.mxu0 }
 0x2cf   : > { %8794 = vst [vmem:[#allocation33_spill] sm:$0xff] %v7725_v40  ;;  %v1293_v38 = vadd.f32 %v7682_v6, %v8797_v16  ;;  %v7758_v16 = vld [vmem:[#allocation2 + $0xba] sm:$0xff] }
 0x2d0   : > { %v1759_v13 = vpop.f32.mrf.mxu2 }
 0x2d1   : > { %v1851_v33 = vadd.f32 %v1759_v13, %v1290_v54  ;;  %v7733_v25 = vpop.f32.mrf.mxu1  ;;  %v2293_v56 = vpop.f32.mrf.mxu3  ;;  %v7744_v54 = vld [vmem:[#allocation2 + $0xb2] sm:$0xff] }
 0x2d2   : > { %6121 = vmatmul.msk.f32.gmra.mxu0 %vm220_vm1, %v7744_v54 }
 0x2d3   : > { %v2385_v35 = vadd.f32 %v2293_v56, %v1851_v33  ;;  %v3472_v56 = vld [vmem:[#allocation2 + $0xb0] sm:$0xff] }
 0x2d4   : > { %5926 = vmatmul.msk.f32.gmra.mxu1 %vm220_vm1, %v2940_v48  ;;  %v4006_v48 = vld [vmem:[#allocation2 + $0xb1] sm:$0xff] }
 0x2d5   : > { %v7738_v42 = vadd.f32 %v2827_v37, %v2385_v35  ;;  %5988 = vmatmul.msk.f32.gmra.mxu2 %vm220_vm1, %v3471_v58  ;;  %v8799_v58 = vld [vmem:[#allocation12_spill] sm:$0xff] }
 0x2d6   : > { %6054 = vmatmul.msk.f32.gmra.mxu3 %vm220_vm1, %v4005_v18  ;;  %v1296_v35 = vadd.f32 %v7694_v55, %v8799_v58  ;;  %v2836_v18 = vpop.f32.mrf.mxu0  ;;  %v7772_v58 = vld [vmem:[#allocation2 + $0xc2] sm:$0xff] }
 0x2d7   : > { %8796 = vst [vmem:[#allocation7_spill] sm:$0xff] %v7738_v42 }
 0x2d8   : > { %v1762_v13 = vpop.f32.mrf.mxu2 }
 0x2d9   : > { %v1852_v40 = vadd.f32 %v1762_v13, %v1293_v38  ;;  %v7746_v5 = vpop.f32.mrf.mxu1  ;;  %v2296_v33 = vpop.f32.mrf.mxu3 }
 0x2da   : > { %6122 = vmatmul.msk.f32.gmra.mxu0 %vm220_vm1, %v7758_v16 }
 0x2db   : > { %v2386_v37 = vadd.f32 %v2296_v33, %v1852_v40  ;;  %v3473_v33 = vld [vmem:[#allocation2 + $0xb8] sm:$0xff] }
 0x2dc   : > { %5927 = vmatmul.msk.f32.gmra.mxu1 %vm220_vm1, %v7692_v61 }
 0x2dd   : > { %v7752_v6 = vadd.f32 %v2830_v41, %v2386_v37  ;;  %5989 = vmatmul.msk.f32.gmra.mxu2 %vm220_vm1, %v3472_v56  ;;  %v4007_v41 = vld [vmem:[#allocation2 + $0xb9] sm:$0xff]  ;;  %v8801_v56 = vld [vmem:[#allocation14_spill] sm:$0xff] }
 0x2de   : > { %6055 = vmatmul.msk.f32.gmra.mxu3 %vm220_vm1, %v4006_v48  ;;  %v1299_v37 = vadd.f32 %v7707_v47, %v8801_v56  ;;  %v2839_v48 = vpop.f32.mrf.mxu0  ;;  %v7786_v56 = vld [vmem:[#allocation2 + $0xca] sm:$0xff] }
 0x2df   : > { %8798 = vst [vmem:[#allocation8_spill] sm:$0xff] %v7752_v6 }
 0x2e0   : > { %v1765_v38 = vpop.f32.mrf.mxu2 }
 0x2e1   : > { %v1853_v13 = vadd.f32 %v1765_v38, %v1296_v35  ;;  %v7760_v42 = vpop.f32.mrf.mxu1  ;;  %v2299_v40 = vpop.f32.mrf.mxu3 }
 0x2e2   : > { %6123 = vmatmul.msk.f32.gmra.mxu0 %vm220_vm1, %v7772_v58 }
 0x2e3   : > { %v2387_v61 = vadd.f32 %v2299_v40, %v1853_v13  ;;  %v3474_v40 = vld [vmem:[#allocation2 + $0xc0] sm:$0xff] }
 0x2e4   : > { %5928 = vmatmul.msk.f32.gmra.mxu1 %vm220_vm1, %v7705_v50 }
 0x2e5   : > { %v7766_v55 = vadd.f32 %v2833_v23, %v2387_v61  ;;  %5990 = vmatmul.msk.f32.gmra.mxu2 %vm220_vm1, %v3473_v33  ;;  %v4008_v23 = vld [vmem:[#allocation2 + $0xc1] sm:$0xff]  ;;  %v8803_v33 = vld [vmem:[#allocation16_spill] sm:$0xff] }
 0x2e6   : > { %6056 = vmatmul.msk.f32.gmra.mxu3 %vm220_vm1, %v4007_v41  ;;  %v1302_v61 = vadd.f32 %v7720_v1, %v8803_v33  ;;  %v2842_v41 = vpop.f32.mrf.mxu0  ;;  %v7800_v33 = vld [vmem:[#allocation2 + $0xda] sm:$0xff] }
 0x2e7   : > { %8800 = vst [vmem:[#allocation9_spill] sm:$0xff] %v7766_v55 }
 0x2e8   : > { %v1768_v35 = vpop.f32.mrf.mxu2 }
 0x2e9   : > { %v1854_v38 = vadd.f32 %v1768_v35, %v1299_v37  ;;  %v7774_v6 = vpop.f32.mrf.mxu1  ;;  %v2302_v13 = vpop.f32.mrf.mxu3 }
 0x2ea   : > { %6124 = vmatmul.msk.f32.gmra.mxu0 %vm220_vm1, %v7786_v56 }
 0x2eb   : > { %v2388_v50 = vadd.f32 %v2302_v13, %v1854_v38  ;;  %v3475_v13 = vld [vmem:[#allocation2 + $0xc8] sm:$0xff] }
 0x2ec   : > { %5929 = vmatmul.msk.f32.gmra.mxu1 %vm220_vm1, %v7718_v62 }
 0x2ed   : > { %v7780_v47 = vadd.f32 %v2836_v18, %v2388_v50  ;;  %5991 = vmatmul.msk.f32.gmra.mxu2 %vm220_vm1, %v3474_v40  ;;  %v4009_v18 = vld [vmem:[#allocation2 + $0xc9] sm:$0xff] }
 0x2ee   : > { %6057 = vmatmul.msk.f32.gmra.mxu3 %vm220_vm1, %v4008_v23  ;;  %v8805_v40 = vld [vmem:[#allocation18_spill] sm:$0xff]  ;;  %v2845_v23 = vpop.f32.mrf.mxu0 }
 0x2ef   : > { %8802 = vst [vmem:[#allocation10_spill] sm:$0xff] %v7780_v47  ;;  %v1305_v50 = vadd.f32 %v7733_v25, %v8805_v40  ;;  %v7814_v40 = vld [vmem:[#allocation2 + $0xe2] sm:$0xff] }
 0x2f0   : > { %v1771_v37 = vpop.f32.mrf.mxu2 }
 0x2f1   : > { %v1855_v35 = vadd.f32 %v1771_v37, %v1302_v61  ;;  %v7788_v55 = vpop.f32.mrf.mxu1  ;;  %v2305_v38 = vpop.f32.mrf.mxu3 }
 0x2f2   : > { %6125 = vmatmul.msk.f32.gmra.mxu0 %vm220_vm1, %v7800_v33 }
 0x2f3   : > { %v2389_v62 = vadd.f32 %v2305_v38, %v1855_v35  ;;  %v3476_v38 = vld [vmem:[#allocation2 + $0xd8] sm:$0xff] }
 0x2f4   : > { %5930 = vmatmul.msk.f32.gmra.mxu1 %vm220_vm1, %v7731_v49 }
 0x2f5   : > { %v7794_v1 = vadd.f32 %v2839_v48, %v2389_v62  ;;  %5992 = vmatmul.msk.f32.gmra.mxu2 %vm220_vm1, %v3475_v13  ;;  %v4010_v48 = vld [vmem:[#allocation2 + $0xd9] sm:$0xff] }
 0x2f6   : > { %6058 = vmatmul.msk.f32.gmra.mxu3 %vm220_vm1, %v4009_v18  ;;  %v8807_v13 = vld [vmem:[#allocation20_spill] sm:$0xff]  ;;  %v2848_v18 = vpop.f32.mrf.mxu0 }
 0x2f7   : > { %8804 = vst [vmem:[#allocation11_spill] sm:$0xff] %v7794_v1  ;;  %v1308_v62 = vadd.f32 %v7746_v5, %v8807_v13  ;;  %v7828_v13 = vld [vmem:[#allocation2 + $0xea] sm:$0xff] }
 0x2f8   : > { %v1774_v61 = vpop.f32.mrf.mxu2 }
 0x2f9   : > { %v1856_v37 = vadd.f32 %v1774_v61, %v1305_v50  ;;  %v7802_v47 = vpop.f32.mrf.mxu1  ;;  %v2308_v35 = vpop.f32.mrf.mxu3 }
 0x2fa   : > { %6126 = vmatmul.msk.f32.gmra.mxu0 %vm220_vm1, %v7814_v40 }
 0x2fb   : > { %v2390_v49 = vadd.f32 %v2308_v35, %v1856_v37  ;;  %v3477_v35 = vld [vmem:[#allocation2 + $0xe0] sm:$0xff] }
 0x2fc   : > { %5931 = vmatmul.msk.f32.gmra.mxu1 %vm220_vm1, %v7744_v54 }
 0x2fd   : > { %v7808_v25 = vadd.f32 %v2842_v41, %v2390_v49  ;;  %5993 = vmatmul.msk.f32.gmra.mxu2 %vm220_vm1, %v3476_v38  ;;  %v4011_v41 = vld [vmem:[#allocation2 + $0xe1] sm:$0xff] }
 0x2fe   : > { %6059 = vmatmul.msk.f32.gmra.mxu3 %vm220_vm1, %v4010_v48  ;;  %v8809_v38 = vld [vmem:[#allocation22_spill] sm:$0xff]  ;;  %v2851_v48 = vpop.f32.mrf.mxu0 }
 0x2ff   : > { %8806 = vst [vmem:[#allocation12_spill] sm:$0xff] %v7808_v25  ;;  %v1311_v49 = vadd.f32 %v7760_v42, %v8809_v38  ;;  %v7842_v38 = vld [vmem:[#allocation2 + $0xf2] sm:$0xff] }
 0x300   : > { %v1777_v50 = vpop.f32.mrf.mxu2 }
 0x301   : > { %v1857_v61 = vadd.f32 %v1777_v50, %v1308_v62  ;;  %v7816_v1 = vpop.f32.mrf.mxu1  ;;  %v2311_v37 = vpop.f32.mrf.mxu3 }
 0x302   : > { %6127 = vmatmul.msk.f32.gmra.mxu0 %vm220_vm1, %v7828_v13 }
 0x303   : > { %v2391_v54 = vadd.f32 %v2311_v37, %v1857_v61  ;;  %v3478_v37 = vld [vmem:[#allocation2 + $0xe8] sm:$0xff] }
 0x304   : > { %5932 = vmatmul.msk.f32.gmra.mxu1 %vm220_vm1, %v7758_v16 }
 0x305   : > { %v7822_v5 = vadd.f32 %v2845_v23, %v2391_v54  ;;  %5994 = vmatmul.msk.f32.gmra.mxu2 %vm220_vm1, %v3477_v35  ;;  %v4012_v23 = vld [vmem:[#allocation2 + $0xe9] sm:$0xff]  ;;  %v8811_v35 = vld [vmem:[#allocation24_spill] sm:$0xff] }
 0x306   : > { %6060 = vmatmul.msk.f32.gmra.mxu3 %vm220_vm1, %v4011_v41  ;;  %v1314_v54 = vadd.f32 %v7774_v6, %v8811_v35  ;;  %v2854_v41 = vpop.f32.mrf.mxu0  ;;  %v7856_v35 = vld [vmem:[#allocation2 + $0xfa] sm:$0xff] }
 0x307   : > { %8808 = vst [vmem:[#allocation14_spill] sm:$0xff] %v7822_v5 }
 0x308   : > { %v1780_v62 = vpop.f32.mrf.mxu2 }
 0x309   : > { %v1858_v50 = vadd.f32 %v1780_v62, %v1311_v49  ;;  %v7830_v25 = vpop.f32.mrf.mxu1  ;;  %v2314_v61 = vpop.f32.mrf.mxu3 }
 0x30a   : > { %6128 = vmatmul.msk.f32.gmra.mxu0 %vm220_vm1, %v7842_v38 }
 0x30b   : > { %v2392_v16 = vadd.f32 %v2314_v61, %v1858_v50  ;;  %v3479_v61 = vld [vmem:[#allocation2 + $0xf0] sm:$0xff] }
 0x30c   : > { %5933 = vmatmul.msk.f32.gmra.mxu1 %vm220_vm1, %v7772_v58 }
 0x30d   : > { %v7836_v42 = vadd.f32 %v2848_v18, %v2392_v16  ;;  %5995 = vmatmul.msk.f32.gmra.mxu2 %vm220_vm1, %v3478_v37  ;;  %v4013_v18 = vld [vmem:[#allocation2 + $0xf1] sm:$0xff]  ;;  %v8812_v37 = vld [vmem:[#allocation26_spill] sm:$0xff] }
 0x30e   : > { %6061 = vmatmul.msk.f32.gmra.mxu3 %vm220_vm1, %v4012_v23  ;;  %v1317_v16 = vadd.f32 %v7788_v55, %v8812_v37  ;;  %v2857_v23 = vpop.f32.mrf.mxu0  ;;  %v4014_v55 = vld [vmem:[#allocation2 + $0xf9] sm:$0xff] }
 0x30f   : > { %8810 = vst [vmem:[#allocation16_spill] sm:$0xff] %v7836_v42 }
 0x310   : > { %v1783_v49 = vpop.f32.mrf.mxu2 }
 0x311   : > { %v1859_v62 = vadd.f32 %v1783_v49, %v1314_v54  ;;  %v7844_v5 = vpop.f32.mrf.mxu1  ;;  %v2317_v50 = vpop.f32.mrf.mxu3 }
 0x312   : > { %6129 = vmatmul.msk.f32.gmra.mxu0 %vm220_vm1, %v7856_v35 }
 0x313   : > { %v2393_v58 = vadd.f32 %v2317_v50, %v1859_v62 }
 0x314   : > { %5934 = vmatmul.msk.f32.gmra.mxu1 %vm220_vm1, %v7786_v56  ;;  %v3480_v56 = vld [vmem:[#allocation2 + $0xf8] sm:$0xff] }
 0x315   : > { %v7850_v6 = vadd.f32 %v2851_v48, %v2393_v58  ;;  %5996 = vmatmul.msk.f32.gmra.mxu2 %vm220_vm1, %v3479_v61  ;;  %v8813_v58 = vld [vmem:[#allocation28_spill] sm:$0xff] }
 0x316   : > { %6062 = vmatmul.msk.f32.gmra.mxu3 %vm220_vm1, %v4013_v18  ;;  %v1320_v18 = vadd.f32 %v7802_v47, %v8813_v58  ;;  %v4015_v47 = vld [vmem:[#allocation2 + $0x101] sm:$0xff]  ;;  %v7886_v58 = vld [vmem:[#allocation2 + $0x10a] sm:$0xff] }
 0x318   : > { %v1786_v54 = vpop.f32.mrf.mxu2 }
 0x319   : > { %v1860_v49 = vadd.f32 %v1786_v54, %v1317_v16  ;;  %v3211_v42 = vpop.f32.mrf.mxu1  ;;  %v2320_v62 = vpop.f32.mrf.mxu3 }
 0x31a   : > { %v7859_v50 = vadd.f32 %v3211_v42, %v7181_v45  ;;  %v2860_v45 = vpop.f32.mrf.mxu0  ;;  %v7871_v42 = vld [vmem:[#allocation2 + $0x102] sm:$0xff] }
 0x31b   : > { %v2394_v48 = vadd.f32 %v2320_v62, %v1860_v49  ;;  %6130 = vmatmul.msk.f32.gmra.mxu0 %vm220_vm1, %v7871_v42 }
 0x31c   : > { %5935 = vmatmul.msk.f32.gmra.mxu1 %vm220_vm1, %v7800_v33  ;;  %v3481_v33 = vld [vmem:[#allocation2 + $0x100] sm:$0xff] }
 0x31d   : > { %v7865_v61 = vadd.f32 %v2854_v41, %v2394_v48  ;;  %5997 = vmatmul.msk.f32.gmra.mxu2 %vm220_vm1, %v3480_v56  ;;  %v8815_v48 = vld [vmem:[#allocation30_spill] sm:$0xff] }
 0x31e   : > { %6063 = vmatmul.msk.f32.gmra.mxu3 %vm220_vm1, %v4014_v55  ;;  %v1323_v55 = vadd.f32 %v7816_v1, %v8815_v48  ;;  %v4016_v1 = vld [vmem:[#allocation2 + $0x109] sm:$0xff]  ;;  %v7901_v48 = vld [vmem:[#allocation2 + $0x112] sm:$0xff] }
 0x320   : > { %v1789_v37 = vpop.f32.mrf.mxu2 }
 0x321   : > { %v1861_v16 = vadd.f32 %v1789_v37, %v1320_v18  ;;  %v3214_v54 = vpop.f32.mrf.mxu1  ;;  %v2323_v49 = vpop.f32.mrf.mxu3 }
 0x322   : > { %v7874_v62 = vadd.f32 %v3214_v54, %v7191_v44  ;;  %v2863_v44 = vpop.f32.mrf.mxu0 }
 0x323   : > { %v2395_v41 = vadd.f32 %v2323_v49, %v1861_v16  ;;  %6131 = vmatmul.msk.f32.gmra.mxu0 %vm220_vm1, %v7886_v58 }
 0x324   : > { %5936 = vmatmul.msk.f32.gmra.mxu1 %vm220_vm1, %v7814_v40  ;;  %v3482_v40 = vld [vmem:[#allocation2 + $0x108] sm:$0xff] }
 0x325   : > { %v7880_v56 = vadd.f32 %v2857_v23, %v2395_v41  ;;  %5998 = vmatmul.msk.f32.gmra.mxu2 %vm220_vm1, %v3481_v33  ;;  %v8817_v41 = vld [vmem:[#allocation32_spill] sm:$0xff] }
 0x326   : > { %6064 = vmatmul.msk.f32.gmra.mxu3 %vm220_vm1, %v4015_v47  ;;  %v1326_v47 = vadd.f32 %v7830_v25, %v8817_v41  ;;  %v4017_v25 = vld [vmem:[#allocation2 + $0x111] sm:$0xff]  ;;  %v7916_v41 = vld [vmem:[#allocation2 + $0x122] sm:$0xff] }
 0x327   : > { %8814 = vst [vmem:[#allocation18_spill] sm:$0xff] %v7880_v56 }
 0x328   : > { %v1792_v18 = vpop.f32.mrf.mxu2 }
 0x329   : > { %v1862_v37 = vadd.f32 %v1792_v18, %v1323_v55  ;;  %v3217_v54 = vpop.f32.mrf.mxu1  ;;  %v2326_v16 = vpop.f32.mrf.mxu3 }
 0x32a   : > { %v7889_v49 = vadd.f32 %v3217_v54, %v7201_v51  ;;  %v2866_v51 = vpop.f32.mrf.mxu0 }
 0x32b   : > { %v2396_v23 = vadd.f32 %v2326_v16, %v1862_v37  ;;  %6132 = vmatmul.msk.f32.gmra.mxu0 %vm220_vm1, %v7901_v48 }
 0x32c   : > { %5937 = vmatmul.msk.f32.gmra.mxu1 %vm220_vm1, %v7828_v13  ;;  %v3483_v13 = vld [vmem:[#allocation2 + $0x110] sm:$0xff] }
 0x32d   : > { %v7895_v33 = vadd.f32 %v2860_v45, %v2396_v23  ;;  %5999 = vmatmul.msk.f32.gmra.mxu2 %vm220_vm1, %v3482_v40  ;;  %v8819_v23 = vld [vmem:[#allocation34_spill] sm:$0xff] }
 0x32e   : > { %6065 = vmatmul.msk.f32.gmra.mxu3 %vm220_vm1, %v4016_v1  ;;  %v1329_v1 = vadd.f32 %v7844_v5, %v8819_v23  ;;  %v4018_v5 = vld [vmem:[#allocation2 + $0x121] sm:$0xff] }
 0x32f   : > { %8816 = vst [vmem:[#allocation20_spill] sm:$0xff] %v7895_v33 }
 0x330   : > { %v1795_v55 = vpop.f32.mrf.mxu2 }
 0x331   : > { %v1863_v18 = vadd.f32 %v1795_v55, %v1326_v47  ;;  %v3220_v54 = vpop.f32.mrf.mxu1  ;;  %v2329_v37 = vpop.f32.mrf.mxu3 }
 0x332   : > { %v7904_v16 = vadd.f32 %v3220_v54, %v7211_v8  ;;  %v4814_v8 = vpop.f32.mrf.mxu0 }
 0x333   : > { %v2397_v45 = vadd.f32 %v2329_v37, %v1863_v18  ;;  %6133 = vmatmul.msk.f32.gmra.mxu0 %vm220_vm1, %v7916_v41 }
 0x334   : > { %5938 = vmatmul.msk.f32.gmra.mxu1 %vm220_vm1, %v7842_v38  ;;  %v3484_v38 = vld [vmem:[#allocation2 + $0x120] sm:$0xff] }
 0x335   : > { %v7910_v40 = vadd.f32 %v2863_v44, %v2397_v45  ;;  %6000 = vmatmul.msk.f32.gmra.mxu2 %vm220_vm1, %v3483_v13 }
 0x336   : > { %6066 = vmatmul.msk.f32.gmra.mxu3 %vm220_vm1, %v4017_v25  ;;  %v7929_v25 = vld [vmem:[#allocation2 + $0x12a] sm:$0xff] }
 0x337   : > { %8818 = vst [vmem:[#allocation22_spill] sm:$0xff] %v7910_v40 }
 0x338   : > { %v1798_v47 = vpop.f32.mrf.mxu2 }
 0x339   : > { %v1864_v55 = vadd.f32 %v1798_v47, %v1329_v1  ;;  %v3223_v54 = vpop.f32.mrf.mxu1  ;;  %v2332_v18 = vpop.f32.mrf.mxu3 }
 0x33a   : > { %v7919_v37 = vadd.f32 %v3223_v54, %v7222_v7  ;;  %v4817_v45 = vpop.f32.mrf.mxu0  ;;  %v3485_v54 = vld [vmem:[#allocation2 + $0x128] sm:$0xff] }
 0x33b   : > { %v2398_v44 = vadd.f32 %v2332_v18, %v1864_v55  ;;  %6134 = vmatmul.msk.f32.gmra.mxu0 %vm220_vm1, %v7929_v25 }
 0x33c   : > { %5939 = vmatmul.msk.f32.gmra.mxu1 %vm220_vm1, %v7856_v35 }
 0x33d   : > { %v7925_v13 = vadd.f32 %v2866_v51, %v2398_v44  ;;  %6001 = vmatmul.msk.f32.gmra.mxu2 %vm220_vm1, %v3484_v38  ;;  %v4019_v51 = vld [vmem:[#allocation2 + $0x129] sm:$0xff]  ;;  %v7943_v38 = vld [vmem:[#allocation2 + $0x132] sm:$0xff] }
 0x33e   : > { %6067 = vmatmul.msk.f32.gmra.mxu3 %vm220_vm1, %v4018_v5 }
 0x33f   : > { %8820 = vst [vmem:[#allocation24_spill] sm:$0xff] %v7925_v13 }
 0x340   : > { %v3746_v7 = vpop.f32.mrf.mxu2 }
 0x341   : > { %v3938_v23 = vadd.f32 %v3746_v7, %v7859_v50  ;;  %v3226_v1 = vpop.f32.mrf.mxu1  ;;  %v4280_v55 = vpop.f32.mrf.mxu3 }
 0x342   : > { %v7933_v47 = vadd.f32 %v3226_v1, %v7232_v21  ;;  %v4820_v50 = vpop.f32.mrf.mxu0  ;;  %v3486_v1 = vld [vmem:[#allocation2 + $0x130] sm:$0xff] }
 0x343   : > { %v4472_v35 = vadd.f32 %v4280_v55, %v3938_v23  ;;  %6135 = vmatmul.msk.f32.gmra.mxu0 %vm220_vm1, %v7943_v38 }
 0x344   : > { %5940 = vmatmul.msk.f32.gmra.mxu1 %vm220_vm1, %v7871_v42 }
 0x345   : > { %v7939_v18 = vadd.f32 %v4814_v8, %v4472_v35  ;;  %6002 = vmatmul.msk.f32.gmra.mxu2 %vm220_vm1, %v3485_v54  ;;  %v4020_v8 = vld [vmem:[#allocation2 + $0x131] sm:$0xff]  ;;  %v7957_v54 = vld [vmem:[#allocation2 + $0x13a] sm:$0xff] }
 0x346   : > { %6068 = vmatmul.msk.f32.gmra.mxu3 %vm220_vm1, %v4019_v51 }
 0x348   : > { %v3749_v21 = vpop.f32.mrf.mxu2 }
 0x349   : > { %v3939_v44 = vadd.f32 %v3749_v21, %v7874_v62  ;;  %v3229_v5 = vpop.f32.mrf.mxu1  ;;  %v4283_v23 = vpop.f32.mrf.mxu3 }
 0x34a   : > { %v7947_v7 = vadd.f32 %v3229_v5, %v7242_v4  ;;  %v4823_v62 = vpop.f32.mrf.mxu0  ;;  %v3487_v5 = vld [vmem:[#allocation2 + $0x138] sm:$0xff] }
 0x34b   : > { %v4473_v42 = vadd.f32 %v4283_v23, %v3939_v44  ;;  %6136 = vmatmul.msk.f32.gmra.mxu0 %vm220_vm1, %v7957_v54 }
 0x34c   : > { %5941 = vmatmul.msk.f32.gmra.mxu1 %vm220_vm1, %v7886_v58 }
 0x34d   : > { %v7953_v55 = vadd.f32 %v4817_v45, %v4473_v42  ;;  %6003 = vmatmul.msk.f32.gmra.mxu2 %vm220_vm1, %v3486_v1  ;;  %v4021_v45 = vld [vmem:[#allocation2 + $0x139] sm:$0xff]  ;;  %v7971_v1 = vld [vmem:[#allocation2 + $0x142] sm:$0xff] }
 0x34e   : > { %6069 = vmatmul.msk.f32.gmra.mxu3 %vm220_vm1, %v4020_v8 }
 0x350   : > { %v3752_v4 = vpop.f32.mrf.mxu2 }
 0x351   : > { %v3940_v35 = vadd.f32 %v3752_v4, %v7889_v49  ;;  %v3232_v51 = vpop.f32.mrf.mxu1  ;;  %v4286_v44 = vpop.f32.mrf.mxu3 }
 0x352   : > { %v7961_v21 = vadd.f32 %v3232_v51, %v7252_v34  ;;  %v4826_v49 = vpop.f32.mrf.mxu0 }
 0x353   : > { %v4474_v58 = vadd.f32 %v4286_v44, %v3940_v35  ;;  %v3488_v35 = vld [vmem:[#allocation2 + $0x140] sm:$0xff]  ;;  %6137 = vmatmul.msk.f32.gmra.mxu0 %vm220_vm1, %v7971_v1 }
 0x354   : > { %5942 = vmatmul.msk.f32.gmra.mxu1 %vm220_vm1, %v7901_v48 }
 0x355   : > { %v7967_v23 = vadd.f32 %v4820_v50, %v4474_v58  ;;  %6004 = vmatmul.msk.f32.gmra.mxu2 %vm220_vm1, %v3487_v5  ;;  %v4022_v50 = vld [vmem:[#allocation2 + $0x141] sm:$0xff] }
 0x356   : > { %6070 = vmatmul.msk.f32.gmra.mxu3 %vm220_vm1, %v4021_v45 }
 0x358   : > { %v3755_v34 = vpop.f32.mrf.mxu2 }
 0x359   : > { %v3941_v42 = vadd.f32 %v3755_v34, %v7904_v16  ;;  %v7974_v8 = vpop.f32.mrf.mxu1  ;;  %v4289_v4 = vpop.f32.mrf.mxu3  ;;  %v7984_v16 = vld [vmem:[#allocation2 + $0x14a] sm:$0xff] }
 0x35a   : > { %v4829_v44 = vpop.f32.mrf.mxu0 }
 0x35b   : > { %v4475_v48 = vadd.f32 %v4289_v4, %v3941_v42  ;;  %v3489_v42 = vld [vmem:[#allocation2 + $0x148] sm:$0xff]  ;;  %6138 = vmatmul.msk.f32.gmra.mxu0 %vm220_vm1, %v7984_v16 }
 0x35c   : > { %5943 = vmatmul.msk.f32.gmra.mxu1 %vm220_vm1, %v7916_v41 }
 0x35d   : > { %v7980_v51 = vadd.f32 %v4823_v62, %v4475_v48  ;;  %6005 = vmatmul.msk.f32.gmra.mxu2 %vm220_vm1, %v3488_v35  ;;  %v4023_v62 = vld [vmem:[#allocation2 + $0x149] sm:$0xff] }
 0x35e   : > { %6071 = vmatmul.msk.f32.gmra.mxu3 %vm220_vm1, %v4022_v50 }
 0x360   : > { %v3758_v5 = vpop.f32.mrf.mxu2 }
 0x361   : > { %v3942_v58 = vadd.f32 %v3758_v5, %v7919_v37  ;;  %v7987_v45 = vpop.f32.mrf.mxu1  ;;  %v4292_v34 = vpop.f32.mrf.mxu3  ;;  %v7997_v37 = vld [vmem:[#allocation2 + $0x152] sm:$0xff] }
 0x362   : > { %v4832_v35 = vpop.f32.mrf.mxu0 }
 0x363   : > { %v4476_v41 = vadd.f32 %v4292_v34, %v3942_v58  ;;  %v3490_v58 = vld [vmem:[#allocation2 + $0x150] sm:$0xff]  ;;  %6139 = vmatmul.msk.f32.gmra.mxu0 %vm220_vm1, %v7997_v37 }
 0x364   : > { %5944 = vmatmul.msk.f32.gmra.mxu1 %vm220_vm1, %v7929_v25 }
 0x365   : > { %v7993_v4 = vadd.f32 %v4826_v49, %v4476_v41  ;;  %6006 = vmatmul.msk.f32.gmra.mxu2 %vm220_vm1, %v3489_v42  ;;  %v4024_v49 = vld [vmem:[#allocation2 + $0x151] sm:$0xff] }
 0x366   : > { %6072 = vmatmul.msk.f32.gmra.mxu3 %vm220_vm1, %v4023_v62 }
 0x368   : > { %v3761_v48 = vpop.f32.mrf.mxu2 }
 0x369   : > { %v3943_v50 = vadd.f32 %v3761_v48, %v7933_v47  ;;  %v8000_v5 = vpop.f32.mrf.mxu1  ;;  %v4295_v13 = vpop.f32.mrf.mxu3  ;;  %v8010_v47 = vld [vmem:[#allocation2 + $0x15a] sm:$0xff] }
 0x36a   : > { %v4835_v42 = vpop.f32.mrf.mxu0 }
 0x36b   : > { %v4477_v25 = vadd.f32 %v4295_v13, %v3943_v50  ;;  %v3491_v13 = vld [vmem:[#allocation2 + $0x158] sm:$0xff]  ;;  %6140 = vmatmul.msk.f32.gmra.mxu0 %vm220_vm1, %v8010_v47 }
 0x36c   : > { %5945 = vmatmul.msk.f32.gmra.mxu1 %vm220_vm1, %v7943_v38 }
 0x36d   : > { %v8006_v34 = vadd.f32 %v4829_v44, %v4477_v25  ;;  %6007 = vmatmul.msk.f32.gmra.mxu2 %vm220_vm1, %v3490_v58  ;;  %v4025_v44 = vld [vmem:[#allocation2 + $0x159] sm:$0xff] }
 0x36e   : > { %6073 = vmatmul.msk.f32.gmra.mxu3 %vm220_vm1, %v4024_v49 }
 0x370   : > { %v3764_v41 = vpop.f32.mrf.mxu2 }
 0x371   : > { %v3944_v62 = vadd.f32 %v3764_v41, %v7947_v7  ;;  %v8013_v48 = vpop.f32.mrf.mxu1  ;;  %v4298_v40 = vpop.f32.mrf.mxu3  ;;  %v8023_v7 = vld [vmem:[#allocation2 + $0x16a] sm:$0xff] }
 0x372   : > { %v4838_v58 = vpop.f32.mrf.mxu0 }
 0x373   : > { %v4478_v38 = vadd.f32 %v4298_v40, %v3944_v62  ;;  %v3492_v40 = vld [vmem:[#allocation2 + $0x168] sm:$0xff]  ;;  %6141 = vmatmul.msk.f32.gmra.mxu0 %vm220_vm1, %v8023_v7 }
 0x374   : > { %5946 = vmatmul.msk.f32.gmra.mxu1 %vm220_vm1, %v7957_v54 }
 0x375   : > { %v8019_v50 = vadd.f32 %v4832_v35, %v4478_v38  ;;  %6008 = vmatmul.msk.f32.gmra.mxu2 %vm220_vm1, %v3491_v13  ;;  %v4026_v35 = vld [vmem:[#allocation2 + $0x169] sm:$0xff]  ;;  %v3411_v13 = vadd.f32 %v7974_v8, %v7262_v26  ;;  %v8038_v38 = vld [vmem:[#allocation2 + $0x172] sm:$0xff]  ;;  %v3412_v8 = vadd.f32 %v7987_v45, %v7272_v32 }
 0x376   : > { %6074 = vmatmul.msk.f32.gmra.mxu3 %vm220_vm1, %v4025_v44  ;;  %v4028_v32 = vld [vmem:[#allocation2 + $0x179] sm:$0xff] }
 0x378   : > { %v3767_v25 = vpop.f32.mrf.mxu2 }
 0x379   : > { %v3945_v49 = vadd.f32 %v3767_v25, %v7961_v21  ;;  %v8026_v41 = vpop.f32.mrf.mxu1  ;;  %v4301_v33 = vpop.f32.mrf.mxu3 }
 0x37a   : > { %v4841_v21 = vpop.f32.mrf.mxu0 }
 0x37b   : > { %v4479_v54 = vadd.f32 %v4301_v33, %v3945_v49  ;;  %v3493_v49 = vld [vmem:[#allocation2 + $0x170] sm:$0xff]  ;;  %6142 = vmatmul.msk.f32.gmra.mxu0 %vm220_vm1, %v8038_v38 }
 0x37c   : > { %5947 = vmatmul.msk.f32.gmra.mxu1 %vm220_vm1, %v7971_v1 }
 0x37d   : > { %v8032_v62 = vadd.f32 %v4835_v42, %v4479_v54  ;;  %6009 = vmatmul.msk.f32.gmra.mxu2 %vm220_vm1, %v3492_v40  ;;  %v4027_v42 = vld [vmem:[#allocation2 + $0x171] sm:$0xff] }
 0x37e   : > { %6075 = vmatmul.msk.f32.gmra.mxu3 %vm220_vm1, %v4026_v35  ;;  %v8051_v35 = vld [vmem:[#allocation2 + $0x17a] sm:$0xff] }
 0x380   : > { %v3770_v44 = vpop.f32.mrf.mxu2 }
 0x381   : > { %v3946_v25 = vadd.f32 %v3770_v44, %v3411_v13  ;;  %v8040_v56 = vpop.f32.mrf.mxu1  ;;  %v4304_v33 = vpop.f32.mrf.mxu3 }
 0x382   : > { %v4844_v54 = vpop.f32.mrf.mxu0 }
 0x383   : > { %v4480_v1 = vadd.f32 %v4304_v33, %v3946_v25  ;;  %v3494_v33 = vld [vmem:[#allocation2 + $0x178] sm:$0xff]  ;;  %6143 = vmatmul.msk.f32.gmra.mxu0 %vm220_vm1, %v8051_v35 }
 0x384   : > { %5948 = vmatmul.msk.f32.gmra.mxu1 %vm220_vm1, %v7984_v16 }
 0x385   : > { %v5014_v26 = vadd.f32 %v4838_v58, %v4480_v1  ;;  %6010 = vmatmul.msk.f32.gmra.mxu2 %vm220_vm1, %v3493_v49 }
 0x386   : > { %6076 = vmatmul.msk.f32.gmra.mxu3 %vm220_vm1, %v4027_v42  ;;  %v8064_v42 = vld [vmem:[#allocation2 + $0x182] sm:$0xff] }
 0x387   : > { %v6282_v40 = vpack.i.bf16 %v5014_v26, %v7939_v18  ;;  %v3413_v18 = vadd.f32 %v8000_v5, %v7282_v59  ;;  %v4029_v59 = vld [vmem:[#allocation2 + $0x181] sm:$0xff] }
 0x388   : > { %v3773_v13 = vpop.f32.mrf.mxu2 }
 0x389   : > { %v3947_v44 = vadd.f32 %v3773_v13, %v3412_v8  ;;  %6283 = vxpose.xlu0.b32.start [1/8] (short) (narrow) %v6282_v40, 8  ;;  %v8053_v25 = vpop.f32.mrf.mxu1  ;;  %v4307_v16 = vpop.f32.mrf.mxu3  ;;  %v3495_v13 = vld [vmem:[#allocation2 + $0x180] sm:$0xff] }
 0x38a   : > { %v4847_v1 = vpop.f32.mrf.mxu0 }
 0x38b   : > { %v4481_v58 = vadd.f32 %v4307_v16, %v3947_v44  ;;  %6144 = vmatmul.msk.f32.gmra.mxu0 %vm220_vm1, %v8064_v42 }
 0x38c   : > { %5949 = vmatmul.msk.f32.gmra.mxu1 %vm220_vm1, %v7997_v37 }
 0x38d   : > { %v5015_v45 = vadd.f32 %v4841_v21, %v4481_v58  ;;  %6011 = vmatmul.msk.f32.gmra.mxu2 %vm220_vm1, %v3494_v33  ;;  %v8077_v33 = vld [vmem:[#allocation2 + $0x18a] sm:$0xff] }
 0x38e   : > { %6077 = vmatmul.msk.f32.gmra.mxu3 %vm220_vm1, %v4028_v32 }
 0x38f   : > { %v6284_v49 = vpack.i.bf16 %v5015_v45, %v7953_v55  ;;  %v3414_v55 = vadd.f32 %v8013_v48, %v7292_v19 }
 0x390   : > { %v3776_v26 = vpop.f32.mrf.mxu2 }
 0x391   : > { %v3948_v8 = vadd.f32 %v3776_v26, %v3413_v18  ;;  %6285 = vxpose.xlu0.b32.cont [2/8] (short) (narrow) %v6284_v49, 8  ;;  %v8066_v40 = vpop.f32.mrf.mxu1  ;;  %v4310_v37 = vpop.f32.mrf.mxu3  ;;  %v3496_v18 = vld [vmem:[#allocation2 + $0x188] sm:$0xff]  ;;  %v3415_v49 = vadd.f32 %v8026_v41, %v7302_v63 }
 0x392   : > { %v4850_v16 = vpop.f32.mrf.mxu0 }
 0x393   : > { %v4482_v21 = vadd.f32 %v4310_v37, %v3948_v8  ;;  %6145 = vmatmul.msk.f32.gmra.mxu0 %vm220_vm1, %v8077_v33  ;;  %v8091_v8 = vld [vmem:[#allocation2 + $0x192] sm:$0xff] }
 0x394   : > { %5950 = vmatmul.msk.f32.gmra.mxu1 %vm220_vm1, %v8010_v47 }
 0x395   : > { %v5016_v5 = vadd.f32 %v4844_v54, %v4482_v21  ;;  %6012 = vmatmul.msk.f32.gmra.mxu2 %vm220_vm1, %v3495_v13 }
 0x396   : > { %6078 = vmatmul.msk.f32.gmra.mxu3 %vm220_vm1, %v4029_v59  ;;  %v3497_v59 = vld [vmem:[#allocation2 + $0x190] sm:$0xff] }
 0x397   : > { %v6286_v44 = vpack.i.bf16 %v5016_v5, %v7967_v23  ;;  %v4030_v23 = vld [vmem:[#allocation2 + $0x189] sm:$0xff]  ;;  %v3416_v5 = vadd.f32 %v8040_v56, %v7312_v46  ;;  %v4032_v56 = vld [vmem:[#allocation2 + $0x199] sm:$0xff] }
 0x398   : > { %v3779_v58 = vpop.f32.mrf.mxu2 }
 0x399   : > { %v3949_v32 = vadd.f32 %v3779_v58, %v3414_v55  ;;  %6287 = vxpose.xlu0.b32.cont [3/8] (short) (narrow) %v6286_v44, 8  ;;  %v3259_v45 = vpop.f32.mrf.mxu1  ;;  %v4313_v54 = vpop.f32.mrf.mxu3  ;;  %v8105_v44 = vld [vmem:[#allocation2 + $0x19a] sm:$0xff] }
 0x39a   : > { %v8080_v47 = vadd.f32 %v3259_v45, %v7342_v22  ;;  %v4853_v26 = vpop.f32.mrf.mxu0 }
 0x39b   : > { %v4483_v19 = vadd.f32 %v4313_v54, %v3949_v32  ;;  %6146 = vmatmul.msk.f32.gmra.mxu0 %vm220_vm1, %v8091_v8  ;;  %v3498_v54 = vld [vmem:[#allocation2 + $0x198] sm:$0xff] }
 0x39c   : > { %5951 = vmatmul.msk.f32.gmra.mxu1 %vm220_vm1, %v8023_v7 }
 0x39d   : > { %v5017_v48 = vadd.f32 %v4847_v1, %v4483_v19  ;;  %6013 = vmatmul.msk.f32.gmra.mxu2 %vm220_vm1, %v3496_v18  ;;  %v3417_v18 = vadd.f32 %v8053_v25, %v7322_v43 }
 0x39e   : > { %6079 = vmatmul.msk.f32.gmra.mxu3 %vm220_vm1, %v4030_v23  ;;  %v8119_v23 = vld [vmem:[#allocation2 + $0x1a2] sm:$0xff] }
 0x39f   : > { %v6288_v22 = vpack.i.bf16 %v5017_v48, %v7980_v51  ;;  %v4031_v51 = vld [vmem:[#allocation2 + $0x191] sm:$0xff] }
 0x3a0   : > { %v3782_v37 = vpop.f32.mrf.mxu2 }
 0x3a1   : > { %v3950_v13 = vadd.f32 %v3782_v37, %v3415_v49  ;;  %6289 = vxpose.xlu0.b32.cont [4/8] (short) (narrow) %v6288_v22, 8  ;;  %v3262_v21 = vpop.f32.mrf.mxu1  ;;  %v4316_v1 = vpop.f32.mrf.mxu3  ;;  %v3499_v37 = vld [vmem:[#allocation2 + $0x1a0] sm:$0xff] }
 0x3a2   : > { %v8094_v7 = vadd.f32 %v3262_v21, %v7352_v20  ;;  %v4856_v55 = vpop.f32.mrf.mxu0 }
 0x3a3   : > { %v4484_v63 = vadd.f32 %v4316_v1, %v3950_v13  ;;  %6147 = vmatmul.msk.f32.gmra.mxu0 %vm220_vm1, %v8105_v44  ;;  %v3418_v13 = vadd.f32 %v8066_v40, %v7332_v11  ;;  %v8133_v1 = vld [vmem:[#allocation2 + $0x1b2] sm:$0xff] }
 0x3a4   : > { %5952 = vmatmul.msk.f32.gmra.mxu1 %vm220_vm1, %v8038_v38 }
 0x3a5   : > { %v5018_v41 = vadd.f32 %v4850_v16, %v4484_v63  ;;  %6014 = vmatmul.msk.f32.gmra.mxu2 %vm220_vm1, %v3497_v59 }
 0x3a6   : > { %6080 = vmatmul.msk.f32.gmra.mxu3 %vm220_vm1, %v4031_v51 }
 0x3a7   : > { %v6290_v20 = vpack.i.bf16 %v5018_v41, %v7993_v4 }
 0x3a8   : > { %v3785_v58 = vpop.f32.mrf.mxu2 }
 0x3a9   : > { %v3951_v32 = vadd.f32 %v3785_v58, %v3416_v5  ;;  %6291 = vxpose.xlu0.b32.cont [5/8] (short) (narrow) %v6290_v20, 8  ;;  %v3265_v45 = vpop.f32.mrf.mxu1  ;;  %v4319_v16 = vpop.f32.mrf.mxu3  ;;  %v3500_v5 = vld [vmem:[#allocation2 + $0x1b0] sm:$0xff] }
 0x3aa   : > { %v8108_v38 = vadd.f32 %v3265_v45, %v7362_v29  ;;  %v4859_v19 = vpop.f32.mrf.mxu0 }
 0x3ab   : > { %v4485_v46 = vadd.f32 %v4319_v16, %v3951_v32  ;;  %6148 = vmatmul.msk.f32.gmra.mxu0 %vm220_vm1, %v8119_v23 }
 0x3ac   : > { %5953 = vmatmul.msk.f32.gmra.mxu1 %vm220_vm1, %v8051_v35 }
 0x3ad   : > { %v5019_v4 = vadd.f32 %v4853_v26, %v4485_v46  ;;  %6015 = vmatmul.msk.f32.gmra.mxu2 %vm220_vm1, %v3498_v54  ;;  %v3501_v54 = vld [vmem:[#allocation2 + $0x1b8] sm:$0xff] }
 0x3ae   : > { %6081 = vmatmul.msk.f32.gmra.mxu3 %vm220_vm1, %v4032_v56 }
 0x3af   : > { %v6292_v29 = vpack.i.bf16 %v5019_v4, %v8006_v34  ;;  %v4033_v34 = vld [vmem:[#allocation2 + $0x1a1] sm:$0xff] }
 0x3b0   : > { %v3788_v48 = vpop.f32.mrf.mxu2  ;;  %v8159_v4 = vld [vmem:[#allocation2 + $0x1c2] sm:$0xff] }
 0x3b1   : > { %v3952_v49 = vadd.f32 %v3788_v48, %v3417_v18  ;;  %6293 = vxpose.xlu0.b32.cont [6/8] (short) (narrow) %v6292_v29, 8  ;;  %v3268_v22 = vpop.f32.mrf.mxu1  ;;  %v4322_v26 = vpop.f32.mrf.mxu3 }
 0x3b2   : > { %v8122_v35 = vadd.f32 %v3268_v22, %v7372_v12  ;;  %v4862_v21 = vpop.f32.mrf.mxu0  ;;  %v4036_v22 = vld [vmem:[#allocation2 + $0x1c1] sm:$0xff] }
 0x3b3   : > { %v4486_v43 = vadd.f32 %v4322_v26, %v3952_v49  ;;  %6149 = vmatmul.msk.f32.gmra.mxu0 %vm220_vm1, %v8133_v1  ;;  %v3502_v49 = vld [vmem:[#allocation2 + $0x1c0] sm:$0xff] }
 0x3b4   : > { %5954 = vmatmul.msk.f32.gmra.mxu1 %vm220_vm1, %v8064_v42 }
 0x3b5   : > { %v5020_v25 = vadd.f32 %v4856_v55, %v4486_v43  ;;  %6016 = vmatmul.msk.f32.gmra.mxu2 %vm220_vm1, %v3499_v37  ;;  %v8173_v37 = vld [vmem:[#allocation2 + $0x1ca] sm:$0xff] }
 0x3b6   : > { %6082 = vmatmul.msk.f32.gmra.mxu3 %vm220_vm1, %v4033_v34 }
 0x3b7   : > { %v6294_v12 = vpack.i.bf16 %v5020_v25, %v8019_v50  ;;  %v4034_v50 = vld [vmem:[#allocation2 + $0x1b1] sm:$0xff] }
 0x3b8   : > { %v3791_v59 = vpop.f32.mrf.mxu2 }
 0x3b9   : > { %v3953_v63 = vadd.f32 %v3791_v59, %v3418_v13  ;;  %6295 = vxpose.xlu0.b32.cont [7/8] (short) (narrow) %v6294_v12, 8  ;;  %v3271_v51 = vpop.f32.mrf.mxu1  ;;  %v4325_v41 = vpop.f32.mrf.mxu3  ;;  %v3503_v12 = vld [vmem:[#allocation2 + $0x1c8] sm:$0xff] }
 0x3ba   : > { %v8136_v42 = vadd.f32 %v3271_v51, %v7382_v9  ;;  %v4865_v55 = vpop.f32.mrf.mxu0  ;;  %v8145_v9 = vld [vmem:[#allocation2 + $0x1ba] sm:$0xff] }
 0x3bb   : > { %v4487_v11 = vadd.f32 %v4325_v41, %v3953_v63  ;;  %6150 = vmatmul.msk.f32.gmra.mxu0 %vm220_vm1, %v8145_v9  ;;  %v8187_v63 = vld [vmem:[#allocation2 + $0x1d2] sm:$0xff] }
 0x3bc   : > { %5955 = vmatmul.msk.f32.gmra.mxu1 %vm220_vm1, %v8077_v33 }
 0x3bd   : > { %v5021_v40 = vadd.f32 %v4859_v19, %v4487_v11  ;;  %6017 = vmatmul.msk.f32.gmra.mxu2 %vm220_vm1, %v3500_v5  ;;  %v3504_v11 = vld [vmem:[#allocation2 + $0x1d0] sm:$0xff] }
 0x3be   : > { %6083 = vmatmul.msk.f32.gmra.mxu3 %vm220_vm1, %v4034_v50  ;;  %v4038_v50 = vld [vmem:[#allocation2 + $0x1d1] sm:$0xff] }
 0x3bf   : > { %v6296_v20 = vpack.i.bf16 %v5021_v40, %v8032_v62  ;;  %v4035_v62 = vld [vmem:[#allocation2 + $0x1b9] sm:$0xff] }
 0x3c0   : > { %v3794_v58 = vpop.f32.mrf.mxu2 }
 0x3c1   : > { %v3954_v32 = vadd.f32 %v3794_v58, %v8080_v47  ;;  %6297 = vxpose.xlu0.b32.end [8/8] (short) (narrow) %v6296_v20, 8  ;;  %v3274_v45 = vpop.f32.mrf.mxu1  ;;  %v4328_v33 = vpop.f32.mrf.mxu3 }
 0x3c2   : > { %v8149_v16 = vadd.f32 %v3274_v45, %v7392_v14  ;;  %v4868_v47 = vpop.f32.mrf.mxu0 }
 0x3c3   : > { %v4488_v46 = vadd.f32 %v4328_v33, %v3954_v32  ;;  %6151 = vmatmul.msk.f32.gmra.mxu0 %vm220_vm1, %v8159_v4  ;;  %v3505_v33 = vld [vmem:[#allocation2 + $0x1d8] sm:$0xff] }
 0x3c4   : > { %5956 = vmatmul.msk.f32.gmra.mxu1 %vm220_vm1, %v8091_v8 }
 0x3c5   : > { %v8155_v56 = vadd.f32 %v4862_v21, %v4488_v46  ;;  %6018 = vmatmul.msk.f32.gmra.mxu2 %vm220_vm1, %v3501_v54  ;;  %v4037_v21 = vld [vmem:[#allocation2 + $0x1c9] sm:$0xff]  ;;  %v4039_v54 = vld [vmem:[#allocation2 + $0x1d9] sm:$0xff] }
 0x3c6   : > { %6084 = vmatmul.msk.f32.gmra.mxu3 %vm220_vm1, %v4035_v62 }
 0x3c8   : > { %v3797_v14 = vpop.f32.mrf.mxu2 }
 0x3c9   : > { %v3955_v18 = vadd.f32 %v3797_v14, %v8094_v7  ;;  %v3277_v29 = vpop.f32.mrf.mxu1  ;;  %v4331_v48 = vpop.f32.mrf.mxu3 }
 0x3ca   : > { %v8163_v19 = vadd.f32 %v3277_v29, %v7402_v10  ;;  %v4871_v7 = vpop.f32.mrf.mxu0 }
 0x3cb   : > { %v4489_v8 = vadd.f32 %v4331_v48, %v3955_v18  ;;  %6152 = vmatmul.msk.f32.gmra.mxu0 %vm220_vm1, %v8173_v37  ;;  %v3506_v48 = vld [vmem:[#allocation2 + $0x1e0] sm:$0xff] }
 0x3cc   : > { %5957 = vmatmul.msk.f32.gmra.mxu1 %vm220_vm1, %v8105_v44 }
 0x3cd   : > { %v8169_v26 = vadd.f32 %v4865_v55, %v4489_v8  ;;  %6019 = vmatmul.msk.f32.gmra.mxu2 %vm220_vm1, %v3502_v49  ;;  %v5435_v49 = vld [vmem:[%s8821_s2 + $0x78] sm:$0xff]  ;;  %v4040_v8 = vld [vmem:[#allocation2 + $0x1e1] sm:$0xff] }
 0x3ce   : > { %6085 = vmatmul.msk.f32.gmra.mxu3 %vm220_vm1, %v4036_v22  ;;  %5436 = vmatpush.msrb.mxu1 %v5435_v49 }
 0x3d0   : > { %v3800_v10 = vpop.f32.mrf.mxu2 }
 0x3d1   : > { %v3956_v43 = vadd.f32 %v3800_v10, %v8108_v38  ;;  %v3280_v34 = vpop.f32.mrf.mxu1  ;;  %v4334_v13 = vpop.f32.mrf.mxu3 }
 0x3d2   : > { %v8177_v25 = vadd.f32 %v3280_v34, %v7412_v15  ;;  %v4874_v38 = vpop.f32.mrf.mxu0 }
 0x3d3   : > { %v4490_v44 = vadd.f32 %v4334_v13, %v3956_v43  ;;  %6153 = vmatmul.msk.f32.gmra.mxu0 %vm220_vm1, %v8187_v63 }
 0x3d4   : > { %5958 = vmatmul.msk.f32.gmra.mxu1 %vm220_vm1, %v8119_v23 }
 0x3d5   : > { %v8183_v59 = vadd.f32 %v4868_v47, %v4490_v44  ;;  %6020 = vmatmul.msk.f32.gmra.mxu2 %vm220_vm1, %v3503_v12  ;;  %v3507_v12 = vld [vmem:[#allocation2 + $0x1e8] sm:$0xff] }
 0x3d6   : > { %6086 = vmatmul.msk.f32.gmra.mxu3 %vm220_vm1, %v4037_v21  ;;  %v4041_v44 = vld [vmem:[#allocation2 + $0x1e9] sm:$0xff] }
 0x3d8   : > { %v3803_v15 = vpop.f32.mrf.mxu2 }
 0x3d9   : > { %v3957_v51 = vadd.f32 %v3803_v15, %v8122_v35  ;;  %v8190_v41 = vpop.f32.mrf.mxu1  ;;  %v4337_v5 = vpop.f32.mrf.mxu3  ;;  %v8200_v35 = vld [vmem:[#allocation2 + $0x1da] sm:$0xff] }
 0x3da   : > { %v4877_v20 = vpop.f32.mrf.mxu0 }
 0x3db   : > { %v4491_v23 = vadd.f32 %v4337_v5, %v3957_v51  ;;  %6154 = vmatmul.msk.f32.gmra.mxu0 %vm220_vm1, %v8200_v35 }
 0x3dc   : > { %5959 = vmatmul.msk.f32.gmra.mxu1 %vm220_vm1, %v8133_v1 }
 0x3dd   : > { %v8196_v40 = vadd.f32 %v4871_v7, %v4491_v23  ;;  %6021 = vmatmul.msk.f32.gmra.mxu2 %vm220_vm1, %v3504_v11  ;;  %v8229_v7 = vld [vmem:[#allocation2 + $0x1ea] sm:$0xff]  ;;  %v3508_v23 = vld [vmem:[#allocation2 + $0x1f8] sm:$0xff] }
 0x3de   : > { %6087 = vmatmul.msk.f32.gmra.mxu3 %vm220_vm1, %v4038_v50  ;;  %v4042_v50 = vld [vmem:[#allocation2 + $0x1f9] sm:$0xff] }
 0x3e0   : > { %v3806_v55 = vpop.f32.mrf.mxu2 }
 0x3e1   : > { %v3958_v58 = vadd.f32 %v3806_v55, %v8136_v42  ;;  %v8203_v32 = vpop.f32.mrf.mxu1  ;;  %v4340_v45 = vpop.f32.mrf.mxu3  ;;  %v8213_v42 = vld [vmem:[#allocation2 + $0x1e2] sm:$0xff]  ;;  %v3427_v55 = vadd.f32 %v8190_v41, %v7422_v24 }
 0x3e2   : > { %v4880_v62 = vpop.f32.mrf.mxu0  ;;  %v3428_v41 = vadd.f32 %v8203_v32, %v7432_v36  ;;  %v5434_v36 = vld [vmem:[%s8821_s2 + $0x70] sm:$0xff] }
 0x3e3   : > { %v4492_v1 = vadd.f32 %v4340_v45, %v3958_v58  ;;  %6155 = vmatmul.msk.f32.gmra.mxu0 %vm220_vm1, %v8213_v42  ;;  %v8257_v58 = vld [vmem:[#allocation2 + $0x202] sm:$0xff]  ;;  %5437 = vmatpush.msrb.mxu1 %v5434_v36 }
 0x3e4   : > { %5960 = vmatmul.msk.f32.gmra.mxu1 %vm220_vm1, %v8145_v9 }
 0x3e5   : > { %v8209_v46 = vadd.f32 %v4874_v38, %v4492_v1  ;;  %6022 = vmatmul.msk.f32.gmra.mxu2 %vm220_vm1, %v3505_v33 }
 0x3e6   : > { %6088 = vmatmul.msk.f32.gmra.mxu3 %vm220_vm1, %v4039_v54 }
 0x3e8   : > { %v3809_v47 = vpop.f32.mrf.mxu2 }
 0x3e9   : > { %v3959_v14 = vadd.f32 %v3809_v47, %v8149_v16  ;;  %v8216_v18 = vpop.f32.mrf.mxu1  ;;  %v4343_v29 = vpop.f32.mrf.mxu3  ;;  %v4043_v47 = vld [vmem:[#allocation2 + $0x201] sm:$0xff] }
 0x3ea   : > { %v4883_v16 = vpop.f32.mrf.mxu0 }
 0x3eb   : > { %v4493_v9 = vadd.f32 %v4343_v29, %v3959_v14  ;;  %6156 = vmatmul.msk.f32.gmra.mxu0 %vm220_vm1, %v8229_v7 }
 0x3ec   : > { %5961 = vmatmul.msk.f32.gmra.mxu1 %vm220_vm1, %v8159_v4 }
 0x3ed   : > { %v8225_v22 = vadd.f32 %v4877_v20, %v4493_v9  ;;  %6023 = vmatmul.msk.f32.gmra.mxu2 %vm220_vm1, %v3506_v48  ;;  %v8270_v48 = vld [vmem:[#allocation2 + $0x20a] sm:$0xff] }
 0x3ee   : > { %6089 = vmatmul.msk.f32.gmra.mxu3 %vm220_vm1, %v4040_v8 }
 0x3f0   : > { %v3812_v10 = vpop.f32.mrf.mxu2 }
 0x3f1   : > { %v3960_v43 = vadd.f32 %v3812_v10, %v8163_v19  ;;  %v8232_v34 = vpop.f32.mrf.mxu1  ;;  %v4346_v13 = vpop.f32.mrf.mxu3  ;;  %v8242_v19 = vld [vmem:[#allocation2 + $0x1fa] sm:$0xff] }
 0x3f2   : > { %v4886_v38 = vpop.f32.mrf.mxu0 }
 0x3f3   : > { %v4494_v4 = vadd.f32 %v4346_v13, %v3960_v43  ;;  %6157 = vmatmul.msk.f32.gmra.mxu0 %vm220_vm1, %v8242_v19  ;;  %v3429_v43 = vadd.f32 %v8216_v18, %v7442_v27  ;;  %v4045_v27 = vld [vmem:[#allocation2 + $0x211] sm:$0xff] }
 0x3f4   : > { %5962 = vmatmul.msk.f32.gmra.mxu1 %vm220_vm1, %v8173_v37 }
 0x3f5   : > { %v8238_v21 = vadd.f32 %v4880_v62, %v4494_v4  ;;  %6024 = vmatmul.msk.f32.gmra.mxu2 %vm220_vm1, %v3507_v12  ;;  %v3509_v62 = vld [vmem:[#allocation2 + $0x200] sm:$0xff]  ;;  %v8286_v4 = vld [vmem:[#allocation2 + $0x212] sm:$0xff] }
 0x3f6   : > { %6090 = vmatmul.msk.f32.gmra.mxu3 %vm220_vm1, %v4041_v44 }
 0x3f8   : > { %v3815_v15 = vpop.f32.mrf.mxu2 }
 0x3f9   : > { %v3961_v51 = vadd.f32 %v3815_v15, %v8177_v25  ;;  %v8245_v5 = vpop.f32.mrf.mxu1  ;;  %v4349_v11 = vpop.f32.mrf.mxu3 }
 0x3fa   : > { %v4889_v25 = vpop.f32.mrf.mxu0 }
 0x3fb   : > { %v4495_v37 = vadd.f32 %v4349_v11, %v3961_v51  ;;  %6158 = vmatmul.msk.f32.gmra.mxu0 %vm220_vm1, %v8257_v58  ;;  %v3511_v51 = vld [vmem:[#allocation2 + $0x210] sm:$0xff] }
 0x3fc   : > { %5963 = vmatmul.msk.f32.gmra.mxu1 %vm220_vm1, %v8187_v63 }
 0x3fd   : > { %v8251_v20 = vadd.f32 %v4883_v16, %v4495_v37  ;;  %6025 = vmatmul.msk.f32.gmra.mxu2 %vm220_vm1, %v3508_v23  ;;  %v3510_v16 = vld [vmem:[#allocation2 + $0x208] sm:$0xff] }
 0x3fe   : > { %6091 = vmatmul.msk.f32.gmra.mxu3 %vm220_vm1, %v4042_v50  ;;  %v8299_v50 = vld [vmem:[#allocation2 + $0x21a] sm:$0xff] }
 0x400   : > { %v3818_v45 = vpop.f32.mrf.mxu2 }
 0x401   : > { %v3962_v33 = vadd.f32 %v3818_v45, %v3427_v55  ;;  %v8259_v1 = vpop.f32.mrf.mxu1  ;;  %v4352_v54 = vpop.f32.mrf.mxu3 }
 0x402   : > { %v4892_v29 = vpop.f32.mrf.mxu0 }
 0x403   : > { %v4496_v63 = vadd.f32 %v4352_v54, %v3962_v33  ;;  %6159 = vmatmul.msk.f32.gmra.mxu0 %vm220_vm1, %v8270_v48  ;;  %v3512_v54 = vld [vmem:[#allocation2 + $0x218] sm:$0xff] }
 0x404   : > { %5964 = vmatmul.msk.f32.gmra.mxu1 %vm220_vm1, %v8200_v35 }
 0x405   : > { %v5030_v24 = vadd.f32 %v4886_v38, %v4496_v63  ;;  %6026 = vmatmul.msk.f32.gmra.mxu2 %vm220_vm1, %v3509_v62  ;;  %v3431_v62 = vadd.f32 %v8245_v5, %v7462_v28 }
 0x406   : > { %6092 = vmatmul.msk.f32.gmra.mxu3 %vm220_vm1, %v4043_v47  ;;  %v8313_v47 = vld [vmem:[#allocation2 + $0x222] sm:$0xff] }
 0x407   : > { %v6303_v14 = vpack.i.bf16 %v5030_v24, %v8155_v56  ;;  %v4044_v56 = vld [vmem:[#allocation2 + $0x209] sm:$0xff] }
 0x408   : > { %v3821_v9 = vpop.f32.mrf.mxu2 }
 0x409   : > { %v3963_v49 = vadd.f32 %v3821_v9, %v3428_v41  ;;  %6304 = vxpose.xlu1.b32.start [1/8] (short) (narrow) %v6303_v14, 8  ;;  %v8272_v8 = vpop.f32.mrf.mxu1  ;;  %v4355_v35 = vpop.f32.mrf.mxu3  ;;  %v3513_v9 = vld [vmem:[#allocation2 + $0x220] sm:$0xff] }
 0x40a   : > { %v4895_v12 = vpop.f32.mrf.mxu0 }
 0x40b   : > { %v4497_v10 = vadd.f32 %v4355_v35, %v3963_v49  ;;  %6160 = vmatmul.msk.f32.gmra.mxu0 %vm220_vm1, %v8286_v4  ;;  %v3432_v49 = vadd.f32 %v8259_v1, %v7472_v52  ;;  %v4048_v1 = vld [vmem:[#allocation2 + $0x229] sm:$0xff] }
 0x40c   : > { %5965 = vmatmul.msk.f32.gmra.mxu1 %vm220_vm1, %v8213_v42 }
 0x40d   : > { %v5031_v32 = vadd.f32 %v4889_v25, %v4497_v10  ;;  %6027 = vmatmul.msk.f32.gmra.mxu2 %vm220_vm1, %v3510_v16  ;;  %v8327_v16 = vld [vmem:[#allocation2 + $0x22a] sm:$0xff] }
 0x40e   : > { %6093 = vmatmul.msk.f32.gmra.mxu3 %vm220_vm1, %v4044_v56 }
 0x40f   : > { %v6305_v13 = vpack.i.bf16 %v5031_v32, %v8169_v26  ;;  %v3430_v26 = vadd.f32 %v8232_v34, %v7452_v31 }
 0x410   : > { %v3824_v44 = vpop.f32.mrf.mxu2 }
 0x411   : > { %v3964_v38 = vadd.f32 %v3824_v44, %v3429_v43  ;;  %6306 = vxpose.xlu1.b32.cont [2/8] (short) (narrow) %v6305_v13, 8  ;;  %v8288_v15 = vpop.f32.mrf.mxu1  ;;  %v4358_v42 = vpop.f32.mrf.mxu3  ;;  %v3514_v43 = vld [vmem:[#allocation2 + $0x228] sm:$0xff] }
 0x412   : > { %v4898_v37 = vpop.f32.mrf.mxu0 }
 0x413   : > { %v4498_v11 = vadd.f32 %v4358_v42, %v3964_v38  ;;  %6161 = vmatmul.msk.f32.gmra.mxu0 %vm220_vm1, %v8299_v50  ;;  %v8344_v38 = vld [vmem:[#allocation2 + $0x232] sm:$0xff] }
 0x414   : > { %5966 = vmatmul.msk.f32.gmra.mxu1 %vm220_vm1, %v8229_v7 }
 0x415   : > { %v5032_v18 = vadd.f32 %v4892_v29, %v4498_v11  ;;  %6028 = vmatmul.msk.f32.gmra.mxu2 %vm220_vm1, %v3511_v51 }
 0x416   : > { %6094 = vmatmul.msk.f32.gmra.mxu3 %vm220_vm1, %v4045_v27 }
 0x417   : > { %v6307_v23 = vpack.i.bf16 %v5032_v18, %v8183_v59  ;;  %v4046_v59 = vld [vmem:[#allocation2 + $0x219] sm:$0xff]  ;;  %v3515_v18 = vld [vmem:[#allocation2 + $0x230] sm:$0xff] }
 0x418   : > { %v3827_v55 = vpop.f32.mrf.mxu2 }
 0x419   : > { %v3965_v25 = vadd.f32 %v3827_v55, %v3430_v26  ;;  %6308 = vxpose.xlu1.b32.cont [3/8] (short) (narrow) %v6307_v23, 8  ;;  %v3307_v45 = vpop.f32.mrf.mxu1  ;;  %v4361_v33 = vpop.f32.mrf.mxu3  ;;  %v3434_v26 = vadd.f32 %v8288_v15, %v7492_v2 }
 0x41a   : > { %v8302_v7 = vadd.f32 %v3307_v45, %v7504_v17  ;;  %v4901_v63 = vpop.f32.mrf.mxu0 }
 0x41b   : > { %v4499_v31 = vadd.f32 %v4361_v33, %v3965_v25  ;;  %6162 = vmatmul.msk.f32.gmra.mxu0 %vm220_vm1, %v8313_v47 }
 0x41c   : > { %5967 = vmatmul.msk.f32.gmra.mxu1 %vm220_vm1, %v8242_v19 }
 0x41d   : > { %v5033_v34 = vadd.f32 %v4895_v12, %v4499_v31  ;;  %6029 = vmatmul.msk.f32.gmra.mxu2 %vm220_vm1, %v3512_v54  ;;  %v3516_v54 = vld [vmem:[#allocation2 + $0x240] sm:$0xff] }
 0x41e   : > { %6095 = vmatmul.msk.f32.gmra.mxu3 %vm220_vm1, %v4046_v59 }
 0x41f   : > { %v6309_v17 = vpack.i.bf16 %v5033_v34, %v8196_v40  ;;  %v4047_v40 = vld [vmem:[#allocation2 + $0x221] sm:$0xff] }
 0x420   : > { %v3830_v24 = vpop.f32.mrf.mxu2 }
 0x421   : > { %v3966_v41 = vadd.f32 %v3830_v24, %v3431_v62  ;;  %6310 = vxpose.xlu1.b32.cont [4/8] (short) (narrow) %v6309_v17, 8  ;;  %v3310_v14 = vpop.f32.mrf.mxu1  ;;  %v4364_v29 = vpop.f32.mrf.mxu3  ;;  %v3517_v24 = vld [vmem:[#allocation2 + $0x248] sm:$0xff] }
 0x422   : > { %v8316_v19 = vadd.f32 %v3310_v14, %v7517_v39  ;;  %v4904_v35 = vpop.f32.mrf.mxu0 }
 0x423   : > { %v4500_v28 = vadd.f32 %v4364_v29, %v3966_v41  ;;  %6163 = vmatmul.msk.f32.gmra.mxu0 %vm220_vm1, %v8327_v16  ;;  %v8384_v29 = vld [vmem:[#allocation2 + $0x252] sm:$0xff] }
 0x424   : > { %5968 = vmatmul.msk.f32.gmra.mxu1 %vm220_vm1, %v8257_v58 }
 0x425   : > { %v5034_v5 = vadd.f32 %v4898_v37, %v4500_v28  ;;  %6030 = vmatmul.msk.f32.gmra.mxu2 %vm220_vm1, %v3513_v9  ;;  %v8358_v37 = vld [vmem:[#allocation2 + $0x242] sm:$0xff] }
 0x426   : > { %6096 = vmatmul.msk.f32.gmra.mxu3 %vm220_vm1, %v4047_v40 }
 0x427   : > { %v6311_v39 = vpack.i.bf16 %v5034_v5, %v8209_v46  ;;  %v5433_v46 = vld [vmem:[%s8821_s2 + $0x68] sm:$0xff] }
 0x428   : > { %v3833_v10 = vpop.f32.mrf.mxu2  ;;  %5438 = vmatpush.msrb.mxu1 %v5433_v46 }
 0x429   : > { %v3967_v36 = vadd.f32 %v3833_v10, %v3432_v49  ;;  %6312 = vxpose.xlu1.b32.cont [5/8] (short) (narrow) %v6311_v39, 8  ;;  %v3313_v56 = vpop.f32.mrf.mxu1  ;;  %v4367_v32 = vpop.f32.mrf.mxu3  ;;  %v3518_v49 = vld [vmem:[#allocation2 + $0x250] sm:$0xff]  ;;  %v5432_v39 = vld [vmem:[%s8821_s2 + $0x60] sm:$0xff] }
 0x42a   : > { %v8330_v58 = vadd.f32 %v3313_v56, %v7530_v57  ;;  %v3433_v57 = vadd.f32 %v8272_v8, %v7482_v60  ;;  %v4907_v44 = vpop.f32.mrf.mxu0  ;;  %5439 = vmatpush.msrb.mxu1 %v5432_v39 }
 0x42b   : > { %v4501_v52 = vadd.f32 %v4367_v32, %v3967_v36  ;;  %6164 = vmatmul.msk.f32.gmra.mxu0 %vm220_vm1, %v8344_v38 }
 0x42c   : > { %5969 = vmatmul.msk.f32.gmra.mxu1 %vm220_vm1, %v8270_v48 }
 0x42d   : > { %v5035_v13 = vadd.f32 %v4901_v63, %v4501_v52  ;;  %6031 = vmatmul.msk.f32.gmra.mxu2 %vm220_vm1, %v3514_v43  ;;  %v8822_v43 = vld [vmem:[#allocation13_spill] sm:$0xff] }
 0x42e   : > { %6097 = vmatmul.msk.f32.gmra.mxu3 %vm220_vm1, %v4048_v1 }
 0x42f   : > { %v6313_v12 = vpack.i.bf16 %v5035_v13, %v8225_v22  ;;  %v4049_v22 = vld [vmem:[#allocation2 + $0x231] sm:$0xff]  ;;  %v4053_v13 = vld [vmem:[#allocation2 + $0x259] sm:$0xff] }
 0x430   : > { %v3836_v42 = vpop.f32.mrf.mxu2 }
 0x431   : > { %v3968_v51 = vadd.f32 %v3836_v42, %v3433_v57  ;;  %6314 = vxpose.xlu1.b32.cont [6/8] (short) (narrow) %v6313_v12, 8  ;;  %v3316_v11 = vpop.f32.mrf.mxu1  ;;  %v4370_v27 = vpop.f32.mrf.mxu3  ;;  %v8415_v12 = vld [vmem:[#allocation2 + $0x262] sm:$0xff] }
 0x432   : > { %v8347_v48 = vadd.f32 %v3316_v11, %v7545_v53  ;;  %v4910_v23 = vpop.f32.mrf.mxu0 }
 0x433   : > { %v4502_v60 = vadd.f32 %v4370_v27, %v3968_v51  ;;  %6165 = vmatmul.msk.f32.gmra.mxu0 %vm220_vm1, %v8358_v37  ;;  %v3520_v27 = vld [vmem:[#allocation2 + $0x260] sm:$0xff] }
 0x434   : > { %5970 = vmatmul.msk.f32.gmra.mxu1 %vm220_vm1, %v8286_v4 }
 0x435   : > { %v5036_v8 = vadd.f32 %v4904_v35, %v4502_v60  ;;  %6032 = vmatmul.msk.f32.gmra.mxu2 %vm220_vm1, %v3515_v18  ;;  %v4052_v35 = vld [vmem:[#allocation2 + $0x251] sm:$0xff]  ;;  %v4054_v18 = vld [vmem:[#allocation2 + $0x261] sm:$0xff] }
 0x436   : > { %6098 = vmatmul.msk.f32.gmra.mxu3 %vm220_vm1, %v4049_v22 }
 0x437   : > { %v6315_v53 = vpack.i.bf16 %v5036_v8, %v8238_v21  ;;  %v4050_v21 = vld [vmem:[#allocation2 + $0x241] sm:$0xff] }
 0x438   : > { %v3839_v55 = vpop.f32.mrf.mxu2 }
 0x439   : > { %v3969_v25 = vadd.f32 %v3839_v55, %v3434_v26  ;;  %6316 = vxpose.xlu1.b32.cont [7/8] (short) (narrow) %v6315_v53, 8  ;;  %v3319_v45 = vpop.f32.mrf.mxu1  ;;  %v4373_v33 = vpop.f32.mrf.mxu3  ;;  %v3521_v55 = vld [vmem:[#allocation2 + $0x268] sm:$0xff] }
 0x43a   : > { %v8361_v4 = vadd.f32 %v3319_v45, %v7561_v3  ;;  %v4913_v59 = vpop.f32.mrf.mxu0  ;;  %v8370_v3 = vld [vmem:[#allocation2 + $0x24a] sm:$0xff] }
 0x43b   : > { %v4503_v2 = vadd.f32 %v4373_v33, %v3969_v25  ;;  %6166 = vmatmul.msk.f32.gmra.mxu0 %vm220_vm1, %v8370_v3  ;;  %v4055_v25 = vld [vmem:[#allocation2 + $0x269] sm:$0xff] }
 0x43c   : > { %5971 = vmatmul.msk.f32.gmra.mxu1 %vm220_vm1, %v8299_v50 }
 0x43d   : > { %v5037_v15 = vadd.f32 %v4907_v44, %v4503_v2  ;;  %6033 = vmatmul.msk.f32.gmra.mxu2 %vm220_vm1, %v3516_v54 }
 0x43e   : > { %6099 = vmatmul.msk.f32.gmra.mxu3 %vm220_vm1, %v4050_v21 }
 0x43f   : > { %v6317_v31 = vpack.i.bf16 %v5037_v15, %v8251_v20  ;;  %v4051_v20 = vld [vmem:[#allocation2 + $0x249] sm:$0xff] }
 0x440   : > { %v3842_v34 = vpop.f32.mrf.mxu2 }
 0x441   : > { %v3970_v62 = vadd.f32 %v3842_v34, %v8302_v7  ;;  %6318 = vxpose.xlu1.b32.end [8/8] (short) (narrow) %v6317_v31, 8  ;;  %v3322_v17 = vpop.f32.mrf.mxu1  ;;  %v4376_v50 = vpop.f32.mrf.mxu3  ;;  %v3522_v31 = vld [vmem:[#allocation2 + $0x270] sm:$0xff] }
 0x442   : > { %v8374_v63 = vadd.f32 %v3322_v17, %v7577_v0  ;;  %v4916_v7 = vpop.f32.mrf.mxu0  ;;  %v4056_v34 = vld [vmem:[#allocation2 + $0x271] sm:$0xff] }
 0x443   : > { %v4504_v41 = vadd.f32 %v4376_v50, %v3970_v62  ;;  %6167 = vmatmul.msk.f32.gmra.mxu0 %vm220_vm1, %v8384_v29 }
 0x444   : > { %5972 = vmatmul.msk.f32.gmra.mxu1 %vm220_vm1, %v8313_v47 }
 0x445   : > { %v8380_v14 = vadd.f32 %v4910_v23, %v4504_v41  ;;  %6034 = vmatmul.msk.f32.gmra.mxu2 %vm220_vm1, %v3517_v24 }
 0x446   : > { %6100 = vmatmul.msk.f32.gmra.mxu3 %vm220_vm1, %v4051_v20 }
 0x448   : > { %v3845_v0 = vpop.f32.mrf.mxu2 }
 0x449   : > { %v3971_v9 = vadd.f32 %v3845_v0, %v8316_v19  ;;  %v3325_v28 = vpop.f32.mrf.mxu1  ;;  %v4379_v5 = vpop.f32.mrf.mxu3  ;;  %v8401_v19 = vld [vmem:[#allocation2 + $0x25a] sm:$0xff] }
 0x44a   : > { %v8388_v40 = vadd.f32 %v3325_v28, %v7593_v30  ;;  %v4919_v30 = vpop.f32.mrf.mxu0  ;;  %v4057_v0 = vld [vmem:[#allocation2 + $0x279] sm:$0xff] }
 0x44b   : > { %v4505_v47 = vadd.f32 %v4379_v5, %v3971_v9  ;;  %6168 = vmatmul.msk.f32.gmra.mxu0 %vm220_vm1, %v8401_v19 }
 0x44c   : > { %5973 = vmatmul.msk.f32.gmra.mxu1 %vm220_vm1, %v8327_v16  ;;  %v3519_v16 = vld [vmem:[#allocation2 + $0x258] sm:$0xff] }
 0x44d   : > { %v8397_v10 = vadd.f32 %v4913_v59, %v4505_v47  ;;  %6035 = vmatmul.msk.f32.gmra.mxu2 %vm220_vm1, %v3518_v49 }
 0x44e   : > { %6101 = vmatmul.msk.f32.gmra.mxu3 %vm220_vm1, %v4052_v35  ;;  %v3524_v35 = vld [vmem:[#allocation2 + $0x288] sm:$0xff] }
 0x450   : > { %v3848_v36 = vpop.f32.mrf.mxu2 }
 0x451   : > { %v3972_v56 = vadd.f32 %v3848_v36, %v8330_v58  ;;  %v3328_v32 = vpop.f32.mrf.mxu1  ;;  %v4382_v46 = vpop.f32.mrf.mxu3 }
 0x452   : > { %v8405_v52 = vadd.f32 %v3328_v32, %v8822_v43  ;;  %v4922_v58 = vpop.f32.mrf.mxu0 }
 0x453   : > { %v4506_v1 = vadd.f32 %v4382_v46, %v3972_v56  ;;  %6169 = vmatmul.msk.f32.gmra.mxu0 %vm220_vm1, %v8415_v12  ;;  %v8823_v56 = vld [vmem:[#allocation15_spill] sm:$0xff] }
 0x454   : > { %5974 = vmatmul.msk.f32.gmra.mxu1 %vm220_vm1, %v8344_v38 }
 0x455   : > { %v8411_v57 = vadd.f32 %v4916_v7, %v4506_v1  ;;  %6036 = vmatmul.msk.f32.gmra.mxu2 %vm220_vm1, %v3519_v16  ;;  %v3523_v7 = vld [vmem:[#allocation2 + $0x278] sm:$0xff] }
 0x456   : > { %6102 = vmatmul.msk.f32.gmra.mxu3 %vm220_vm1, %v4053_v13 }
 0x458   : > { %v3851_v44 = vpop.f32.mrf.mxu2 }
 0x459   : > { %v3973_v42 = vadd.f32 %v3851_v44, %v8347_v48  ;;  %v8418_v51 = vpop.f32.mrf.mxu1  ;;  %v4385_v11 = vpop.f32.mrf.mxu3  ;;  %v8428_v48 = vld [vmem:[#allocation2 + $0x26a] sm:$0xff] }
 0x45a   : > { %v4925_v22 = vpop.f32.mrf.mxu0  ;;  %v3443_v32 = vadd.f32 %v8418_v51, %v8823_v56  ;;  %v4059_v44 = vld [vmem:[#allocation2 + $0x291] sm:$0xff]  ;;  %v8824_v51 = vld [vmem:[#allocation17_spill] sm:$0xff] }
 0x45b   : > { %v4507_v38 = vadd.f32 %v4385_v11, %v3973_v42  ;;  %6170 = vmatmul.msk.f32.gmra.mxu0 %vm220_vm1, %v8428_v48 }
 0x45c   : > { %5975 = vmatmul.msk.f32.gmra.mxu1 %vm220_vm1, %v8358_v37 }
 0x45d   : > { %v8424_v60 = vadd.f32 %v4919_v30, %v4507_v38  ;;  %6037 = vmatmul.msk.f32.gmra.mxu2 %vm220_vm1, %v3520_v27 }
 0x45e   : > { %6103 = vmatmul.msk.f32.gmra.mxu3 %vm220_vm1, %v4054_v18  ;;  %v4594_v18 = vld [vmem:[#allocation2 + $0x29a] sm:$0xff] }
 0x460   : > { %v3854_v8 = vpop.f32.mrf.mxu2 }
 0x461   : > { %v3974_v26 = vadd.f32 %v3854_v8, %v8361_v4  ;;  %v8431_v53 = vpop.f32.mrf.mxu1  ;;  %v4388_v23 = vpop.f32.mrf.mxu3  ;;  %v8441_v4 = vld [vmem:[#allocation2 + $0x272] sm:$0xff] }
 0x462   : > { %v4928_v33 = vpop.f32.mrf.mxu0  ;;  %v3444_v11 = vadd.f32 %v8431_v53, %v8824_v51  ;;  %v5430_v53 = vld [vmem:[%s8821_s2 + $0x50] sm:$0xff] }
 0x463   : > { %v4508_v37 = vadd.f32 %v4388_v23, %v3974_v26  ;;  %6171 = vmatmul.msk.f32.gmra.mxu0 %vm220_vm1, %v8441_v4  ;;  %v4063_v51 = vld [vmem:[#allocation2 + $0x2b1] sm:$0xff] }
 0x464   : > { %5976 = vmatmul.msk.f32.gmra.mxu1 %vm220_vm1, %v8370_v3  ;;  %v5431_v3 = vld [vmem:[%s8821_s2 + $0x58] sm:$0xff] }
 0x465   : > { %v8437_v45 = vadd.f32 %v4922_v58, %v4508_v37  ;;  %6038 = vmatmul.msk.f32.gmra.mxu2 %vm220_vm1, %v3521_v55  ;;  %5440 = vmatpush.msrb.mxu1 %v5431_v3  ;;  %v3525_v58 = vld [vmem:[#allocation2 + $0x290] sm:$0xff] }
 0x466   : > { %6104 = vmatmul.msk.f32.gmra.mxu3 %vm220_vm1, %v4055_v25  ;;  %v8825_v25 = vld [vmem:[#allocation19_spill] sm:$0xff] }
 0x467   : > { %5441 = vmatpush.msrb.mxu1 %v5430_v53 }
 0x468   : > { %v3857_v54 = vpop.f32.mrf.mxu2 }
 0x469   : > { %v3975_v2 = vadd.f32 %v3857_v54, %v8374_v63  ;;  %v8444_v21 = vpop.f32.mrf.mxu1  ;;  %v4391_v15 = vpop.f32.mrf.mxu3  ;;  %v8457_v63 = vld [vmem:[#allocation2 + $0x27a] sm:$0xff] }
 0x46a   : > { %v4931_v17 = vpop.f32.mrf.mxu0 }
 0x46b   : > { %v4509_v59 = vadd.f32 %v4391_v15, %v3975_v2  ;;  %6172 = vmatmul.msk.f32.gmra.mxu0 %vm220_vm1, %v8457_v63  ;;  %v4595_v15 = vld [vmem:[#allocation2 + $0x2a2] sm:$0xff] }
 0x46c   : > { %5977 = vmatmul.msk.f32.gmra.mxu1 %vm220_vm1, %v8384_v29 }
 0x46d   : > { %v8453_v62 = vadd.f32 %v4925_v22, %v4509_v59  ;;  %6039 = vmatmul.msk.f32.gmra.mxu2 %vm220_vm1, %v3522_v31 }
 0x46e   : > { %6105 = vmatmul.msk.f32.gmra.mxu3 %vm220_vm1, %v4056_v34  ;;  %v3527_v34 = vld [vmem:[#allocation2 + $0x2a0] sm:$0xff] }
 0x470   : > { %v3860_v50 = vpop.f32.mrf.mxu2 }
 0x471   : > { %v3976_v24 = vadd.f32 %v3860_v50, %v8388_v40  ;;  %v8460_v41 = vpop.f32.mrf.mxu1  ;;  %v4394_v20 = vpop.f32.mrf.mxu3  ;;  %v4592_v40 = vld [vmem:[#allocation2 + $0x28a] sm:$0xff] }
 0x472   : > { %v4934_v28 = vpop.f32.mrf.mxu0 }
 0x473   : > { %v4510_v29 = vadd.f32 %v4394_v20, %v3976_v24  ;;  %6173 = vmatmul.msk.f32.gmra.mxu0 %vm220_vm1, %v4592_v40 }
 0x474   : > { %5978 = vmatmul.msk.f32.gmra.mxu1 %vm220_vm1, %v8401_v19  ;;  %v4058_v19 = vld [vmem:[#allocation2 + $0x289] sm:$0xff] }
 0x475   : > { %v8466_v9 = vadd.f32 %v4928_v33, %v4510_v29  ;;  %6040 = vmatmul.msk.f32.gmra.mxu2 %vm220_vm1, %v3523_v7  ;;  %v3445_v33 = vadd.f32 %v8444_v21, %v8825_v25  ;;  %v4061_v21 = vld [vmem:[#allocation2 + $0x2a1] sm:$0xff]  ;;  %v4596_v29 = vld [vmem:[#allocation2 + $0x2aa] sm:$0xff]  ;;  %v4064_v25 = vld [vmem:[#allocation2 + $0x2b9] sm:$0xff] }
 0x476   : > { %6106 = vmatmul.msk.f32.gmra.mxu3 %vm220_vm1, %v4057_v0 }
 0x478   : > { %v3863_v5 = vpop.f32.mrf.mxu2 }
 0x479   : > { %v3977_v49 = vadd.f32 %v3863_v5, %v8405_v52  ;;  %v8471_v47 = vpop.f32.mrf.mxu1  ;;  %v4397_v39 = vpop.f32.mrf.mxu3  ;;  %v4593_v52 = vld [vmem:[#allocation2 + $0x292] sm:$0xff] }
 0x47a   : > { %v4937_v43 = vpop.f32.mrf.mxu0  ;;  %v8827_v5 = vld [vmem:[#allocation31_spill] sm:$0xff] }
 0x47b   : > { %v4511_v30 = vadd.f32 %v4397_v39, %v3977_v49  ;;  %6174 = vmatmul.msk.f32.gmra.mxu0 %vm220_vm1, %v4593_v52  ;;  %v3528_v39 = vld [vmem:[#allocation2 + $0x2a8] sm:$0xff] }
 0x47c   : > { %5979 = vmatmul.msk.f32.gmra.mxu1 %vm220_vm1, %v8415_v12 }
 0x47d   : > { %v8476_v36 = vadd.f32 %v4931_v17, %v4511_v30  ;;  %6041 = vmatmul.msk.f32.gmra.mxu2 %vm220_vm1, %v3524_v35  ;;  %v4062_v30 = vld [vmem:[#allocation2 + $0x2a9] sm:$0xff] }
 0x47e   : > { %6107 = vmatmul.msk.f32.gmra.mxu3 %vm220_vm1, %v4058_v19  ;;  %v8828_v19 = vld [vmem:[#allocation23_spill] sm:$0xff] }
 0x480   : > { %v3866_v46 = vpop.f32.mrf.mxu2 }
 0x481   : > { %v3978_v16 = vadd.f32 %v3866_v46, %v3443_v32  ;;  %v8482_v1 = vpop.f32.mrf.mxu1  ;;  %v4400_v13 = vpop.f32.mrf.mxu3 }
 0x482   : > { %v4940_v38 = vpop.f32.mrf.mxu0 }
 0x483   : > { %v4512_v12 = vadd.f32 %v4400_v13, %v3978_v16  ;;  %6175 = vmatmul.msk.f32.gmra.mxu0 %vm220_vm1, %v4594_v18  ;;  %v8829_v13 = vld [vmem:[#allocation33_spill] sm:$0xff] }
 0x484   : > { %5980 = vmatmul.msk.f32.gmra.mxu1 %vm220_vm1, %v8428_v48  ;;  %v3526_v48 = vld [vmem:[#allocation2 + $0x298] sm:$0xff] }
 0x485   : > { %v5046_v42 = vadd.f32 %v4934_v28, %v4512_v12  ;;  %6042 = vmatmul.msk.f32.gmra.mxu2 %vm220_vm1, %v3525_v58  ;;  %v4598_v18 = vld [vmem:[#allocation2 + $0x2ba] sm:$0xff] }
 0x486   : > { %6108 = vmatmul.msk.f32.gmra.mxu3 %vm220_vm1, %v4059_v44  ;;  %v3529_v44 = vld [vmem:[#allocation2 + $0x2b0] sm:$0xff] }
 0x487   : > { %v6324_v27 = vpack.i.bf16 %v5046_v42, %v8380_v14  ;;  %v4060_v14 = vld [vmem:[#allocation2 + $0x299] sm:$0xff] }
 0x488   : > { %v3869_v22 = vpop.f32.mrf.mxu2 }
 0x489   : > { %v3979_v8 = vadd.f32 %v3869_v22, %v3444_v11  ;;  %6325 = vxpose.xlu2.b32.start [1/8] (short) (narrow) %v6324_v27, 8  ;;  %v8492_v26 = vpop.f32.mrf.mxu1  ;;  %v4403_v23 = vpop.f32.mrf.mxu3  ;;  %v8830_v11 = vld [vmem:[#allocation25_spill] sm:$0xff] }
 0x48a   : > { %v4943_v2 = vpop.f32.mrf.mxu0 }
 0x48b   : > { %v4513_v55 = vadd.f32 %v4403_v23, %v3979_v8  ;;  %6176 = vmatmul.msk.f32.gmra.mxu0 %vm220_vm1, %v4595_v15 }
 0x48c   : > { %5981 = vmatmul.msk.f32.gmra.mxu1 %vm220_vm1, %v8441_v4 }
 0x48d   : > { %v5047_v37 = vadd.f32 %v4937_v43, %v4513_v55  ;;  %6043 = vmatmul.msk.f32.gmra.mxu2 %vm220_vm1, %v3526_v48  ;;  %v4597_v43 = vld [vmem:[#allocation2 + $0x2b2] sm:$0xff] }
 0x48e   : > { %6109 = vmatmul.msk.f32.gmra.mxu3 %vm220_vm1, %v4060_v14  ;;  %v8831_v48 = vld [vmem:[#allocation7_spill] sm:$0xff]  ;;  %v3530_v14 = vld [vmem:[#allocation2 + $0x2b8] sm:$0xff] }
 0x48f   : > { %v6326_v54 = vpack.i.bf16 %v5047_v37, %v8397_v10  ;;  %v8826_v10 = vld [vmem:[#allocation21_spill] sm:$0xff] }
 0x490   : > { %v3872_v31 = vpop.f32.mrf.mxu2  ;;  %v3446_v24 = vadd.f32 %v8460_v41, %v8826_v10  ;;  %v3531_v10 = vld [vmem:[#allocation2 + $0x2c0] sm:$0xff] }
 0x491   : > { %v3980_v59 = vadd.f32 %v3872_v31, %v3445_v33  ;;  %6327 = vxpose.xlu2.b32.cont [2/8] (short) (narrow) %v6326_v54, 8  ;;  %v8505_v3 = vpop.f32.mrf.mxu1  ;;  %v4406_v4 = vpop.f32.mrf.mxu3  ;;  %v8832_v33 = vld [vmem:[#allocation27_spill] sm:$0xff]  ;;  %v4599_v31 = vld [vmem:[#allocation2 + $0x2c2] sm:$0xff] }
 0x492   : > { %v4946_v7 = vpop.f32.mrf.mxu0  ;;  %v3449_v54 = vadd.f32 %v8492_v26, %v8832_v33  ;;  %v8834_v26 = vld [vmem:[#allocation29_spill] sm:$0xff] }
 0x493   : > { %v4514_v17 = vadd.f32 %v4406_v4, %v3980_v59  ;;  %6177 = vmatmul.msk.f32.gmra.mxu0 %vm220_vm1, %v4596_v29 }
 0x494   : > { %5982 = vmatmul.msk.f32.gmra.mxu1 %vm220_vm1, %v8457_v63 }
 0x495   : > { %v5048_v50 = vadd.f32 %v4940_v38, %v4514_v17  ;;  %6044 = vmatmul.msk.f32.gmra.mxu2 %vm220_vm1, %v3527_v34  ;;  %v8833_v17 = vld [vmem:[#allocation8_spill] sm:$0xff] }
 0x496   : > { %6110 = vmatmul.msk.f32.gmra.mxu3 %vm220_vm1, %v4061_v21 }
 0x497   : > { %v6328_v20 = vpack.i.bf16 %v5048_v50, %v8411_v57  ;;  %v3447_v57 = vadd.f32 %v8471_v47, %v8828_v19 }
 0x498   : > { %v3875_v0 = vpop.f32.mrf.mxu2 }
 0x499   : > { %v3981_v28 = vadd.f32 %v3875_v0, %v3446_v24  ;;  %6329 = vxpose.xlu2.b32.cont [3/8] (short) (narrow) %v6328_v20, 8  ;;  %v3355_v40 = vpop.f32.mrf.mxu1  ;;  %v4409_v63 = vpop.f32.mrf.mxu3  ;;  %v4065_v20 = vld [vmem:[#allocation2 + $0x2c1] sm:$0xff] }
 0x49a   : > { %v8516_v49 = vadd.f32 %v3355_v40, %v8827_v5  ;;  %v4949_v32 = vpop.f32.mrf.mxu0 }
 0x49b   : > { %v4515_v35 = vadd.f32 %v4409_v63, %v3981_v28  ;;  %6178 = vmatmul.msk.f32.gmra.mxu0 %vm220_vm1, %v4597_v43  ;;  %v8835_v63 = vld [vmem:[#allocation9_spill] sm:$0xff]  ;;  %v8836_v43 = vld [vmem:[#allocation10_spill] sm:$0xff] }
 0x49d   : > { %v5049_v41 = vadd.f32 %v4943_v2, %v4515_v35  ;;  %6045 = vmatmul.msk.f32.gmra.mxu2 %vm220_vm1, %v3528_v39 }
 0x49e   : > { %6111 = vmatmul.msk.f32.gmra.mxu3 %vm220_vm1, %v4062_v30 }
 0x49f   : > { %v6330_v56 = vpack.i.bf16 %v5049_v41, %v8424_v60  ;;  %v3448_v60 = vadd.f32 %v8482_v1, %v8830_v11  ;;  %v5429_v1 = vld [vmem:[%s8821_s2 + $0x48] sm:$0xff] }
 0x4a0   : > { %v3878_v52 = vpop.f32.mrf.mxu2  ;;  %5442 = vmatpush.msrb.mxu1 %v5429_v1 }
 0x4a1   : > { %v3982_v46 = vadd.f32 %v3878_v52, %v3447_v57  ;;  %6331 = vxpose.xlu2.b32.cont [4/8] (short) (narrow) %v6330_v56, 8  ;;  %v3358_v16 = vpop.f32.mrf.mxu1  ;;  %v4412_v12 = vpop.f32.mrf.mxu3 }
 0x4a2   : > { %v8525_v58 = vadd.f32 %v3358_v16, %v8829_v13  ;;  %v4952_v38 = vpop.f32.mrf.mxu0 }
 0x4a3   : > { %v4516_v42 = vadd.f32 %v4412_v12, %v3982_v46  ;;  %6179 = vmatmul.msk.f32.gmra.mxu0 %vm220_vm1, %v4598_v18 }
 0x4a5   : > { %v5050_v47 = vadd.f32 %v4946_v7, %v4516_v42  ;;  %6046 = vmatmul.msk.f32.gmra.mxu2 %vm220_vm1, %v3529_v44 }
 0x4a6   : > { %6112 = vmatmul.msk.f32.gmra.mxu3 %vm220_vm1, %v4063_v51  ;;  %v8837_v51 = vld [vmem:[#allocation11_spill] sm:$0xff] }
 0x4a7   : > { %v6332_v27 = vpack.i.bf16 %v5050_v47, %v8437_v45 }
 0x4a8   : > { %v3881_v22 = vpop.f32.mrf.mxu2 }
 0x4a9   : > { %v3983_v8 = vadd.f32 %v3881_v22, %v3448_v60  ;;  %6333 = vxpose.xlu2.b32.cont [5/8] (short) (narrow) %v6332_v27, 8  ;;  %v3361_v23 = vpop.f32.mrf.mxu1  ;;  %v4415_v53 = vpop.f32.mrf.mxu3 }
 0x4aa   : > { %v3453_v55 = vadd.f32 %v3361_v23, %v8831_v48  ;;  %v4955_v15 = vpop.f32.mrf.mxu0 }
 0x4ab   : > { %v4517_v37 = vadd.f32 %v4415_v53, %v3983_v8  ;;  %6180 = vmatmul.msk.f32.gmra.mxu0 %vm220_vm1, %v4599_v31  ;;  %v8838_v8 = vld [vmem:[#allocation12_spill] sm:$0xff] }
 0x4ad   : > { %v5051_v45 = vadd.f32 %v4949_v32, %v4517_v37  ;;  %6047 = vmatmul.msk.f32.gmra.mxu2 %vm220_vm1, %v3530_v14 }
 0x4ae   : > { %6113 = vmatmul.msk.f32.gmra.mxu3 %vm220_vm1, %v4064_v25 }
 0x4af   : > { %v6334_v2 = vpack.i.bf16 %v5051_v45, %v8453_v62  ;;  %v3450_v62 = vadd.f32 %v8505_v3, %v8834_v26 }
 0x4b0   : > { %v3884_v59 = vpop.f32.mrf.mxu2 }
 0x4b1   : > { %v3984_v4 = vadd.f32 %v3884_v59, %v3449_v54  ;;  %6335 = vxpose.xlu2.b32.cont [6/8] (short) (narrow) %v6334_v2, 8  ;;  %v3364_v34 = vpop.f32.mrf.mxu1  ;;  %v4418_v50 = vpop.f32.mrf.mxu3 }
 0x4b2   : > { %v3454_v21 = vadd.f32 %v3364_v34, %v8833_v17  ;;  %v4958_v0 = vpop.f32.mrf.mxu0 }
 0x4b3   : > { %v4518_v24 = vadd.f32 %v4418_v50, %v3984_v4 }
 0x4b5   : > { %v5052_v7 = vadd.f32 %v4952_v38, %v4518_v24  ;;  %6048 = vmatmul.msk.f32.gmra.mxu2 %vm220_vm1, %v3531_v10 }
 0x4b6   : > { %6114 = vmatmul.msk.f32.gmra.mxu3 %vm220_vm1, %v4065_v20 }
 0x4b7   : > { %v6336_v29 = vpack.i.bf16 %v5052_v7, %v8466_v9 }
 0x4b8   : > { %v3887_v28 = vpop.f32.mrf.mxu2 }
 0x4b9   : > { %v3985_v40 = vadd.f32 %v3887_v28, %v3450_v62  ;;  %6337 = vxpose.xlu2.b32.cont [7/8] (short) (narrow) %v6336_v29, 8  ;;  %v3367_v5 = vpop.f32.mrf.mxu1  ;;  %v4421_v35 = vpop.f32.mrf.mxu3 }
 0x4ba   : > { %v3455_v39 = vadd.f32 %v3367_v5, %v8835_v63  ;;  %v4961_v57 = vpop.f32.mrf.mxu0  ;;  %v6298_v28 = vpop.trf.xlu0 }
 0x4bb   : > { %v4519_v30 = vadd.f32 %v4421_v35, %v3985_v40  ;;  %v8575_v40 = vunpack.i.h.bf16 %v6298_v28  ;;  %v6299_v5 = vunpack.i.l.bf16 %v6298_v28 }
 0x4bd   : > { %v5053_v41 = vadd.f32 %v4955_v15, %v4519_v30  ;;  %v5344_v30 = vperm.slane %v8575_v40, 0 }
 0x4bf   : > { %v6338_v19 = vpack.i.bf16 %v5053_v41, %v8476_v36  ;;  %v5342_v41 = vperm.slane %v6299_v5, 0 }
 0x4c0   : > { %v3890_v56 = vpop.f32.mrf.mxu2 }
 0x4c1   : > { %v3986_v3 = vadd.f32 %v3890_v56, %v8516_v49  ;;  %6339 = vxpose.xlu2.b32.end [8/8] (short) (narrow) %v6338_v19, 8  ;;  %v3370_v32 = vpop.f32.mrf.mxu1  ;;  %v4424_v52 = vpop.f32.mrf.mxu3  ;;  %v5428_v49 = vld [vmem:[%s8821_s2 + $0x40] sm:$0xff] }
 0x4c2   : > { %v3456_v9 = vadd.f32 %v3370_v32, %v8836_v43  ;;  %v4964_v13 = vpop.f32.mrf.mxu0  ;;  %5443 = vmatpush.msrb.mxu1 %v5428_v49  ;;  %v6319_v19 = vpop.trf.xlu1  ;;  %v5381_v43 = vperm.slane %v6299_v5, 1 }
 0x4c3   : > { %v4520_v46 = vadd.f32 %v4424_v52, %v3986_v3  ;;  %v5335_v3 = vrot.slane %v8575_v40, 2 }
 0x4c5   : > { %v8554_v16 = vadd.f32 %v4958_v0, %v4520_v46  ;;  %v8581_v46 = vunpack.i.h.bf16 %v6319_v19 }
 0x4c8   : > { %v3893_v12 = vpop.f32.mrf.mxu2 }
 0x4c9   : > { %v3987_v44 = vadd.f32 %v3893_v12, %v8525_v58  ;;  %v3373_v42 = vpop.f32.mrf.mxu1  ;;  %v4427_v36 = vpop.f32.mrf.mxu3 }
 0x4ca   : > { %v3457_v47 = vadd.f32 %v3373_v42, %v8837_v51  ;;  %v4967_v27 = vpop.f32.mrf.mxu0  ;;  %v5383_v51 = vperm.slane %v8575_v40, 1  ;;  %v5420_v40 = vld [vmem:[%s8821_s2] sm:$0xff] }
 0x4cb   : > { %v4521_v11 = vadd.f32 %v4427_v36, %v3987_v44  ;;  %v8584_v44 = vunpack.i.l.bf16 %v6319_v19  ;;  %v5384_v36 = vperm.slane %v5335_v3, 1 }
 0x4cd   : > { %v8561_v60 = vadd.f32 %v4961_v57, %v4521_v11  ;;  %v5336_v49 = vrot.slane %v8584_v44, 2 }
 0x4d0   : > { %v3896_v38 = vpop.f32.mrf.mxu2 }
 0x4d1   : > { %v3988_v18 = vadd.f32 %v3896_v38, %v3453_v55  ;;  %v3376_v22 = vpop.f32.mrf.mxu1  ;;  %v4430_v48 = vpop.f32.mrf.mxu3 }
 0x4d2   : > { %v3458_v23 = vadd.f32 %v3376_v22, %v8838_v8  ;;  %v4970_v14 = vpop.f32.mrf.mxu0  ;;  %v5386_v22 = vperm.slane %v5336_v49, 1  ;;  %v8839_v8 = vld [vmem:[#allocation14_spill] sm:$0xff] }
 0x4d3   : > { %v4522_v58 = vadd.f32 %v4430_v48, %v3988_v18  ;;  %v5385_v18 = vperm.slane %v8584_v44, 1 }
 0x4d5   : > { %v8564_v53 = vadd.f32 %v4964_v13, %v4522_v58  ;;  %v5387_v58 = vperm.slane %v8581_v46, 1 }
 0x4d8   : > { %v3899_v37 = vpop.f32.mrf.mxu2 }
 0x4d9   : > { %v3989_v1 = vadd.f32 %v3899_v37, %v3454_v21  ;;  %v4433_v25 = vpop.f32.mrf.mxu3  ;;  %v5427_v21 = vld [vmem:[%s8821_s2 + $0x38] sm:$0xff]  ;;  %v3379_v20 = vpop.f32.mrf.mxu1 }
 0x4da   : > { %v4973_v54 = vpop.f32.mrf.mxu0  ;;  %5444 = vmatpush.msrb.mxu1 %v5427_v21 }
 0x4db   : > { %v4523_v45 = vadd.f32 %v4433_v25, %v3989_v1 }
 0x4dd   : > { %v8566_v33 = vadd.f32 %v4967_v27, %v4523_v45  ;;  %v5337_v27 = vrot.slane %v8581_v46, 2 }
 0x4df   : > { %v5388_v1 = vperm.slane %v5337_v27, 1 }
 0x4e0   : > { %v3902_v2 = vpop.f32.mrf.mxu2 }
 0x4e1   : > { %v3990_v15 = vadd.f32 %v3902_v2, %v3455_v39  ;;  %v4436_v31 = vpop.f32.mrf.mxu3  ;;  %v5334_v39 = vrot.slane %v6299_v5, 2  ;;  %v3382_v57 = vpop.f32.mrf.mxu1 }
 0x4e2   : > { %v4976_v4 = vpop.f32.mrf.mxu0 }
 0x4e3   : > { %v4524_v59 = vadd.f32 %v4436_v31, %v3990_v15  ;;  %v5343_v32 = vperm.slane %v5334_v39, 0 }
 0x4e5   : > { %v8568_v55 = vadd.f32 %v4970_v14, %v4524_v59  ;;  %v5359_v12 = vsel %vm5358_vm4, %v5343_v32, %v5342_v41 }
 0x4e8   : > { %v3905_v34 = vpop.f32.mrf.mxu2 }
 0x4e9   : > { %v3991_v17 = vadd.f32 %v3905_v34, %v3456_v9  ;;  %v4439_v50 = vpop.f32.mrf.mxu3  ;;  %v5382_v9 = vperm.slane %v5334_v39, 1  ;;  %v3385_v2 = vpop.f32.mrf.mxu1 }
 0x4ea   : > { %v4979_v7 = vpop.f32.mrf.mxu0  ;;  %v3461_v39 = vadd.f32 %v3385_v2, %v7850_v6 }
 0x4eb   : > { %v4525_v10 = vadd.f32 %v4439_v50, %v3991_v17  ;;  %v5397_v11 = vsel %vm5358_vm4, %v5382_v9, %v5381_v43  ;;  %v8840_v50 = vld [vmem:[#allocation16_spill] sm:$0xff] }
 0x4ec   : > { %v5398_v14 = vsel %vm5360_vm5, %v5383_v51, %v5397_v11 }
 0x4ed   : > { %v8573_v24 = vadd.f32 %v4973_v54, %v4525_v10  ;;  %v5399_v25 = vsel %vm5362_vm6, %v5384_v36, %v5398_v14  ;;  %v3460_v10 = vadd.f32 %v3382_v57, %v8840_v50  ;;  %v5422_v14 = vld [vmem:[%s8821_s2 + $0x10] sm:$0xff] }
 0x4ee   : > { %v5400_v54 = vsel %vm5364_vm7, %v5385_v18, %v5399_v25 }
 0x4ef   : > { %v5401_v31 = vsel %vm5366_vm8, %v5386_v22, %v5400_v54  ;;  %v5421_v54 = vld [vmem:[%s8821_s2 + $0x8] sm:$0xff] }
 0x4f0   : > { %v3908_v26 = vpop.f32.mrf.mxu2 }
 0x4f1   : > { %v3992_v62 = vadd.f32 %v3908_v26, %v3457_v47  ;;  %v4442_v29 = vpop.f32.mrf.mxu3  ;;  %v8588_v47 = vsel %vm5360_vm5, %v5344_v30, %v5359_v12  ;;  %v3388_v28 = vpop.f32.mrf.mxu1 }
 0x4f2   : > { %v4982_v35 = vpop.f32.mrf.mxu0  ;;  %v3462_v43 = vadd.f32 %v3388_v28, %v7865_v61  ;;  %v5425_v61 = vld [vmem:[%s8821_s2 + $0x28] sm:$0xff] }
 0x4f3   : > { %v4526_v0 = vadd.f32 %v4442_v29, %v3992_v62 }
 0x4f5   : > { %v8577_v63 = vadd.f32 %v4976_v4, %v4526_v0  ;;  %v5402_v4 = vsel %vm5368_vm9, %v5387_v58, %v5401_v31  ;;  %v5426_v0 = vld [vmem:[%s8821_s2 + $0x30] sm:$0xff]  ;;  %v5423_v58 = vld [vmem:[%s8821_s2 + $0x18] sm:$0xff] }
 0x4f6   : > { %v5403_v34 = vsel %vm5370_vm10, %v5388_v1, %v5402_v4  ;;  %5445 = vmatpush.msrb.mxu1 %v5426_v0  ;;  %v8842_v1 = vld [vmem:[#allocation20_spill] sm:$0xff] }
 0x4f7   : > { %5411 = vrot.lane.b32.xlu1 %v5403_v34, %s6479_s25  ;;  %v8844_v0 = vld [vmem:[#allocation24_spill] sm:$0xff] }
 0x4f8   : > { %v3911_v56 = vpop.f32.mrf.mxu2  ;;  %5446 = vmatpush.msrb.mxu1 %v5425_v61 }
 0x4f9   : > { %v3993_v52 = vadd.f32 %v3911_v56, %v3458_v23  ;;  %v4445_v13 = vpop.f32.mrf.mxu3  ;;  %v3459_v23 = vadd.f32 %v3379_v20, %v8839_v8  ;;  %v3391_v32 = vpop.f32.mrf.mxu1 }
 0x4fa   : > { %v4985_v48 = vpop.f32.mrf.mxu0 }
 0x4fb   : > { %v4527_v42 = vadd.f32 %v4445_v13, %v3993_v52 }
 0x4fd   : > { %v8595_v38 = vadd.f32 %v4979_v7, %v4527_v42 }
 0x500   : > { %v3914_v37 = vpop.f32.mrf.mxu2 }
 0x501   : > { %v3994_v45 = vadd.f32 %v3914_v37, %v3459_v23  ;;  %v4448_v15 = vpop.f32.mrf.mxu3  ;;  %v3394_v18 = vpop.f32.mrf.mxu1 }
 0x502   : > { %v4988_v7 = vpop.f32.mrf.mxu0  ;;  %v3464_v25 = vadd.f32 %v3394_v18, %v8842_v1 }
 0x503   : > { %v4528_v59 = vadd.f32 %v4448_v15, %v3994_v45 }
 0x505   : > { %v5062_v17 = vadd.f32 %v4982_v35, %v4528_v59 }
 0x507   : > { %v6345_v21 = vpack.i.bf16 %v5062_v17, %v8554_v16  ;;  %v8843_v17 = vld [vmem:[#allocation22_spill] sm:$0xff] }
 0x508   : > { %v3917_v20 = vpop.f32.mrf.mxu2 }
 0x509   : > { %v3995_v26 = vadd.f32 %v3917_v20, %v3460_v10  ;;  %6346 = vxpose.xlu0.b32.start [1/8] (short) (narrow) %v6345_v21, 8  ;;  %v4451_v62 = vpop.f32.mrf.mxu3  ;;  %v3397_v31 = vpop.f32.mrf.mxu1 }
 0x50a   : > { %v4991_v19 = vpop.f32.mrf.mxu0  ;;  %v3465_v50 = vadd.f32 %v3397_v31, %v8843_v17 }
 0x50b   : > { %v4529_v29 = vadd.f32 %v4451_v62, %v3995_v26 }
 0x50d   : > { %v5063_v5 = vadd.f32 %v4985_v48, %v4529_v29 }
 0x50f   : > { %v6347_v35 = vpack.i.bf16 %v5063_v5, %v8561_v60  ;;  %v8841_v60 = vld [vmem:[#allocation18_spill] sm:$0xff] }
 0x510   : > { %v3920_v30 = vpop.f32.mrf.mxu2  ;;  %v3463_v36 = vadd.f32 %v3391_v32, %v8841_v60  ;;  %v5347_v32 = vperm.slane %v5336_v49, 0 }
 0x511   : > { %v3996_v41 = vadd.f32 %v3920_v30, %v3461_v39  ;;  %6348 = vxpose.xlu0.b32.cont [2/8] (short) (narrow) %v6347_v35, 8  ;;  %v4454_v16 = vpop.f32.mrf.mxu3  ;;  %v3400_v62 = vpop.f32.mrf.mxu1 }
 0x512   : > { %v4994_v6 = vpop.f32.mrf.mxu0  ;;  %v3466_v28 = vadd.f32 %v3400_v62, %v8844_v0 }
 0x513   : > { %v4530_v57 = vadd.f32 %v4454_v16, %v3996_v41 }
 0x515   : > { %v5064_v56 = vadd.f32 %v4988_v7, %v4530_v57  ;;  %v5345_v57 = vperm.slane %v5335_v3, 0 }
 0x517   : > { %v6349_v9 = vpack.i.bf16 %v5064_v56, %v8564_v53  ;;  %v5424_v53 = vld [vmem:[%s8821_s2 + $0x20] sm:$0xff]  ;;  %v5346_v56 = vperm.slane %v8584_v44, 0  ;;  %s6380_s2 = sshra.s32 %s5480_s1, 4  ;;  %s6381_s2 = int_to_ptr.hbm [resolvable:$true] %s6380_s2 }
 0x518   : > { %v3923_v52 = vpop.f32.mrf.mxu2  ;;  %5447 = vmatpush.msrb.mxu1 %v5424_v53  ;;  %s6382_s26 = scalar_lea.hbm %s6381_s2, 16  ;;  %p6387_p6 = scmp.lt.s32.totalorder %s6381_s2, %s8732_s3 }
 0x519   : > { %v3997_v13 = vadd.f32 %v3923_v52, %v3462_v43  ;;  %6350 = vxpose.xlu0.b32.cont [3/8] (short) (narrow) %v6349_v9, 8  ;;  %v4457_v12 = vpop.f32.mrf.mxu3  ;;  %v5349_v43 = vperm.slane %v5337_v27, 0  ;;  %v5363_v9 = vsel %vm5362_vm6, %v5345_v57, %v8588_v47  ;;  %p6383_p2 = scmp.ne.s32.totalorder %s6381_s2, %s6382_s26  ;;  %p6388_p8 = scmp.lt.s32.totalorder %s6386_s17, %s6382_s26 }
 0x51a   : > { %v4997_v37 = vpop.f32.mrf.mxu0  ;;  %5448 = vmatpush.msrb.mxu1 %v5423_v58  ;;  %v5365_v52 = vsel %vm5364_vm7, %v5346_v56, %v5363_v9 }
 0x51b   : > { %v4531_v42 = vadd.f32 %v4457_v12, %v3997_v13  ;;  %v5367_v3 = vsel %vm5366_vm8, %v5347_v32, %v5365_v52  ;;  %p6384_p3 = pnand %p6383_p2, %p6565_p5  ;;  %p6389_p9 = por %p6388_p8, %p6387_p6 }
 0x51c   : > { %5449 = vmatpush.msrb.mxu1 %v5422_v14 }
 0x51d   : > { %v5065_v51 = vadd.f32 %v4991_v19, %v4531_v42  ;;  %p6385_p4 = pneg %p6384_p3 }
 0x51e   : > { %5450 = vmatpush.msrb.mxu1 %v5421_v54 }
 0x51f   : > { %v6351_v11 = vpack.i.bf16 %v5065_v51, %v8566_v33  ;;  %p6390_p10 = pnand %p6389_p9, %p6385_p4 }
 0x520   : > { %v3926_v22 = vpop.f32.mrf.mxu2  ;;  %5451 = vmatpush.msrb.mxu1 %v5420_v40 }
 0x521   : > { %v3998_v8 = vadd.f32 %v3926_v22, %v3463_v36  ;;  %6352 = vxpose.xlu0.b32.cont [4/8] (short) (narrow) %v6351_v11, 8  ;;  %v4460_v23 = vpop.f32.mrf.mxu3 }
 0x522   : > { %v5000_v20 = vpop.f32.mrf.mxu0 }
 0x523   : > { %v4532_v48 = vadd.f32 %v4460_v23, %v3998_v8 }
 0x525   : > { %v5066_v33 = vadd.f32 %v4994_v6, %v4532_v48 }
 0x527   : > { %v6353_v45 = vpack.i.bf16 %v5066_v33, %v8568_v55 }
 0x528   : > { %v3929_v2 = vpop.f32.mrf.mxu2 }
 0x529   : > { %v3999_v15 = vadd.f32 %v3929_v2, %v3464_v25  ;;  %6354 = vxpose.xlu0.b32.cont [5/8] (short) (narrow) %v6353_v45, 8  ;;  %v4463_v59 = vpop.f32.mrf.mxu3 }
 0x52a   : > { %v5003_v41 = vpop.f32.mrf.mxu0 }
 0x52b   : > { %v4533_v4 = vadd.f32 %v4463_v59, %v3999_v15 }
 0x52d   : > { %v5067_v34 = vadd.f32 %v4997_v37, %v4533_v4 }
 0x52f   : > { %v6355_v10 = vpack.i.bf16 %v5067_v34, %v8573_v24 }
 0x530   : > { %v3932_v21 = vpop.f32.mrf.mxu2 }
 0x531   : > { %v4000_v55 = vadd.f32 %v3932_v21, %v3465_v50  ;;  %6356 = vxpose.xlu0.b32.cont [6/8] (short) (narrow) %v6355_v10, 8  ;;  %v4466_v7 = vpop.f32.mrf.mxu3 }
 0x533   : > { %v4534_v26 = vadd.f32 %v4466_v7, %v4000_v55 }
 0x535   : > { %v5068_v29 = vadd.f32 %v5000_v20, %v4534_v26 }
 0x537   : > { %v6357_v5 = vpack.i.bf16 %v5068_v29, %v8577_v63  ;;  %v5348_v63 = vperm.slane %v8581_v46, 0 }
 0x538   : > { %v3935_v39 = vpop.f32.mrf.mxu2 }
 0x539   : > { %v4001_v35 = vadd.f32 %v3935_v39, %v3466_v28  ;;  %6358 = vxpose.xlu0.b32.cont [7/8] (short) (narrow) %v6357_v5, 8  ;;  %v4469_v30 = vpop.f32.mrf.mxu3  ;;  %v5369_v44 = vsel %vm5368_vm9, %v5348_v63, %v5367_v3 }
 0x53a   : > { %v5371_v13 = vsel %vm5370_vm10, %v5349_v43, %v5369_v44 }
 0x53b   : > { %v4535_v16 = vadd.f32 %v4469_v30, %v4001_v35 }
 0x53d   : > { %v5069_v19 = vadd.f32 %v5003_v41, %v4535_v16 }
 0x53f   : > { %v6359_v24 = vpack.i.bf16 %v5069_v19, %v8595_v38  ;;  %v6340_v38 = vpop.trf.xlu2 }
 0x540   : > { %v6344_v49 = vunpack.i.h.bf16 %v6340_v38  ;;  %v6341_v46 = vunpack.i.l.bf16 %v6340_v38 }
 0x541   : > { %6360 = vxpose.xlu0.b32.end [8/8] (short) (narrow) %v6359_v24, 8 }
 0x542   : > { %v5338_v27 = vrot.slane %v6341_v46, 2  ;;  %v5350_v12 = vperm.slane %v6341_v46, 0  ;;  %v5352_v42 = vperm.slane %v6344_v49, 0  ;;  %v5339_v11 = vrot.slane %v6344_v49, 2 }
 0x543   : > { %v5389_v8 = vperm.slane %v6341_v46, 1  ;;  %v5391_v53 = vperm.slane %v6344_v49, 1 }
 0x544   : > { %v5351_v47 = vperm.slane %v5338_v27, 0  ;;  %v5353_v18 = vperm.slane %v5339_v11, 0  ;;  %v5390_v61 = vperm.slane %v5338_v27, 1  ;;  %v5392_v48 = vperm.slane %v5339_v11, 1 }
 0x546   : > { %v5372_v6 = vsel %vm5358_vm4, %v5351_v47, %v5350_v12  ;;  %v5404_v23 = vsel %vm5358_vm4, %v5390_v61, %v5389_v8 }
 0x547   : > { %v5373_v51 = vsel %vm5360_vm5, %v5352_v42, %v5372_v6  ;;  %v5405_v37 = vsel %vm5360_vm5, %v5391_v53, %v5404_v23 }
 0x548   : > { %v5374_v22 = vsel %vm5362_vm6, %v5353_v18, %v5373_v51  ;;  %v5406_v31 = vsel %vm5362_vm6, %v5392_v48, %v5405_v37 }
 0x569   : > { %v5412_v60 = vpop.permute.xlu1 %5411 }
 0x56a   : > { %v5418_v36 = vsel %vm5417_vm11, %v5371_v13, %v5412_v60 }
 0x56b   : > { %5452 = vmatmul.f32.vlgmr.msrb.gmra.mxu1 %v5418_v36 }
 0x5ad   : > { %v6361_v58 = vpop.trf.xlu0 }
 0x5ae   : > { %v6365_v33 = vunpack.i.h.bf16 %v6361_v58  ;;  %v6362_v14 = vunpack.i.l.bf16 %v6361_v58 }
 0x5b0   : > { %v5341_v1 = vrot.slane %v6365_v33, 2  ;;  %v5340_v25 = vrot.slane %v6362_v14, 2  ;;  %v5354_v45 = vperm.slane %v6362_v14, 0  ;;  %v5393_v54 = vperm.slane %v6362_v14, 1 }
 0x5b1   : > { %v5356_v59 = vperm.slane %v6365_v33, 0  ;;  %v5395_v4 = vperm.slane %v6365_v33, 1 }
 0x5b2   : > { %v5355_v2 = vperm.slane %v5340_v25, 0  ;;  %v5394_v15 = vperm.slane %v5340_v25, 1  ;;  %v5407_v34 = vsel %vm5364_vm7, %v5393_v54, %v5406_v31  ;;  %v5375_v17 = vsel %vm5364_vm7, %v5354_v45, %v5374_v22 }
 0x5b3   : > { %v5396_v50 = vperm.slane %v5341_v1, 1  ;;  %v5357_v21 = vperm.slane %v5341_v1, 0 }
 0x5b4   : > { %v5408_v10 = vsel %vm5366_vm8, %v5394_v15, %v5407_v34  ;;  %v5376_v20 = vsel %vm5366_vm8, %v5355_v2, %v5375_v17 }
 0x5b5   : > { %v5409_v55 = vsel %vm5368_vm9, %v5395_v4, %v5408_v10  ;;  %v5377_v7 = vsel %vm5368_vm9, %v5356_v59, %v5376_v20 }
 0x5b6   : > { %v5410_v26 = vsel %vm5370_vm10, %v5396_v50, %v5409_v55  ;;  %v5378_v62 = vsel %vm5370_vm10, %v5357_v21, %v5377_v7 }
 0x5b7   : > { %5413 = vrot.lane.b32.xlu2 %v5410_v26, %s6479_s25  ;;  %s5477_s25 = sshll.u32 %s206_s9, 4  ;;  %s5478_s25 = int_to_ptr.vmem [resolvable:$true] %s5477_s25 }
 0x5e8   : > { %v5453_v29 = vpop.f32.mrf.mxu1 }
 0x5e9   : > { %5459 = vst [vmem:[%s206_s9] sm:$0xff] %v5453_v29 }
 0x611   : > { %v5414_v0 = vpop.permute.xlu2 %5413 }
 0x612   : > { %v5419_v28 = vsel %vm5417_vm11, %v5378_v62, %v5414_v0 }
 0x613   : > { %5455 = vmatmul.f32.gmra.mxu1 %v5419_v28 }
 0x690   : > { %v5456_v5 = vpop.f32.mrf.mxu1 }
 0x691   : > { %5460 = vst [vmem:[%s206_s9 + $0x8] sm:$0xff] %v5456_v5 }
 0x692   : > { %6393 = shalt.err (!%p6390_p10)
}
 0x693   : > { %s6480_s0 = smov 128   ;;  %s6481_s6 = smov 256  }
 0x694   : > { %s6482_s9 = smov 8  }
 0x695   : > { %6190 = dma.vmem_to_hbm [thread:$0]  (%p6565_p5), %s5478_s25, 256, %s5480_s1, %s5462_s7, %s6480_s0, %s6481_s6, %s6482_s9  }
 0x696 PF: > { %p6196_p11 = scmp.ge.s32.totalorder %s6476_s21, 2  ;;  %s5494_s22 = sand.u32 1, %s6440_s12  }
 0x697   : > { %s5495_s2 = scalar_lea.sflag [#allocation4], %s5494_s22 }
 0x698   : > { %p6193_p12 = pnand %p6196_p11, %p6572_p7 }
 0x69a   : > { %p6194_p13 = pneg %p6193_p12 }
 0x69c   : > { %6435 = dma.done.wait (%p6194_p13), %s5495_s2, 256  }
 0x69d   : > { %6437 = vsyncadd (%p6194_p13), %s5495_s2, 4294967040  ;;  %s16_s21 = sadd.s32 1, %s6476_s21   ;;  %s8845_s1 = sld [smem:[#allocation6_spill]] }
 0x69e   : > { %p13_p0 = scmp.ge.s32.totalorder %s16_s21, 10   ;;  %s8846_s12 = smov %s6444_s13 }
 0x69f   : > { %s8847_s13 = smov %s6448_s14  ;;  %s8848_s14 = smov %s6588_s8 }
 0x6a0   : > { %s8849_s15 = smov %s6464_s18  ;;  %s8850_s16 = smov %s6468_s19 }
 0x6a1   : > { %s8851_s17 = smov %s6472_s20  ;;  %s8852_s18 = smov %s8856_s23 }
 0x6a2   : > { %s8853_s19 = smov %s8860_s24  ;;  %15 = sbr.rel (!%p13_p0) target bundleno = 10 (0xa), region = 78 }
 0x6a3   : > { %s8854_s20 = smov %s8845_s1 }
 0x6a7   :  { %5501 = vsyncpa [#allocation4], 1 }
 0x6a8   :  { %5503 = vsyncpa [#allocation4 + $0x1], 1 }

</bundles_post_ra>
